<compile_context>
chip_gen: v6e
topology: v6e:2x2x1
jax: 0.10.0
libtpu: 0.0.40
codegen_flags: <defaults>
</compile_context>

<pallas_src>
import functools

import jax
import jax.numpy as jnp
from jax import lax
from jax.experimental import pallas as pl
from jax.experimental.pallas import tpu as pltpu

# Small synthetic config (stands in for bert-base: hidden=768, vocab=30522).
VOCAB = 256        # encoder.config.vocab_size
HIDDEN = 128       # encoder.config.hidden_size
EMBED_DIM = 128    # embedding_dim (module default)
FFN = 256          # encoder intermediate size
SEQ = 8
BATCH = 2

PAD_ROWS = 128     # folded (batch*seq) rows padded to a full MXU/vreg-tile height
CLS_ROWS = 8       # sublane-aligned slice holding the B CLS rows (needs B <= 8)

# Single head with head_dim == HIDDEN, so 1/sqrt(HIDDEN) is the correct scale.
# TODO(synk): with a multi-head bert-base encoder this must become head_dim**-0.5.
_ATTN_SCALE = float(HIDDEN) ** -0.5


def _gelu(x):
    # tanh-approx GELU (BERT style), f32 on the VPU/EUP.
    c = jnp.float32(0.7978845608028654)  # sqrt(2/pi)
    return 0.5 * x * (1.0 + jnp.tanh(c * (x + 0.044715 * x * x * x)))


def _layernorm(x, gamma, beta):
    mean = jnp.mean(x, axis=-1, keepdims=True)
    var = jnp.mean((x - mean) * (x - mean), axis=-1, keepdims=True)
    return (x - mean) * lax.rsqrt(var + 1e-12) * gamma + beta


# ---------------------------------------------------------------------------
# Fused kernel: encoder layer (padded batch*seq slab) -> CLS slice -> proj ->
# decoder.  All weights are whole-array VMEM-resident operands.
# ---------------------------------------------------------------------------
def fused_kernel(x_ref, rowkey_ref, colkey_ref,
                 wqkv_ref, bqkv_ref, wo_ref, bo_ref, g1_ref, be1_ref,
                 w1_ref, bf1_ref, w2_ref, bf2_ref, g2_ref, be2_ref,
                 wp_ref, bp_ref, wd1_ref, bd1_ref, wd2_ref, bd2_ref,
                 logits_ref, z_ref, *, num_cls, head_rows):
    x = x_ref[...]                                   # (PAD, H) f32
    xb = x.astype(jnp.bfloat16)

    # --- fused QKV projection: one (PAD,H) x (H,3H) MXU pass ---
    qkv = jnp.dot(xb, wqkv_ref[...],
                  preferred_element_type=jnp.float32) + bqkv_ref[...]
    q = qkv[:, 0:HIDDEN] * jnp.float32(_ATTN_SCALE)  # fold 1/sqrt(H) once
    k = qkv[:, HIDDEN:2 * HIDDEN]
    v = qkv[:, 2 * HIDDEN:3 * HIDDEN]

    # scores[i, j] = q[i] . k[j] -- one (PAD, PAD) slab for the whole batch.
    scores = lax.dot_general(q.astype(jnp.bfloat16), k.astype(jnp.bfloat16),
                             (((1,), (1,)), ((), ())),
                             preferred_element_type=jnp.float32)

    # Block-diagonal + padding mask, built in-kernel from two tiny key vectors:
    # row key == col key  <=>  same batch AND the key token is valid.
    row = jnp.broadcast_to(rowkey_ref[...], scores.shape)   # (PAD,1) -> (PAD,PAD)
    col = jnp.broadcast_to(colkey_ref[...], scores.shape)   # (1,PAD) -> (PAD,PAD)
    scores = scores + jnp.where(row == col, jnp.float32(0.0), jnp.float32(-1e9))

    m = jnp.max(scores, axis=-1, keepdims=True)
    p = jnp.exp(scores - m)
    denom = jnp.sum(p, axis=-1, keepdims=True)
    attn = p * pl.reciprocal(denom, approx=True)     # EUP, not a VALU divide

    ctx = jnp.dot(attn.astype(jnp.bfloat16), v.astype(jnp.bfloat16),
                  preferred_element_type=jnp.float32)
    attn_out = jnp.dot(ctx.astype(jnp.bfloat16), wo_ref[...],
                       preferred_element_type=jnp.float32) + bo_ref[...]

    h1 = _layernorm(x + attn_out, g1_ref[...], be1_ref[...])          # f32

    # --- FFN ---
    ff = _gelu(jnp.dot(h1.astype(jnp.bfloat16), w1_ref[...],
                       preferred_element_type=jnp.float32) + bf1_ref[...])
    ff = jnp.dot(ff.astype(jnp.bfloat16), w2_ref[...],
                 preferred_element_type=jnp.float32) + bf2_ref[...]
    h2 = _layernorm(h1 + ff, g2_ref[...], be2_ref[...])               # (PAD, H)

    # --- CLS rows: seq-major layout puts them in the first `num_cls` rows.
    # Static, sublane-aligned 8-row slice (no selection matmul, no extra input).
    h_cls = h2[0:head_rows, :]                                        # (8, H)

    # --- head: z = proj(h_cls); logits = decoder(z) ---
    z = jnp.dot(h_cls.astype(jnp.bfloat16), wp_ref[...],
                preferred_element_type=jnp.float32) + bp_ref[...]
    t = jnp.tanh(jnp.dot(z.astype(jnp.bfloat16), wd1_ref[...],
                         preferred_element_type=jnp.float32) + bd1_ref[...])
    logits = jnp.dot(t.astype(jnp.bfloat16), wd2_ref[...],
                     preferred_element_type=jnp.float32) + bd2_ref[...]

    z_ref[...] = z[0:num_cls, :]
    logits_ref[...] = logits[0:num_cls, :]


# ---------------------------------------------------------------------------
# Parameters (deterministic, synthetic). Matmul weights in bf16, rest in f32.
# ---------------------------------------------------------------------------
def init_params(key):
    mm_shapes = [  # MXU operands -> bf16
        ("wqkv", (HIDDEN, 3 * HIDDEN)), ("wo", (HIDDEN, HIDDEN)),
        ("w1", (HIDDEN, FFN)), ("w2", (FFN, HIDDEN)),
        ("wp", (HIDDEN, EMBED_DIM)), ("wd1", (EMBED_DIM, HIDDEN)),
        ("wd2", (HIDDEN, VOCAB)),
    ]
    f32_shapes = [  # embeddings, biases -> f32
        ("word_emb", (VOCAB, HIDDEN)), ("pos_emb", (SEQ, HIDDEN)),
        ("bqkv", (1, 3 * HIDDEN)), ("bo", (1, HIDDEN)),
        ("bf1", (1, FFN)), ("bf2", (1, HIDDEN)),
        ("bp", (1, EMBED_DIM)), ("bd1", (1, HIDDEN)), ("bd2", (1, VOCAB)),
    ]
    keys = jax.random.split(key, len(mm_shapes) + len(f32_shapes))
    params = {}
    for (n, s), k in zip(mm_shapes, keys[:len(mm_shapes)]):
        params[n] = (0.02 * jax.random.normal(k, s, jnp.float32)).astype(jnp.bfloat16)
    for (n, s), k in zip(f32_shapes, keys[len(mm_shapes):]):
        params[n] = 0.02 * jax.random.normal(k, s, jnp.float32)
    # LayerNorm affine params (f32).
    params["g1"] = jnp.ones((1, HIDDEN), jnp.float32)
    params["be1"] = jnp.zeros((1, HIDDEN), jnp.float32)
    params["g2"] = jnp.ones((1, HIDDEN), jnp.float32)
    params["be2"] = jnp.zeros((1, HIDDEN), jnp.float32)
    return params


def _vmem_spec():
    # Grid-invariant whole-array operand, resident in VMEM (~0.6 MiB total —
    # far under every generation's VMEM limit, no double-buffering needed).
    # TODO(synk): with real bert-base shapes (hidden=768, vocab=30522, 12
    # layers) weights no longer fit VMEM; this must become a grid with
    # BlockSpec-streamed, double-buffered weight tiles (smaller tiles on v7x)
    # plus an explicit vmem_limit_bytes.
    return pl.BlockSpec(memory_space=pltpu.MemorySpace.VMEM)


# ---------------------------------------------------------------------------
# Forward pass (mirrors PatchAutoencoder.forward).
# ---------------------------------------------------------------------------
@jax.jit
def patch_autoencoder_forward(params, input_ids, attention_mask):
    B, S = input_ids.shape
    BS = B * S
    assert BS <= PAD_ROWS and B <= CLS_ROWS <= PAD_ROWS

    # Glue (plain JAX): embedding gather + seq-major fold + row padding to 128.
    x = params["word_emb"][input_ids] + params["pos_emb"][None, :S, :]   # (B,S,H)
    x_sm = jnp.transpose(x, (1, 0, 2)).reshape(BS, HIDDEN)               # row = s*B + b
    x_pad = jnp.zeros((PAD_ROWS, HIDDEN), jnp.float32).at[:BS, :].set(x_sm)

    # Tiny mask keys (1 KiB total) instead of a dense (BS,BS) f32 bias:
    #   row r is a query of batch (r % B); column j is attendable iff it is a
    #   valid token of the same batch. Padding rows/cols get sentinels that
    #   never match (their softmax stays finite and their outputs are unused).
    r = jnp.arange(PAD_ROWS, dtype=jnp.int32)
    rowkey = jnp.where(r < BS, (r % B).astype(jnp.float32),
                       jnp.float32(-2.0)).reshape(PAD_ROWS, 1)
    valid_sm = jnp.transpose(attention_mask, (1, 0)).reshape(BS) > 0
    colkey_real = jnp.where(
        valid_sm,
        (jnp.arange(BS, dtype=jnp.int32) % B).astype(jnp.float32),
        jnp.float32(-1.0))
    colkey = jnp.full((PAD_ROWS,), -1.0, jnp.float32).at[:BS].set(
        colkey_real).reshape(1, PAD_ROWS)

    order = ["wqkv", "bqkv", "wo", "bo", "g1", "be1",
             "w1", "bf1", "w2", "bf2", "g2", "be2",
             "wp", "bp", "wd1", "bd1", "wd2", "bd2"]
    weights = [params[n] for n in order]
    inputs = [x_pad, rowkey, colkey] + weights

    kernel = functools.partial(fused_kernel, num_cls=B, head_rows=CLS_ROWS)
    recon_logits, z = pl.pallas_call(
        kernel,
        out_shape=(jax.ShapeDtypeStruct((B, VOCAB), jnp.float32),
                   jax.ShapeDtypeStruct((B, EMBED_DIM), jnp.float32)),
        in_specs=[_vmem_spec() for _ in inputs],
        out_specs=(_vmem_spec(), _vmem_spec()),
    )(*inputs)

    return recon_logits, z


if __name__ == "__main__":
    root = jax.random.PRNGKey(0)
    k_param, k_ids = jax.random.split(root)

    params = init_params(k_param)
    input_ids = jax.random.randint(k_ids, (BATCH, SEQ), 0, VOCAB, dtype=jnp.int32)
    attention_mask = jnp.ones((BATCH, SEQ), jnp.int32).at[1, SEQ - 2:].set(0)

    recon_logits, z = patch_autoencoder_forward(params, input_ids, attention_mask)
    jax.block_until_ready((recon_logits, z))

    assert recon_logits.shape == (BATCH, VOCAB) and recon_logits.dtype == jnp.float32
    assert z.shape == (BATCH, EMBED_DIM) and z.dtype == jnp.float32
    assert bool(jnp.all(jnp.isfinite(recon_logits))) and bool(jnp.all(jnp.isfinite(z)))
    print("KERNEL_OK")
</pallas_src>

<mosaic_0001>
module attributes {stable_mosaic.version = 11 : i64} {
  func.func @fused_kernel(%arg0: memref<128x128xf32, #tpu.memory_space<vmem>>, %arg1: memref<128x1xf32, #tpu.memory_space<vmem>>, %arg2: memref<1x128xf32, #tpu.memory_space<vmem>>, %arg3: memref<128x384xbf16, #tpu.memory_space<vmem>>, %arg4: memref<1x384xf32, #tpu.memory_space<vmem>>, %arg5: memref<128x128xbf16, #tpu.memory_space<vmem>>, %arg6: memref<1x128xf32, #tpu.memory_space<vmem>>, %arg7: memref<1x128xf32, #tpu.memory_space<vmem>>, %arg8: memref<1x128xf32, #tpu.memory_space<vmem>>, %arg9: memref<128x256xbf16, #tpu.memory_space<vmem>>, %arg10: memref<1x256xf32, #tpu.memory_space<vmem>>, %arg11: memref<256x128xbf16, #tpu.memory_space<vmem>>, %arg12: memref<1x128xf32, #tpu.memory_space<vmem>>, %arg13: memref<1x128xf32, #tpu.memory_space<vmem>>, %arg14: memref<1x128xf32, #tpu.memory_space<vmem>>, %arg15: memref<128x128xbf16, #tpu.memory_space<vmem>>, %arg16: memref<1x128xf32, #tpu.memory_space<vmem>>, %arg17: memref<128x128xbf16, #tpu.memory_space<vmem>>, %arg18: memref<1x128xf32, #tpu.memory_space<vmem>>, %arg19: memref<128x256xbf16, #tpu.memory_space<vmem>>, %arg20: memref<1x256xf32, #tpu.memory_space<vmem>>, %arg21: memref<2x256xf32, #tpu.memory_space<vmem>>, %arg22: memref<2x128xf32, #tpu.memory_space<vmem>>) attributes {dimension_semantics = [], scalar_prefetch = 0 : i64, scratch_operands = 0 : i64, tpu.core_type = #tpu.core_type<tc>} {
    %c0 = arith.constant 0 : index
    %c0_0 = arith.constant 0 : index
    %0 = vector.load %arg0[%c0, %c0_0] : memref<128x128xf32, #tpu.memory_space<vmem>>, vector<128x128xf32>
    %1 = arith.truncf %0 : vector<128x128xf32> to vector<128x128xbf16>
    %c0_1 = arith.constant 0 : index
    %c0_2 = arith.constant 0 : index
    %2 = vector.load %arg3[%c0_1, %c0_2] : memref<128x384xbf16, #tpu.memory_space<vmem>>, vector<128x384xbf16>
    %cst = arith.constant dense<0.000000e+00> : vector<128x384xf32>
    %3 = tpu.matmul %1, %2, %cst {dimension_numbers = #tpu.dot_dimension_numbers<[1], [0], [0], [1], [0, 0, 1, 1], [], []>} : vector<128x128xbf16>, vector<128x384xbf16>, vector<128x384xf32> -> vector<128x384xf32>
    %c0_3 = arith.constant 0 : index
    %c0_4 = arith.constant 0 : index
    %4 = vector.load %arg4[%c0_3, %c0_4] : memref<1x384xf32, #tpu.memory_space<vmem>>, vector<1x384xf32>
    %5 = vector.broadcast %4 : vector<1x384xf32> to vector<128x384xf32>
    %6 = arith.addf %3, %5 : vector<128x384xf32>
    %7 = vector.extract_strided_slice %6 {offsets = [0, 0], sizes = [128, 128], strides = [1, 1]} : vector<128x384xf32> to vector<128x128xf32>
    %cst_5 = arith.constant 0.0883883461 : f32
    %8 = vector.broadcast %cst_5 : f32 to vector<128x128xf32>
    %9 = arith.mulf %7, %8 : vector<128x128xf32>
    %10 = vector.extract_strided_slice %6 {offsets = [0, 128], sizes = [128, 128], strides = [1, 1]} : vector<128x384xf32> to vector<128x128xf32>
    %11 = vector.extract_strided_slice %6 {offsets = [0, 256], sizes = [128, 128], strides = [1, 1]} : vector<128x384xf32> to vector<128x128xf32>
    %12 = arith.truncf %9 : vector<128x128xf32> to vector<128x128xbf16>
    %13 = arith.truncf %10 : vector<128x128xf32> to vector<128x128xbf16>
    %cst_6 = arith.constant dense<0.000000e+00> : vector<128x128xf32>
    %14 = tpu.matmul %12, %13, %cst_6 {dimension_numbers = #tpu.dot_dimension_numbers<[1], [1], [0], [0], [0, 0, 1, 0], [], []>} : vector<128x128xbf16>, vector<128x128xbf16>, vector<128x128xf32> -> vector<128x128xf32>
    %c0_7 = arith.constant 0 : index
    %c0_8 = arith.constant 0 : index
    %15 = vector.load %arg1[%c0_7, %c0_8] : memref<128x1xf32, #tpu.memory_space<vmem>>, vector<128x1xf32>
    %16 = vector.shape_cast %15 : vector<128x1xf32> to vector<128x1xf32>
    %17 = vector.broadcast %16 : vector<128x1xf32> to vector<128x128xf32>
    %c0_9 = arith.constant 0 : index
    %c0_10 = arith.constant 0 : index
    %18 = vector.load %arg2[%c0_9, %c0_10] : memref<1x128xf32, #tpu.memory_space<vmem>>, vector<1x128xf32>
    %19 = vector.shape_cast %18 : vector<1x128xf32> to vector<1x128xf32>
    %20 = vector.broadcast %19 : vector<1x128xf32> to vector<128x128xf32>
    %21 = arith.cmpf oeq, %17, %20 : vector<128x128xf32>
    %cst_11 = arith.constant 0.000000e+00 : f32
    %cst_12 = arith.constant -1.000000e+09 : f32
    %22 = vector.broadcast %cst_11 : f32 to vector<128x128xf32>
    %23 = vector.broadcast %cst_12 : f32 to vector<128x128xf32>
    %24 = arith.select %21, %22, %23 : vector<128x128xi1>, vector<128x128xf32>
    %25 = arith.addf %14, %24 : vector<128x128xf32>
    %cst_13 = arith.constant dense<0xFF800000> : vector<128xf32>
    %26 = vector.multi_reduction <maximumf>, %25, %cst_13 [1] : vector<128x128xf32> to vector<128xf32>
    %27 = vector.shape_cast %26 : vector<128xf32> to vector<128x1xf32>
    %28 = vector.broadcast %27 : vector<128x1xf32> to vector<128x128xf32>
    %29 = arith.subf %25, %28 : vector<128x128xf32>
    %30 = math.exp %29 : vector<128x128xf32>
    %cst_14 = arith.constant dense<0.000000e+00> : vector<128xf32>
    %31 = vector.multi_reduction <add>, %30, %cst_14 [1] : vector<128x128xf32> to vector<128xf32>
    %32 = vector.shape_cast %31 : vector<128xf32> to vector<128x1xf32>
    %33 = tpu.reciprocal %32 {approx = true} : vector<128x1xf32> -> vector<128x1xf32>
    %34 = vector.broadcast %33 : vector<128x1xf32> to vector<128x128xf32>
    %35 = arith.mulf %30, %34 : vector<128x128xf32>
    %36 = arith.truncf %35 : vector<128x128xf32> to vector<128x128xbf16>
    %37 = arith.truncf %11 : vector<128x128xf32> to vector<128x128xbf16>
    %cst_15 = arith.constant dense<0.000000e+00> : vector<128x128xf32>
    %38 = tpu.matmul %36, %37, %cst_15 {dimension_numbers = #tpu.dot_dimension_numbers<[1], [0], [0], [1], [0, 0, 1, 1], [], []>} : vector<128x128xbf16>, vector<128x128xbf16>, vector<128x128xf32> -> vector<128x128xf32>
    %39 = arith.truncf %38 : vector<128x128xf32> to vector<128x128xbf16>
    %c0_16 = arith.constant 0 : index
    %c0_17 = arith.constant 0 : index
    %40 = vector.load %arg5[%c0_16, %c0_17] : memref<128x128xbf16, #tpu.memory_space<vmem>>, vector<128x128xbf16>
    %cst_18 = arith.constant dense<0.000000e+00> : vector<128x128xf32>
    %41 = tpu.matmul %39, %40, %cst_18 {dimension_numbers = #tpu.dot_dimension_numbers<[1], [0], [0], [1], [0, 0, 1, 1], [], []>} : vector<128x128xbf16>, vector<128x128xbf16>, vector<128x128xf32> -> vector<128x128xf32>
    %c0_19 = arith.constant 0 : index
    %c0_20 = arith.constant 0 : index
    %42 = vector.load %arg6[%c0_19, %c0_20] : memref<1x128xf32, #tpu.memory_space<vmem>>, vector<1x128xf32>
    %43 = vector.broadcast %42 : vector<1x128xf32> to vector<128x128xf32>
    %44 = arith.addf %41, %43 : vector<128x128xf32>
    %45 = arith.addf %0, %44 : vector<128x128xf32>
    %c0_21 = arith.constant 0 : index
    %c0_22 = arith.constant 0 : index
    %46 = vector.load %arg7[%c0_21, %c0_22] : memref<1x128xf32, #tpu.memory_space<vmem>>, vector<1x128xf32>
    %c0_23 = arith.constant 0 : index
    %c0_24 = arith.constant 0 : index
    %47 = vector.load %arg8[%c0_23, %c0_24] : memref<1x128xf32, #tpu.memory_space<vmem>>, vector<1x128xf32>
    %cst_25 = arith.constant dense<0.000000e+00> : vector<128xf32>
    %48 = vector.multi_reduction <add>, %45, %cst_25 [1] : vector<128x128xf32> to vector<128xf32>
    %49 = vector.shape_cast %48 : vector<128xf32> to vector<128x1xf32>
    %cst_26 = arith.constant 1.280000e+02 : f32
    %50 = vector.broadcast %cst_26 : f32 to vector<128x1xf32>
    %51 = arith.divf %49, %50 : vector<128x1xf32>
    %52 = vector.broadcast %51 : vector<128x1xf32> to vector<128x128xf32>
    %53 = arith.subf %45, %52 : vector<128x128xf32>
    %54 = vector.broadcast %51 : vector<128x1xf32> to vector<128x128xf32>
    %55 = arith.subf %45, %54 : vector<128x128xf32>
    %56 = arith.mulf %53, %55 : vector<128x128xf32>
    %cst_27 = arith.constant dense<0.000000e+00> : vector<128xf32>
    %57 = vector.multi_reduction <add>, %56, %cst_27 [1] : vector<128x128xf32> to vector<128xf32>
    %58 = vector.shape_cast %57 : vector<128xf32> to vector<128x1xf32>
    %cst_28 = arith.constant 1.280000e+02 : f32
    %59 = vector.broadcast %cst_28 : f32 to vector<128x1xf32>
    %60 = arith.divf %58, %59 : vector<128x1xf32>
    %61 = vector.broadcast %51 : vector<128x1xf32> to vector<128x128xf32>
    %62 = arith.subf %45, %61 : vector<128x128xf32>
    %cst_29 = arith.constant 9.99999996E-13 : f32
    %63 = vector.broadcast %cst_29 : f32 to vector<128x1xf32>
    %64 = arith.addf %60, %63 : vector<128x1xf32>
    %65 = math.rsqrt %64 : vector<128x1xf32>
    %66 = vector.broadcast %65 : vector<128x1xf32> to vector<128x128xf32>
    %67 = arith.mulf %62, %66 : vector<128x128xf32>
    %68 = vector.broadcast %46 : vector<1x128xf32> to vector<128x128xf32>
    %69 = arith.mulf %67, %68 : vector<128x128xf32>
    %70 = vector.broadcast %47 : vector<1x128xf32> to vector<128x128xf32>
    %71 = arith.addf %69, %70 : vector<128x128xf32>
    %72 = arith.truncf %71 : vector<128x128xf32> to vector<128x128xbf16>
    %c0_30 = arith.constant 0 : index
    %c0_31 = arith.constant 0 : index
    %73 = vector.load %arg9[%c0_30, %c0_31] : memref<128x256xbf16, #tpu.memory_space<vmem>>, vector<128x256xbf16>
    %cst_32 = arith.constant dense<0.000000e+00> : vector<128x256xf32>
    %74 = tpu.matmul %72, %73, %cst_32 {dimension_numbers = #tpu.dot_dimension_numbers<[1], [0], [0], [1], [0, 0, 1, 1], [], []>} : vector<128x128xbf16>, vector<128x256xbf16>, vector<128x256xf32> -> vector<128x256xf32>
    %c0_33 = arith.constant 0 : index
    %c0_34 = arith.constant 0 : index
    %75 = vector.load %arg10[%c0_33, %c0_34] : memref<1x256xf32, #tpu.memory_space<vmem>>, vector<1x256xf32>
    %76 = vector.broadcast %75 : vector<1x256xf32> to vector<128x256xf32>
    %77 = arith.addf %74, %76 : vector<128x256xf32>
    %cst_35 = arith.constant 5.000000e-01 : f32
    %78 = vector.broadcast %cst_35 : f32 to vector<128x256xf32>
    %79 = arith.mulf %78, %77 : vector<128x256xf32>
    %cst_36 = arith.constant 4.471500e-02 : f32
    %80 = vector.broadcast %cst_36 : f32 to vector<128x256xf32>
    %81 = arith.mulf %80, %77 : vector<128x256xf32>
    %82 = arith.mulf %81, %77 : vector<128x256xf32>
    %83 = arith.mulf %82, %77 : vector<128x256xf32>
    %84 = arith.addf %77, %83 : vector<128x256xf32>
    %cst_37 = arith.constant 0.797884583 : f32
    %85 = vector.broadcast %cst_37 : f32 to vector<128x256xf32>
    %86 = arith.mulf %85, %84 : vector<128x256xf32>
    %87 = math.tanh %86 : vector<128x256xf32>
    %cst_38 = arith.constant 1.000000e+00 : f32
    %88 = vector.broadcast %cst_38 : f32 to vector<128x256xf32>
    %89 = arith.addf %88, %87 : vector<128x256xf32>
    %90 = arith.mulf %79, %89 : vector<128x256xf32>
    %91 = arith.truncf %90 : vector<128x256xf32> to vector<128x256xbf16>
    %c0_39 = arith.constant 0 : index
    %c0_40 = arith.constant 0 : index
    %92 = vector.load %arg11[%c0_39, %c0_40] : memref<256x128xbf16, #tpu.memory_space<vmem>>, vector<256x128xbf16>
    %cst_41 = arith.constant dense<0.000000e+00> : vector<128x128xf32>
    %93 = tpu.matmul %91, %92, %cst_41 {dimension_numbers = #tpu.dot_dimension_numbers<[1], [0], [0], [1], [0, 0, 1, 1], [], []>} : vector<128x256xbf16>, vector<256x128xbf16>, vector<128x128xf32> -> vector<128x128xf32>
    %c0_42 = arith.constant 0 : index
    %c0_43 = arith.constant 0 : index
    %94 = vector.load %arg12[%c0_42, %c0_43] : memref<1x128xf32, #tpu.memory_space<vmem>>, vector<1x128xf32>
    %95 = vector.broadcast %94 : vector<1x128xf32> to vector<128x128xf32>
    %96 = arith.addf %93, %95 : vector<128x128xf32>
    %97 = arith.addf %71, %96 : vector<128x128xf32>
    %c0_44 = arith.constant 0 : index
    %c0_45 = arith.constant 0 : index
    %98 = vector.load %arg13[%c0_44, %c0_45] : memref<1x128xf32, #tpu.memory_space<vmem>>, vector<1x128xf32>
    %c0_46 = arith.constant 0 : index
    %c0_47 = arith.constant 0 : index
    %99 = vector.load %arg14[%c0_46, %c0_47] : memref<1x128xf32, #tpu.memory_space<vmem>>, vector<1x128xf32>
    %cst_48 = arith.constant dense<0.000000e+00> : vector<128xf32>
    %100 = vector.multi_reduction <add>, %97, %cst_48 [1] : vector<128x128xf32> to vector<128xf32>
    %101 = vector.shape_cast %100 : vector<128xf32> to vector<128x1xf32>
    %cst_49 = arith.constant 1.280000e+02 : f32
    %102 = vector.broadcast %cst_49 : f32 to vector<128x1xf32>
    %103 = arith.divf %101, %102 : vector<128x1xf32>
    %104 = vector.broadcast %103 : vector<128x1xf32> to vector<128x128xf32>
    %105 = arith.subf %97, %104 : vector<128x128xf32>
    %106 = vector.broadcast %103 : vector<128x1xf32> to vector<128x128xf32>
    %107 = arith.subf %97, %106 : vector<128x128xf32>
    %108 = arith.mulf %105, %107 : vector<128x128xf32>
    %cst_50 = arith.constant dense<0.000000e+00> : vector<128xf32>
    %109 = vector.multi_reduction <add>, %108, %cst_50 [1] : vector<128x128xf32> to vector<128xf32>
    %110 = vector.shape_cast %109 : vector<128xf32> to vector<128x1xf32>
    %cst_51 = arith.constant 1.280000e+02 : f32
    %111 = vector.broadcast %cst_51 : f32 to vector<128x1xf32>
    %112 = arith.divf %110, %111 : vector<128x1xf32>
    %113 = vector.broadcast %103 : vector<128x1xf32> to vector<128x128xf32>
    %114 = arith.subf %97, %113 : vector<128x128xf32>
    %cst_52 = arith.constant 9.99999996E-13 : f32
    %115 = vector.broadcast %cst_52 : f32 to vector<128x1xf32>
    %116 = arith.addf %112, %115 : vector<128x1xf32>
    %117 = math.rsqrt %116 : vector<128x1xf32>
    %118 = vector.broadcast %117 : vector<128x1xf32> to vector<128x128xf32>
    %119 = arith.mulf %114, %118 : vector<128x128xf32>
    %120 = vector.broadcast %98 : vector<1x128xf32> to vector<128x128xf32>
    %121 = arith.mulf %119, %120 : vector<128x128xf32>
    %122 = vector.broadcast %99 : vector<1x128xf32> to vector<128x128xf32>
    %123 = arith.addf %121, %122 : vector<128x128xf32>
    %124 = vector.extract_strided_slice %123 {offsets = [0, 0], sizes = [8, 128], strides = [1, 1]} : vector<128x128xf32> to vector<8x128xf32>
    %125 = arith.truncf %124 : vector<8x128xf32> to vector<8x128xbf16>
    %c0_53 = arith.constant 0 : index
    %c0_54 = arith.constant 0 : index
    %126 = vector.load %arg15[%c0_53, %c0_54] : memref<128x128xbf16, #tpu.memory_space<vmem>>, vector<128x128xbf16>
    %cst_55 = arith.constant dense<0.000000e+00> : vector<8x128xf32>
    %127 = tpu.matmul %125, %126, %cst_55 {dimension_numbers = #tpu.dot_dimension_numbers<[1], [0], [0], [1], [0, 0, 1, 1], [], []>} : vector<8x128xbf16>, vector<128x128xbf16>, vector<8x128xf32> -> vector<8x128xf32>
    %c0_56 = arith.constant 0 : index
    %c0_57 = arith.constant 0 : index
    %128 = vector.load %arg16[%c0_56, %c0_57] : memref<1x128xf32, #tpu.memory_space<vmem>>, vector<1x128xf32>
    %129 = vector.broadcast %128 : vector<1x128xf32> to vector<8x128xf32>
    %130 = arith.addf %127, %129 : vector<8x128xf32>
    %131 = arith.truncf %130 : vector<8x128xf32> to vector<8x128xbf16>
    %c0_58 = arith.constant 0 : index
    %c0_59 = arith.constant 0 : index
    %132 = vector.load %arg17[%c0_58, %c0_59] : memref<128x128xbf16, #tpu.memory_space<vmem>>, vector<128x128xbf16>
    %cst_60 = arith.constant dense<0.000000e+00> : vector<8x128xf32>
    %133 = tpu.matmul %131, %132, %cst_60 {dimension_numbers = #tpu.dot_dimension_numbers<[1], [0], [0], [1], [0, 0, 1, 1], [], []>} : vector<8x128xbf16>, vector<128x128xbf16>, vector<8x128xf32> -> vector<8x128xf32>
    %c0_61 = arith.constant 0 : index
    %c0_62 = arith.constant 0 : index
    %134 = vector.load %arg18[%c0_61, %c0_62] : memref<1x128xf32, #tpu.memory_space<vmem>>, vector<1x128xf32>
    %135 = vector.broadcast %134 : vector<1x128xf32> to vector<8x128xf32>
    %136 = arith.addf %133, %135 : vector<8x128xf32>
    %137 = math.tanh %136 : vector<8x128xf32>
    %138 = arith.truncf %137 : vector<8x128xf32> to vector<8x128xbf16>
    %c0_63 = arith.constant 0 : index
    %c0_64 = arith.constant 0 : index
    %139 = vector.load %arg19[%c0_63, %c0_64] : memref<128x256xbf16, #tpu.memory_space<vmem>>, vector<128x256xbf16>
    %cst_65 = arith.constant dense<0.000000e+00> : vector<8x256xf32>
    %140 = tpu.matmul %138, %139, %cst_65 {dimension_numbers = #tpu.dot_dimension_numbers<[1], [0], [0], [1], [0, 0, 1, 1], [], []>} : vector<8x128xbf16>, vector<128x256xbf16>, vector<8x256xf32> -> vector<8x256xf32>
    %c0_66 = arith.constant 0 : index
    %c0_67 = arith.constant 0 : index
    %141 = vector.load %arg20[%c0_66, %c0_67] : memref<1x256xf32, #tpu.memory_space<vmem>>, vector<1x256xf32>
    %142 = vector.broadcast %141 : vector<1x256xf32> to vector<8x256xf32>
    %143 = arith.addf %140, %142 : vector<8x256xf32>
    %144 = vector.extract_strided_slice %130 {offsets = [0, 0], sizes = [2, 128], strides = [1, 1]} : vector<8x128xf32> to vector<2x128xf32>
    %c0_68 = arith.constant 0 : index
    %c0_69 = arith.constant 0 : index
    %145 = vector.load %arg22[%c0_68, %c0_69] : memref<2x128xf32, #tpu.memory_space<vmem>>, vector<2x128xf32>
    tpu.vector_store %arg22[%c0_68, %c0_69], %144 {strides = array<i32>} : memref<2x128xf32, #tpu.memory_space<vmem>>, vector<2x128xf32>,
    %146 = vector.extract_strided_slice %143 {offsets = [0, 0], sizes = [2, 256], strides = [1, 1]} : vector<8x256xf32> to vector<2x256xf32>
    %c0_70 = arith.constant 0 : index
    %c0_71 = arith.constant 0 : index
    %147 = vector.load %arg21[%c0_70, %c0_71] : memref<2x256xf32, #tpu.memory_space<vmem>>, vector<2x256xf32>
    tpu.vector_store %arg21[%c0_70, %c0_71], %146 {strides = array<i32>} : memref<2x256xf32, #tpu.memory_space<vmem>>, vector<2x256xf32>,
    return
  }
}

</mosaic_0001>

<bundles_post_ra>
// kernel: patch_autoencoder_forward.1
= control target key start
LH: loop header
LB: loop body
LE: loop exit
PB: predicated region body
PF: predicated region fallthrough
CT: control target
= control target key end

     0   :  { %s5151_s0 = inlined_call_operand.vmem [shape: f32[128,128], index: 0, kind: input, shape index: {}]   ;;  %s5152_s1 = inlined_call_operand.vmem [shape: f32[128,1], index: 1, kind: input, shape index: {}]   ;;  %s5153_s2 = inlined_call_operand.vmem [shape: f32[1,128], index: 2, kind: input, shape index: {}]   ;;  %s5154_s3 = inlined_call_operand.vmem [shape: bf16[128,384], index: 3, kind: input, shape index: {}]   ;;  %s5155_s4 = inlined_call_operand.hbm [shape: f32[1,384], index: 4, kind: input, shape index: {}]   ;;  %s5156_s5 = inlined_call_operand.vmem [shape: bf16[128,128], index: 5, kind: input, shape index: {}]   ;;  %s5157_s6 = inlined_call_operand.hbm [shape: f32[1,128], index: 6, kind: input, shape index: {}]   ;;  %s5158_s7 = inlined_call_operand.hbm [shape: f32[1,128], index: 7, kind: input, shape index: {}]   ;;  %s5159_s8 = inlined_call_operand.hbm [shape: f32[1,128], index: 8, kind: input, shape index: {}]   ;;  %s5160_s9 = inlined_call_operand.vmem [shape: bf16[128,256], index: 9, kind: input, shape index: {}]   ;;  %s5161_s10 = inlined_call_operand.hbm [shape: f32[1,256], index: 10, kind: input, shape index: {}]   ;;  %s5162_s11 = inlined_call_operand.vmem [shape: bf16[256,128], index: 11, kind: input, shape index: {}]   ;;  %s5163_s12 = inlined_call_operand.hbm [shape: f32[1,128], index: 12, kind: input, shape index: {}]   ;;  %s5164_s13 = inlined_call_operand.hbm [shape: f32[1,128], index: 13, kind: input, shape index: {}]   ;;  %s5165_s14 = inlined_call_operand.hbm [shape: f32[1,128], index: 14, kind: input, shape index: {}]   ;;  %s5166_s15 = inlined_call_operand.hbm [shape: bf16[128,128], index: 15, kind: input, shape index: {}]   ;;  %s5167_s16 = inlined_call_operand.hbm [shape: f32[1,128], index: 16, kind: input, shape index: {}]   ;;  %s5168_s17 = inlined_call_operand.hbm [shape: bf16[128,128], index: 17, kind: input, shape index: {}]   ;;  %s5169_s18 = inlined_call_operand.hbm [shape: f32[1,128], index: 18, kind: input, shape index: {}]   ;;  %s5170_s19 = inlined_call_operand.hbm [shape: bf16[128,256], index: 19, kind: input, shape index: {}]   ;;  %s5171_s20 = inlined_call_operand.hbm [shape: f32[1,256], index: 20, kind: input, shape index: {}]   ;;  %s5172_s21 = inlined_call_operand.hbm [shape: f32[2,256], index: 21, kind: output, shape index: {0}]   ;;  %s5173_s22 = inlined_call_operand.hbm [shape: f32[2,128], index: 22, kind: output, shape index: {1}]  }
   0x1   :  { %5178 = sst [smem:[#allocation38_spill]] %s5151_s0 }
   0x2   :  { %5179 = sst [smem:[#allocation39_spill]] %s5152_s1 }
   0x3   :  { %5180 = sst [smem:[#allocation40_spill]] %s5153_s2 }
   0x4   :  { %5181 = sst [smem:[#allocation41_spill]] %s5154_s3 }
   0x5   :  { %5182 = sst [smem:[#allocation42_spill]] %s5155_s4 }
   0x6   :  { %5183 = sst [smem:[#allocation43_spill]] %s5156_s5 }
   0x7   :  { %5184 = sst [smem:[#allocation44_spill]] %s5157_s6 }
   0x8   :  { %28 = vsyncpa [#allocation3], 0 }
   0x9   :  { %29 = vsyncpa [#allocation6], 0 }
   0xa   :  { %30 = vsyncpa [#allocation9], 0 }
   0xb   :  { %31 = vsyncpa [#allocation12], 0 }
   0xc   :  { %32 = vsyncpa [#allocation15], 0 }
   0xd   :  { %33 = vsyncpa [#allocation18], 0 }
   0xe   :  { %34 = vsyncpa [#allocation21], 0 }
   0xf   :  { %35 = vsyncpa [#allocation24], 0 }
  0x10   :  { %36 = vsyncpa [#allocation4], 0 }
  0x11   :  { %37 = vsyncpa [#allocation27], 0  ;;  %s3876_s3 = smov [#allocation5]   ;;  %s3877_s29 = smov [#allocation8]  }
  0x12   :  { %s64_s28 = sshll.u32 %s3876_s3, 4  ;;  %s84_s30 = sshll.u32 %s3877_s29, 4  ;;  %s65_s28 = int_to_ptr.vmem [resolvable:$true] %s64_s28  ;;  %s85_s30 = int_to_ptr.vmem [resolvable:$true] %s84_s30 }
  0x13   :  { %s3544_s4 = scalar_lea.vmem %s65_s28, 16  ;;  %s3548_s0 = scalar_lea.vmem %s65_s28, 32 }
  0x14   :  { %p3545_p0 = scmp.ne.s32.totalorder %s65_s28, %s3544_s4  ;;  %p3549_p1 = scmp.lt.s32.totalorder %s65_s28, %s65_s28 }
  0x15   :  { %p3550_p2 = scmp.lt.s32.totalorder %s3548_s0, %s3544_s4 }
  0x17   :  { %p3551_p3 = por %p3550_p2, %p3549_p1 }
  0x19   :  { %p3552_p4 = pnand %p3551_p3, %p3545_p0 }
  0x1b   :  { %3555 = shalt.err (!%p3552_p4)
}
  0x1c   :  { %s5185_s5 = sld [smem:[#allocation44_spill]]  ;;  %s3564_s24 = scalar_lea.vmem %s85_s30, 16 }
  0x1d   :  { %p3565_p5 = scmp.ne.s32.totalorder %s85_s30, %s3564_s24  ;;  %s3568_s6 = scalar_lea.vmem %s85_s30, 32 }
  0x1e   :  { %p3569_p6 = scmp.lt.s32.totalorder %s85_s30, %s85_s30  ;;  %p3570_p7 = scmp.lt.s32.totalorder %s3568_s6, %s3564_s24 }
  0x20   :  { %p3571_p8 = por %p3570_p7, %p3569_p6 }
  0x22   :  { %67 = dma.hbm_to_vmem [thread:$0]  %s5185_s5, 16, %s65_s28, [#allocation6]  }
  0x23   :  { %p3572_p9 = pnand %p3571_p8, %p3565_p5 }
  0x25   :  { %3575 = shalt.err (!%p3572_p9)
}
  0x26   :  { %87 = dma.hbm_to_vmem [thread:$0]  %s5159_s8, 16, %s85_s30, [#allocation9]  }
  0x27   :  { %s3878_s2 = smov [#allocation11]   ;;  %s3879_s3 = smov [#allocation14]  }
  0x28   :  { %s108_s27 = sshll.u32 %s3878_s2, 4  ;;  %s128_s29 = sshll.u32 %s3879_s3, 4  ;;  %s109_s27 = int_to_ptr.vmem [resolvable:$true] %s108_s27  ;;  %s129_s29 = int_to_ptr.vmem [resolvable:$true] %s128_s29 }
  0x29   :  { %s3584_s4 = scalar_lea.vmem %s109_s27, 16  ;;  %s3588_s28 = scalar_lea.vmem %s109_s27, 32 }
  0x2a   :  { %p3585_p10 = scmp.ne.s32.totalorder %s109_s27, %s3584_s4  ;;  %p3589_p11 = scmp.lt.s32.totalorder %s109_s27, %s109_s27 }
  0x2b   :  { %p3590_p12 = scmp.lt.s32.totalorder %s3588_s28, %s3584_s4 }
  0x2d   :  { %p3591_p13 = por %p3590_p12, %p3589_p11 }
  0x2f   :  { %p3592_p0 = pnand %p3591_p13, %p3585_p10 }
  0x31   :  { %3595 = shalt.err (!%p3592_p0)
}
  0x32   :  { %111 = dma.hbm_to_vmem [thread:$0]  %s5163_s12, 16, %s109_s27, [#allocation12]  }
  0x33   :  { %s3604_s1 = scalar_lea.vmem %s129_s29, 16  ;;  %s3608_s8 = scalar_lea.vmem %s129_s29, 32 }
  0x34   :  { %p3605_p1 = scmp.ne.s32.totalorder %s129_s29, %s3604_s1  ;;  %p3609_p2 = scmp.lt.s32.totalorder %s129_s29, %s129_s29 }
  0x35   :  { %p3610_p3 = scmp.lt.s32.totalorder %s3608_s8, %s3604_s1 }
  0x37   :  { %p3611_p4 = por %p3610_p3, %p3609_p2 }
  0x39   :  { %p3612_p5 = pnand %p3611_p4, %p3605_p1 }
  0x3b   :  { %3615 = shalt.err (!%p3612_p5)
}
  0x3c   :  { %131 = dma.hbm_to_vmem [thread:$0]  %s5165_s14, 16, %s129_s29, [#allocation15]  }
  0x3d   :  { %s3880_s24 = smov [#allocation17]   ;;  %s3881_s25 = smov [#allocation20]  }
  0x3e   :  { %s150_s6 = sshll.u32 %s3880_s24, 4  ;;  %s172_s26 = sshll.u32 %s3881_s25, 4  ;;  %s151_s6 = int_to_ptr.vmem [resolvable:$true] %s150_s6  ;;  %s173_s26 = int_to_ptr.vmem [resolvable:$true] %s172_s26 }
  0x3f   :  { %s3624_s2 = scalar_lea.vmem %s151_s6, 16  ;;  %s3628_s12 = scalar_lea.vmem %s151_s6, 32 }
  0x40   :  { %p3625_p6 = scmp.ne.s32.totalorder %s151_s6, %s3624_s2  ;;  %p3629_p7 = scmp.lt.s32.totalorder %s151_s6, %s151_s6 }
  0x41   :  { %p3630_p8 = scmp.lt.s32.totalorder %s3628_s12, %s3624_s2 }
  0x43   :  { %p3631_p9 = por %p3630_p8, %p3629_p7 }
  0x45   :  { %p3632_p10 = pnand %p3631_p9, %p3625_p6 }
  0x47   :  { %3635 = shalt.err (!%p3632_p10)
}
  0x48   :  { %153 = dma.hbm_to_vmem [thread:$0]  %s5167_s16, 16, %s151_s6, [#allocation18]  }
  0x49   :  { %s3644_s4 = scalar_lea.vmem %s173_s26, 16  ;;  %s3648_s14 = scalar_lea.vmem %s173_s26, 32 }
  0x4a   :  { %p3645_p11 = scmp.ne.s32.totalorder %s173_s26, %s3644_s4  ;;  %p3649_p12 = scmp.lt.s32.totalorder %s173_s26, %s173_s26 }
  0x4b   :  { %p3650_p13 = scmp.lt.s32.totalorder %s3648_s14, %s3644_s4 }
  0x4d   :  { %p3651_p0 = por %p3650_p13, %p3649_p12 }
  0x4f   :  { %p3652_p1 = pnand %p3651_p0, %p3645_p11 }
  0x51   :  { %3655 = shalt.err (!%p3652_p1)
}
  0x52   :  { %175 = dma.hbm_to_vmem [thread:$0]  %s5169_s18, 16, %s173_s26, [#allocation21]  }
  0x53   :  { %s3882_s0 = smov [#allocation2]   ;;  %s3883_s1 = smov [#allocation7]  }
  0x54   :  { %s52_s23 = sshll.u32 %s3882_s0, 4  ;;  %s74_s8 = sshll.u32 %s3883_s1, 4  ;;  %s53_s23 = int_to_ptr.vmem [resolvable:$true] %s52_s23  ;;  %s75_s8 = int_to_ptr.vmem [resolvable:$true] %s74_s8 }
  0x55   :  { %s3664_s30 = scalar_lea.vmem %s53_s23, 48  ;;  %s3668_s16 = scalar_lea.vmem %s53_s23, 64 }
  0x56   :  { %p3665_p2 = scmp.ne.s32.totalorder %s53_s23, %s3664_s30  ;;  %p3669_p3 = scmp.lt.s32.totalorder %s53_s23, %s53_s23 }
  0x57   :  { %p3670_p4 = scmp.lt.s32.totalorder %s3668_s16, %s3664_s30 }
  0x59   :  { %p3671_p5 = por %p3670_p4, %p3669_p3 }
  0x5b   :  { %p3672_p6 = pnand %p3671_p5, %p3665_p2 }
  0x5d   :  { %3675 = shalt.err (!%p3672_p6)
}
  0x5e   :  { %s5186_s6 = sld [smem:[#allocation42_spill]]  ;;  %s3684_s25 = scalar_lea.vmem %s75_s8, 16 }
  0x5f   :  { %p3685_p7 = scmp.ne.s32.totalorder %s75_s8, %s3684_s25  ;;  %s3688_s18 = scalar_lea.vmem %s75_s8, 32 }
  0x60   :  { %p3689_p8 = scmp.lt.s32.totalorder %s75_s8, %s75_s8  ;;  %p3690_p9 = scmp.lt.s32.totalorder %s3688_s18, %s3684_s25 }
  0x62   :  { %p3691_p10 = por %p3690_p9, %p3689_p8 }
  0x64   :  { %55 = dma.hbm_to_vmem [thread:$0]  %s5186_s6, 48, %s53_s23, [#allocation3]  }
  0x65   :  { %p3692_p11 = pnand %p3691_p10, %p3685_p7 }
  0x67   :  { %3695 = shalt.err (!%p3692_p11)
}
  0x68   :  { %77 = dma.hbm_to_vmem [thread:$0]  %s5158_s7, 16, %s75_s8, [#allocation6]  }
  0x69   :  { %s3884_s12 = smov [#allocation10]   ;;  %s3885_s3 = smov [#allocation13]  }
  0x6a   :  { %s96_s27 = sshll.u32 %s3884_s12, 4  ;;  %s118_s4 = sshll.u32 %s3885_s3, 4  ;;  %s97_s27 = int_to_ptr.vmem [resolvable:$true] %s96_s27  ;;  %s119_s4 = int_to_ptr.vmem [resolvable:$true] %s118_s4 }
  0x6b   :  { %s3704_s14 = scalar_lea.vmem %s97_s27, 32  ;;  %p3709_p13 = scmp.lt.s32.totalorder %s97_s27, %s97_s27 }
  0x6c   :  { %p3705_p12 = scmp.ne.s32.totalorder %s97_s27, %s3704_s14  ;;  %p3710_p0 = scmp.lt.s32.totalorder %s3704_s14, %s3704_s14 }
  0x6e   :  { %p3711_p1 = por %p3710_p0, %p3709_p13 }
  0x70   :  { %p3712_p2 = pnand %p3711_p1, %p3705_p12 }
  0x72   :  { %3715 = shalt.err (!%p3712_p2)
}
  0x73   :  { %99 = dma.hbm_to_vmem [thread:$0]  %s5161_s10, 32, %s97_s27, [#allocation9]  }
  0x74   :  { %s3724_s0 = scalar_lea.vmem %s119_s4, 16  ;;  %s3728_s7 = scalar_lea.vmem %s119_s4, 32 }
  0x75   :  { %p3725_p3 = scmp.ne.s32.totalorder %s119_s4, %s3724_s0  ;;  %p3729_p4 = scmp.lt.s32.totalorder %s119_s4, %s119_s4 }
  0x76   :  { %p3730_p5 = scmp.lt.s32.totalorder %s3728_s7, %s3724_s0 }
  0x78   :  { %p3731_p6 = por %p3730_p5, %p3729_p4 }
  0x7a   :  { %p3732_p7 = pnand %p3731_p6, %p3725_p3 }
  0x7c   :  { %3735 = shalt.err (!%p3732_p7)
}
  0x7d   :  { %121 = dma.hbm_to_vmem [thread:$0]  %s5164_s13, 16, %s119_s4, [#allocation12]  }
  0x7e   :  { %s3886_s8 = smov [#allocation16]  }
  0x7f   :  { %s137_s30 = sshll.u32 %s3886_s8, 4  ;;  %s138_s30 = int_to_ptr.vmem [resolvable:$true] %s137_s30 }
  0x80   :  { %s3744_s16 = scalar_lea.vmem %s138_s30, 1024  ;;  %p3749_p9 = scmp.lt.s32.totalorder %s138_s30, %s138_s30 }
  0x81   :  { %p3745_p8 = scmp.ne.s32.totalorder %s138_s30, %s3744_s16  ;;  %p3750_p10 = scmp.lt.s32.totalorder %s3744_s16, %s3744_s16 }
  0x83   :  { %p3751_p11 = por %p3750_p10, %p3749_p9 }
  0x85   :  { %p3752_p12 = pnand %p3751_p11, %p3745_p8 }
  0x87   :  { %3755 = shalt.err (!%p3752_p12)
}
  0x88   :  { %s3887_s10 = smov 64   ;;  %s3888_s5 = smov 4  }
  0x89   :  { %143 = dma.hbm_to_vmem [thread:$0]  %s5166_s15, 1024, %s138_s30, [#allocation15], %s3887_s10, %s3887_s10, %s3888_s5  }
  0x8a   :  { %s3889_s25 = smov [#allocation19]   ;;  %s3890_s13 = smov [#allocation22]  }
  0x8b   :  { %s159_s18 = sshll.u32 %s3889_s25, 4  ;;  %s181_s26 = sshll.u32 %s3890_s13, 4  ;;  %s160_s18 = int_to_ptr.vmem [resolvable:$true] %s159_s18  ;;  %s182_s26 = int_to_ptr.vmem [resolvable:$true] %s181_s26 }
  0x8c   :  { %s3764_s2 = scalar_lea.vmem %s160_s18, 1024  ;;  %p3769_p0 = scmp.lt.s32.totalorder %s160_s18, %s160_s18 }
  0x8d   :  { %p3765_p13 = scmp.ne.s32.totalorder %s160_s18, %s3764_s2  ;;  %p3770_p1 = scmp.lt.s32.totalorder %s3764_s2, %s3764_s2 }
  0x8f   :  { %p3771_p2 = por %p3770_p1, %p3769_p0 }
  0x91   :  { %p3772_p3 = pnand %p3771_p2, %p3765_p13 }
  0x93   :  { %3775 = shalt.err (!%p3772_p3)
}
  0x94   :  { %165 = dma.hbm_to_vmem [thread:$0]  %s5168_s17, 1024, %s160_s18, [#allocation18], %s3887_s10, %s3887_s10, %s3888_s5  }
  0x95   :  { %s3784_s3 = scalar_lea.vmem %s182_s26, 2048  ;;  %p3789_p5 = scmp.lt.s32.totalorder %s182_s26, %s182_s26 }
  0x96   :  { %p3785_p4 = scmp.ne.s32.totalorder %s182_s26, %s3784_s3  ;;  %p3790_p6 = scmp.lt.s32.totalorder %s3784_s3, %s3784_s3 }
  0x98   :  { %p3791_p7 = por %p3790_p6, %p3789_p5 }
  0x9a   :  { %p3792_p8 = pnand %p3791_p7, %p3785_p4 }
  0x9c   :  { %3795 = shalt.err (!%p3792_p8)
}
  0x9d   :  { %s3891_s15 = smov 128   ;;  %s3892_s4 = smov 8  }
  0x9e   :  { %187 = dma.hbm_to_vmem [thread:$0]  %s5170_s19, 2048, %s182_s26, [#allocation21], %s3891_s15, %s3891_s15, %s3892_s4  }
  0x9f   :  { %s3893_s28 = smov [#allocation23]  }
  0xa0   :  { %s194_s0 = sshll.u32 %s3893_s28, 4  ;;  %s195_s0 = int_to_ptr.vmem [resolvable:$true] %s194_s0 }
  0xa1   :  { %s3804_s7 = scalar_lea.vmem %s195_s0, 32  ;;  %p3809_p10 = scmp.lt.s32.totalorder %s195_s0, %s195_s0 }
  0xa2   :  { %p3805_p9 = scmp.ne.s32.totalorder %s195_s0, %s3804_s7  ;;  %p3810_p11 = scmp.lt.s32.totalorder %s3804_s7, %s3804_s7 }
  0xa4   :  { %p3811_p12 = por %p3810_p11, %p3809_p10 }
  0xa6   :  { %p3812_p13 = pnand %p3811_p12, %p3805_p9 }
  0xa8   :  { %3815 = shalt.err (!%p3812_p13)
}
  0xa9   :  { %197 = dma.hbm_to_vmem [thread:$0]  %s5171_s20, 32, %s195_s0, [#allocation24]  }
  0xaa   :  { %3856 = dma.done.wait [#allocation3], 48  }
  0xab   :  { %3857 = vsyncadd [#allocation3], 4294967248 }
  0xac   :  { %3858 = dma.done.wait [#allocation6], 32  }
  0xad   :  { %3859 = vsyncadd [#allocation6], 4294967264 }
  0xae   :  { %3860 = dma.done.wait [#allocation9], 48  }
  0xaf   :  { %3861 = vsyncadd [#allocation9], 4294967248 }
  0xb0   :  { %3862 = dma.done.wait [#allocation12], 32  }
  0xb1   :  { %3863 = vsyncadd [#allocation12], 4294967264 }
  0xb2   :  { %3864 = dma.done.wait [#allocation15], 1040  }
  0xb3   :  { %3865 = vsyncadd [#allocation15], 4294966256 }
  0xb4   :  { %3866 = dma.done.wait [#allocation18], 1040  }
  0xb5   :  { %3867 = vsyncadd [#allocation18], 4294966256 }
  0xb6   :  { %3868 = dma.done.wait [#allocation21], 2064  }
  0xb7   :  { %3869 = vsyncadd [#allocation21], 4294965232 }
  0xb8   :  { %3870 = dma.done.wait [#allocation24], 32  }
  0xb9   :  { %3871 = vsyncadd [#allocation24], 4294967264  ;;  %v3894_v0 = vmov 0   ;;  %s5187_s1 = sld [smem:[#allocation41_spill]]  ;;  %v299_v41 = vlaneseq  ;;  %v4189_v44 = vld [vmem:[#allocation2] sm:$0x7] }
  0xba   :  { %474 = vmatprep.mubr.bf16.mxu0 %v3894_v0  ;;  %3234 = vset.pattern.permute.xlu0 %v3894_v0  ;;  %s5188_s3 = sld [smem:[#allocation38_spill]] }
  0xbb   :  { %3235 = vset.pattern.permute.xlu1 %v3894_v0  ;;  %v4184_v42 = vshrl.u32 %v299_v41, 7  ;;  %s5189_s15 = sld [smem:[#allocation39_spill]] }
  0xbc   :  { %s5190_s27 = sld [smem:[#allocation40_spill]] }
  0xbd   :  { %v4187_v43 = vsub.s32 0, %v4184_v42  ;;  %v4196_v46 = vsub.s32 1, %v4184_v42  ;;  %s5191_s4 = sld [smem:[#allocation43_spill]] }
  0xbf   :  { %v3236_v1 = vld [vmem:[%s5187_s1 + $0xac] ss:$12 sps:$4 sm:$0xff]   ;;  %v3238_v2 = vld [vmem:[%s5187_s1 + $0xa8] ss:$12 sps:$4 sm:$0xff]   ;;  %v3241_v4 = vld [vmem:[%s5187_s1 + $0x90] ss:$12 sps:$4 sm:$0xff]   ;;  %v4193_v45 = vrot.slane %v4189_v44, %v4187_v43  ;;  %v4201_v50 = vrot.slane %v4189_v44, %v4196_v46 }
  0xc0   :  { %442 = vmatprep.subr.bf16.mxu0 %v3236_v1  ;;  %v3239_v3 = vld [vmem:[%s5187_s1 + $0x94] ss:$12 sps:$4 sm:$0xff]   ;;  %v3242_v5 = vld [vmem:[%s5187_s1 + $0x7c] ss:$12 sps:$4 sm:$0xff]   ;;  %v3244_v6 = vld [vmem:[%s5187_s1 + $0x78] ss:$12 sps:$4 sm:$0xff]  }
  0xc1   :  { %443 = vmatpush1.bf16.msra.mxu0 %v3238_v2  ;;  %v3245_v7 = vld [vmem:[%s5187_s1 + $0x64] ss:$12 sps:$4 sm:$0xff]   ;;  %v3247_v9 = vld [vmem:[%s5187_s1 + $0x60] ss:$12 sps:$4 sm:$0xff]   ;;  %v3250_v13 = vld [vmem:[%s5187_s1 + $0x48] ss:$12 sps:$4 sm:$0xff]  }
  0xc2   :  { %444 = vmatprep.subr.bf16.mxu0 %v3239_v3  ;;  %v241_v8 = vld [vmem:[%s5188_s3] sm:$0xff]  ;;  %v242_v10 = vld [vmem:[%s5188_s3 + $0x8] sm:$0xff]  ;;  %v3253_v15 = vld [vmem:[%s5187_s1 + $0x30] ss:$12 sps:$4 sm:$0xff]  }
  0xc3   :  { %v3248_v11 = vld [vmem:[%s5187_s1 + $0x4c] ss:$12 sps:$4 sm:$0xff]   ;;  %v257_v12 = vpack.c.bf16 %v242_v10, %v241_v8  ;;  %v3251_v14 = vld [vmem:[%s5187_s1 + $0x34] ss:$12 sps:$4 sm:$0xff]   ;;  %v3254_v16 = vld [vmem:[%s5187_s1 + $0x1c] ss:$12 sps:$4 sm:$0xff]  }
  0xc4   :  { %v3256_v17 = vld [vmem:[%s5187_s1 + $0x18] ss:$12 sps:$4 sm:$0xff]   ;;  %v3259_v19 = vld [vmem:[%s5187_s1] ss:$12 sps:$4 sm:$0xff]   ;;  %v243_v20 = vld [vmem:[%s5188_s3 + $0x10] sm:$0xff] }
  0xc5   :  { %445 = vmatpush1.bf16.msra.mxu0 %v3241_v4  ;;  %3058 = vmatprep.mubr.bf16.mxu1 %v257_v12  ;;  %v3257_v18 = vld [vmem:[%s5187_s1 + $0x4] ss:$12 sps:$4 sm:$0xff]   ;;  %v244_v21 = vld [vmem:[%s5188_s3 + $0x18] sm:$0xff]  ;;  %v246_v24 = vld [vmem:[%s5188_s3 + $0x28] sm:$0xff] }
  0xc6   :  { %446 = vmatprep.subr.bf16.mxu0 %v3242_v5  ;;  %v4121_v22 = vpack.c.bf16 %v244_v21, %v243_v20  ;;  %v245_v23 = vld [vmem:[%s5188_s3 + $0x20] sm:$0xff]  ;;  %v247_v26 = vld [vmem:[%s5188_s3 + $0x30] sm:$0xff]  ;;  %v248_v27 = vld [vmem:[%s5188_s3 + $0x38] sm:$0xff] }
  0xc7   :  { %v4131_v25 = vpack.c.bf16 %v246_v24, %v245_v23  ;;  %v4141_v28 = vpack.c.bf16 %v248_v27, %v247_v26  ;;  %v249_v29 = vld [vmem:[%s5188_s3 + $0x40] sm:$0xff]  ;;  %v250_v30 = vld [vmem:[%s5188_s3 + $0x48] sm:$0xff]  ;;  %v251_v32 = vld [vmem:[%s5188_s3 + $0x50] sm:$0xff] }
  0xc8   :  { %v4151_v31 = vpack.c.bf16 %v250_v30, %v249_v29  ;;  %v252_v33 = vld [vmem:[%s5188_s3 + $0x58] sm:$0xff]  ;;  %v253_v35 = vld [vmem:[%s5188_s3 + $0x60] sm:$0xff]  ;;  %v254_v36 = vld [vmem:[%s5188_s3 + $0x68] sm:$0xff] }
  0xc9   :  { %447 = vmatpush1.bf16.msra.mxu0 %v3244_v6  ;;  %v4161_v34 = vpack.c.bf16 %v252_v33, %v251_v32  ;;  %v4171_v37 = vpack.c.bf16 %v254_v36, %v253_v35  ;;  %v255_v38 = vld [vmem:[%s5188_s3 + $0x70] sm:$0xff]  ;;  %v256_v39 = vld [vmem:[%s5188_s3 + $0x78] sm:$0xff]  ;;  %v684_v26 = vld [vmem:[%s5189_s15] sm:$0xff] }
  0xca   :  { %448 = vmatprep.subr.bf16.mxu0 %v3245_v7  ;;  %v4181_v40 = vpack.c.bf16 %v256_v39, %v255_v38  ;;  %v686_v27 = vld [vmem:[%s5189_s15 + $0x10] sm:$0xff]  ;;  %702 = vperm.xlu0 %3234, %v684_v26   ;;  %v685_v32 = vld [vmem:[%s5189_s15 + $0x8] sm:$0xff]  ;;  %v687_v33 = vld [vmem:[%s5189_s15 + $0x18] sm:$0xff] }
  0xcb   :  { %712 = vperm.xlu1 %3235, %v686_v27  }
  0xcd   :  { %449 = vmatpush1.bf16.msra.mxu0 %v3247_v9 }
  0xce   :  { %450 = vmatprep.subr.bf16.mxu0 %v3248_v11  ;;  %707 = vperm.xlu0 %3234, %v685_v32  }
  0xcf   :  { %717 = vperm.xlu1 %3235, %v687_v33  }
  0xd1   :  { %451 = vmatpush1.bf16.msra.mxu0 %v3250_v13 }
  0xd2   :  { %452 = vmatprep.subr.bf16.mxu0 %v3251_v14 }
  0xd5   :  { %453 = vmatpush1.bf16.msra.mxu0 %v3253_v15 }
  0xd6   :  { %454 = vmatprep.subr.bf16.mxu0 %v3254_v16 }
  0xd9   :  { %455 = vmatpush1.bf16.msra.mxu0 %v3256_v17 }
  0xda   :  { %456 = vmatprep.subr.bf16.mxu0 %v3257_v18 }
  0xdd   :  { %457 = vmatpush1.bf16.msra.mxu0 %v3259_v19 }
  0xe0   :  { %475 = vmatmul.mubr.bf16.vlgmr.msra.gmra.mxu0 %v257_v12 }
  0xe1   :  { %484 = vmatprep.mubr.bf16.mxu0 %v3894_v0 }
  0xe8   :  { %485 = vmatmul.mubr.bf16.gmra.mxu0 %v4121_v22 }
  0xe9   :  { %494 = vmatprep.mubr.bf16.mxu0 %v3894_v0 }
  0xf0   :  { %495 = vmatmul.mubr.bf16.gmra.mxu0 %v4131_v25 }
  0xf1   :  { %504 = vmatprep.mubr.bf16.mxu0 %v3894_v0 }
  0xf8   :  { %505 = vmatmul.mubr.bf16.gmra.mxu0 %v4141_v28 }
  0xf9   :  { %514 = vmatprep.mubr.bf16.mxu0 %v3894_v0 }
 0x100   :  { %515 = vmatmul.mubr.bf16.gmra.mxu0 %v4151_v31 }
 0x101   :  { %524 = vmatprep.mubr.bf16.mxu0 %v3894_v0 }
 0x108   :  { %525 = vmatmul.mubr.bf16.gmra.mxu0 %v4161_v34 }
 0x109   :  { %534 = vmatprep.mubr.bf16.mxu0 %v3894_v0 }
 0x110   :  { %535 = vmatmul.mubr.bf16.gmra.mxu0 %v4171_v37 }
 0x111   :  { %544 = vmatprep.mubr.bf16.mxu0 %v3894_v0 }
 0x118   :  { %545 = vmatmul.mubr.bf16.gmra.mxu0 %v4181_v40 }
 0x1a0   :  { %v476_v47 = vpop.f32.mrf.mxu0 }
 0x1a1   :  { %v477_v49 = vadd.f32 %v476_v47, %v4193_v45 }
 0x1a2   :  { %v478_v48 = vpop.f32.mrf.mxu0 }
 0x1a3   :  { %v652_v54 = vmul.f32 0.088388346, %v477_v49  ;;  %v479_v55 = vadd.f32 %v478_v48, %v4201_v50 }
 0x1a4   :  { %v480_v51 = vpop.f32.mrf.mxu0 }
 0x1a5   :  { %v481_v52 = vadd.f32 %v480_v51, %v4193_v45 }
 0x1a6   :  { %v482_v53 = vpop.f32.mrf.mxu0 }
 0x1a7   :  { %v653_v56 = vmul.f32 0.088388346, %v481_v52  ;;  %v483_v57 = vadd.f32 %v482_v53, %v4201_v50 }
 0x1a8   :  { %v486_v58 = vpop.f32.mrf.mxu0 }
 0x1a9   :  { %v668_v59 = vpack.c.bf16 %v653_v56, %v652_v54  ;;  %v4206_v60 = vpack.c.bf16 %v483_v57, %v479_v55  ;;  %v487_v61 = vadd.f32 %v486_v58, %v4193_v45 }
 0x1aa   :  { %v488_v62 = vpop.f32.mrf.mxu0 }
 0x1ab   :  { %3090 = vmatprep.mubr.bf16.mxu0 %v668_v59  ;;  %v4210_v3 = vmul.f32 0.088388346, %v487_v61  ;;  %v489_v4 = vadd.f32 %v488_v62, %v4201_v50 }
 0x1ac   :  { %v490_v63 = vpop.f32.mrf.mxu0 }
 0x1ad   :  { %v491_v1 = vadd.f32 %v490_v63, %v4193_v45 }
 0x1ae   :  { %v492_v2 = vpop.f32.mrf.mxu0 }
 0x1af   :  { %v4213_v5 = vmul.f32 0.088388346, %v491_v1  ;;  %v493_v6 = vadd.f32 %v492_v2, %v4201_v50 }
 0x1b0   :  { %v496_v7 = vpop.f32.mrf.mxu0 }
 0x1b1   :  { %v669_v8 = vpack.c.bf16 %v4213_v5, %v4210_v3  ;;  %v4218_v9 = vpack.c.bf16 %v493_v6, %v489_v4  ;;  %v497_v10 = vadd.f32 %v496_v7, %v4193_v45  ;;  %v3262_v3 = vld [vmem:[%s5187_s1 + $0x80] ss:$12 sps:$4 sm:$0xff]   ;;  %v3263_v5 = vld [vmem:[%s5187_s1 + $0x68] ss:$12 sps:$4 sm:$0xff]  }
 0x1b2   :  { %v498_v11 = vpop.f32.mrf.mxu0 }
 0x1b3   :  { %v4222_v15 = vmul.f32 0.088388346, %v497_v10  ;;  %v499_v16 = vadd.f32 %v498_v11, %v4201_v50 }
 0x1b4   :  { %v500_v12 = vpop.f32.mrf.mxu0 }
 0x1b5   :  { %v501_v13 = vadd.f32 %v500_v12, %v4193_v45 }
 0x1b6   :  { %v502_v14 = vpop.f32.mrf.mxu0 }
 0x1b7   :  { %v4225_v17 = vmul.f32 0.088388346, %v501_v13  ;;  %v503_v18 = vadd.f32 %v502_v14, %v4201_v50 }
 0x1b8   :  { %v506_v19 = vpop.f32.mrf.mxu0 }
 0x1b9   :  { %v670_v20 = vpack.c.bf16 %v4225_v17, %v4222_v15  ;;  %v4230_v21 = vpack.c.bf16 %v503_v18, %v499_v16  ;;  %v507_v23 = vadd.f32 %v506_v19, %v4193_v45  ;;  %v3266_v15 = vld [vmem:[%s5187_s1 + $0x20] ss:$12 sps:$4 sm:$0xff]   ;;  %v3267_v17 = vld [vmem:[%s5187_s1 + $0x8] ss:$12 sps:$4 sm:$0xff]  }
 0x1ba   :  { %v4233_v24 = vpop.f32.mrf.mxu0 }
 0x1bb   :  { %v4248_v36 = vmul.f32 0.088388346, %v507_v23 }
 0x1bc   :  { %v510_v29 = vpop.f32.mrf.mxu0 }
 0x1bd   :  { %v511_v30 = vadd.f32 %v510_v29, %v4193_v45 }
 0x1be   :  { %v512_v35 = vpop.f32.mrf.mxu0 }
 0x1bf   :  { %v4250_v38 = vmul.f32 0.088388346, %v511_v30 }
 0x1c0   :  { %v516_v39 = vpop.f32.mrf.mxu0 }
 0x1c1   :  { %v671_v41 = vpack.c.bf16 %v4250_v38, %v4248_v36  ;;  %v517_v47 = vadd.f32 %v516_v39, %v4193_v45 }
 0x1c2   :  { %v518_v48 = vpop.f32.mrf.mxu0 }
 0x1c3   :  { %v4256_v53 = vmul.f32 0.088388346, %v517_v47 }
 0x1c4   :  { %v520_v49 = vpop.f32.mrf.mxu0 }
 0x1c5   :  { %v521_v51 = vadd.f32 %v520_v49, %v4193_v45 }
 0x1c6   :  { %v522_v52 = vpop.f32.mrf.mxu0 }
 0x1c7   :  { %v4258_v54 = vmul.f32 0.088388346, %v521_v51 }
 0x1c8   :  { %v526_v55 = vpop.f32.mrf.mxu0 }
 0x1c9   :  { %v672_v56 = vpack.c.bf16 %v4258_v54, %v4256_v53  ;;  %v527_v57 = vadd.f32 %v526_v55, %v4193_v45 }
 0x1ca   :  { %v528_v58 = vpop.f32.mrf.mxu0 }
 0x1cb   :  { %v662_v63 = vmul.f32 0.088388346, %v527_v57 }
 0x1cc   :  { %v530_v59 = vpop.f32.mrf.mxu0 }
 0x1cd   :  { %v531_v61 = vadd.f32 %v530_v59, %v4193_v45  ;;  %v523_v59 = vadd.f32 %v522_v52, %v4201_v50 }
 0x1ce   :  { %v532_v62 = vpop.f32.mrf.mxu0 }
 0x1cf   :  { %v663_v1 = vmul.f32 0.088388346, %v531_v61  ;;  %v533_v55 = vadd.f32 %v532_v62, %v4201_v50  ;;  %v519_v61 = vadd.f32 %v518_v48, %v4201_v50  ;;  %v688_v62 = vld [vmem:[%s5189_s15 + $0x20] sm:$0xff] }
 0x1d0   :  { %v536_v2 = vpop.f32.mrf.mxu0 }
 0x1d1   :  { %v673_v4 = vpack.c.bf16 %v663_v1, %v662_v63  ;;  %v537_v6 = vadd.f32 %v536_v2, %v4193_v45  ;;  %v680_v63 = vpack.c.bf16 %v523_v59, %v519_v61  ;;  %v513_v1 = vadd.f32 %v512_v35, %v4201_v50 }
 0x1d2   :  { %v538_v7 = vpop.f32.mrf.mxu0  ;;  %v509_v2 = vadd.f32 %v4233_v24, %v4201_v50  ;;  %v713_v24 = vpop.permute.xlu1 %712  ;;  %v309_v61 = vsub.s32 2, %v4184_v42 }
 0x1d3   :  { %v664_v13 = vmul.f32 0.088388346, %v537_v6  ;;  %v539_v49 = vadd.f32 %v538_v7, %v4201_v50  ;;  %v691_v7 = vld [vmem:[%s5189_s15 + $0x38] sm:$0xff] }
 0x1d4   :  { %v540_v10 = vpop.f32.mrf.mxu0  ;;  %v679_v6 = vpack.c.bf16 %v513_v1, %v509_v2  ;;  %v310_v2 = vrot.slane %v4189_v44, %v309_v61 }
 0x1d5   :  { %v541_v11 = vadd.f32 %v540_v10, %v4193_v45  ;;  %v689_v10 = vld [vmem:[%s5189_s15 + $0x28] sm:$0xff] }
 0x1d6   :  { %v542_v12 = vpop.f32.mrf.mxu0 }
 0x1d7   :  { %v665_v14 = vmul.f32 0.088388346, %v541_v11  ;;  %v543_v29 = vadd.f32 %v542_v12, %v4201_v50  ;;  %v693_v11 = vld [vmem:[%s5189_s15 + $0x48] sm:$0xff]  ;;  %v692_v12 = vld [vmem:[%s5189_s15 + $0x40] sm:$0xff] }
 0x1d8   :  { %v546_v16 = vpop.f32.mrf.mxu0 }
 0x1d9   :  { %v674_v18 = vpack.c.bf16 %v665_v14, %v664_v13  ;;  %v547_v19 = vadd.f32 %v546_v16, %v4193_v45  ;;  %v682_v54 = vpack.c.bf16 %v543_v29, %v539_v49 }
 0x1da   :  { %v548_v23 = vpop.f32.mrf.mxu0 }
 0x1db   :  { %v666_v32 = vmul.f32 0.088388346, %v547_v19  ;;  %v549_v33 = vadd.f32 %v548_v23, %v4201_v50 }
 0x1dc   :  { %v550_v26 = vpop.f32.mrf.mxu0 }
 0x1dd   :  { %v551_v27 = vadd.f32 %v550_v26, %v4193_v45  ;;  %v529_v45 = vadd.f32 %v528_v58, %v4201_v50 }
 0x1de   :  { %v552_v30 = vpop.f32.mrf.mxu0 }
 0x1df   :  { %v667_v39 = vmul.f32 0.088388346, %v551_v27  ;;  %v553_v47 = vadd.f32 %v552_v30, %v4201_v50  ;;  %v681_v57 = vpack.c.bf16 %v533_v55, %v529_v45  ;;  %v3260_v50 = vld [vmem:[%s5187_s1 + $0xb0] ss:$12 sps:$4 sm:$0xff]  }
 0x1e0   :  { %3042 = vmatprep.subr.bf16.mxu1 %v3260_v50 }
 0x1e1   :  { %v675_v51 = vpack.c.bf16 %v667_v39, %v666_v32  ;;  %v683_v53 = vpack.c.bf16 %v553_v47, %v549_v33  ;;  %3043 = vmatpush3.bf16.msra.mxu1 %v3260_v50 }
 0x1e3   :  { %3074 = vmatprep.subr.bf16.mxu0 %v683_v53 }
 0x1e4   :  { %3075 = vmatpush3.bf16.xpose.msra.mxu0 %v683_v53 }
 0x1e5   :  { %3076 = vmatprep.subr.bf16.mxu0 %v682_v54 }
 0x1ec   :  { %3077 = vmatpush3.bf16.xpose.msra.mxu0 %v682_v54 }
 0x1ed   :  { %3078 = vmatprep.subr.bf16.mxu0 %v681_v57 }
 0x1f4   :  { %3079 = vmatpush3.bf16.xpose.msra.mxu0 %v681_v57 }
 0x1f5   :  { %3080 = vmatprep.subr.bf16.mxu0 %v680_v63 }
 0x1fc   :  { %3081 = vmatpush3.bf16.xpose.msra.mxu0 %v680_v63 }
 0x1fd   :  { %3082 = vmatprep.subr.bf16.mxu0 %v679_v6 }
 0x204   :  { %3083 = vmatpush3.bf16.xpose.msra.mxu0 %v679_v6 }
 0x205   :  { %3084 = vmatprep.subr.bf16.mxu0 %v4230_v21 }
 0x20c   :  { %3085 = vmatpush3.bf16.xpose.msra.mxu0 %v4230_v21  ;;  %v4329_v21 = vld [vmem:[%s5190_s27] ss:$0 sm:$0xff] }
 0x20d   :  { %3086 = vmatprep.subr.bf16.mxu0 %v4218_v9  ;;  %vm789_vm1 = vcmp.eq.f32.partialorder %v713_v24, %v4329_v21 }
 0x214   :  { %3087 = vmatpush3.bf16.xpose.msra.mxu0 %v4218_v9  ;;  %v3265_v9 = vld [vmem:[%s5187_s1 + $0x38] ss:$12 sps:$4 sm:$0xff]  }
 0x215   :  { %3088 = vmatprep.subr.bf16.mxu0 %v4206_v60 }
 0x21c   :  { %3089 = vmatpush3.bf16.xpose.msra.mxu0 %v4206_v60  ;;  %v3261_v60 = vld [vmem:[%s5187_s1 + $0x98] ss:$12 sps:$4 sm:$0xff]  }
 0x21d   :  { %3044 = vmatprep.subr.bf16.mxu1 %v3261_v60 }
 0x21e   :  { %3045 = vmatpush3.bf16.msra.mxu1 %v3261_v60 }
 0x21f   :  { %3046 = vmatprep.subr.bf16.mxu1 %v3262_v3 }
 0x222   :  { %3047 = vmatpush3.bf16.msra.mxu1 %v3262_v3 }
 0x223   :  { %3091 = vmatmul.mubr.bf16.vlgmr.msra.gmra.mxu0 %v669_v8  ;;  %3048 = vmatprep.subr.bf16.mxu1 %v3263_v5  ;;  %v3264_v8 = vld [vmem:[%s5187_s1 + $0x50] ss:$12 sps:$4 sm:$0xff]  }
 0x224   :  { %3094 = vmatprep.mubr.bf16.mxu0 %v670_v20  ;;  %v703_v20 = vpop.permute.xlu0 %702 }
 0x225   :  { %vm787_vm0 = vcmp.eq.f32.partialorder %v703_v20, %v4329_v21 }
 0x226   :  { %3049 = vmatpush3.bf16.msra.mxu1 %v3263_v5 }
 0x227   :  { %3050 = vmatprep.subr.bf16.mxu1 %v3264_v8 }
 0x22a   :  { %3051 = vmatpush3.bf16.msra.mxu1 %v3264_v8 }
 0x22b   :  { %3095 = vmatmul.mubr.bf16.gmra.mxu0 %v671_v41  ;;  %3052 = vmatprep.subr.bf16.mxu1 %v3265_v9 }
 0x22c   :  { %3098 = vmatprep.mubr.bf16.mxu0 %v672_v56 }
 0x22e   :  { %3053 = vmatpush3.bf16.msra.mxu1 %v3265_v9 }
 0x22f   :  { %3054 = vmatprep.subr.bf16.mxu1 %v3266_v15 }
 0x232   :  { %3055 = vmatpush3.bf16.msra.mxu1 %v3266_v15 }
 0x233   :  { %3099 = vmatmul.mubr.bf16.gmra.mxu0 %v673_v4  ;;  %3056 = vmatprep.subr.bf16.mxu1 %v3267_v17  ;;  %v690_v4 = vld [vmem:[%s5189_s15 + $0x30] sm:$0xff] }
 0x234   :  { %3102 = vmatprep.mubr.bf16.mxu0 %v674_v18 }
 0x236   :  { %3057 = vmatpush3.bf16.msra.mxu1 %v3267_v17 }
 0x239   :  { %3059 = vmatmul.mubr.bf16.vlgmr.msra.gmra.mxu1 %v4121_v22 }
 0x23a   :  { %3062 = vmatprep.mubr.bf16.mxu1 %v4131_v25  ;;  %v708_v25 = vpop.permute.xlu0 %707 }
 0x23b   :  { %3103 = vmatmul.mubr.bf16.gmra.mxu0 %v675_v51  ;;  %vm788_vm2 = vcmp.eq.f32.partialorder %v708_v25, %v4329_v21 }
 0x23c   :  { %1736 = vmatprep.mubr.bf16.mxu0 %v3894_v0 }
 0x241   :  { %3063 = vmatmul.mubr.bf16.gmra.mxu1 %v4141_v28  ;;  %v3895_v28 = vmov -1e+09  }
 0x242   :  { %3066 = vmatprep.mubr.bf16.mxu1 %v4151_v31  ;;  %v803_v31 = vsel %vm787_vm0, 0.0, %v3895_v28  ;;  %v805_v35 = vsel %vm789_vm1, 0.0, %v3895_v28  ;;  %v804_v38 = vsel %vm788_vm2, 0.0, %v3895_v28  ;;  %vm3897_vm0 = vmmov 0  }
 0x249   :  { %3067 = vmatmul.mubr.bf16.gmra.mxu1 %v4161_v34  ;;  %v718_v34 = vpop.permute.xlu1 %717 }
 0x24a   :  { %3070 = vmatprep.mubr.bf16.mxu1 %v4171_v37  ;;  %vm790_vm3 = vcmp.eq.f32.partialorder %v718_v34, %v4329_v21 }
 0x24b   :  { %v806_v56 = vsel %vm790_vm3, 0.0, %v3895_v28 }
 0x251   :  { %3071 = vmatmul.mubr.bf16.gmra.mxu1 %v4181_v40 }
 0x2e3   :  { %v3092_v22 = vpop.f32.mrf.mxu0 }
 0x2e4   :  { %v862_v48 = vadd.f32 %v3092_v22, %v805_v35 }
 0x2e5   :  { %v853_v37 = vpop.f32.mrf.mxu0 }
 0x2e6   :  { %v854_v40 = vadd.f32 %v853_v37, %v803_v31 }
 0x2e7   :  { %v3093_v36 = vpop.f32.mrf.mxu0 }
 0x2e8   :  { %916 = vmax.xlane.f32.xlu0 %v854_v40  ;;  %v865_v58 = vadd.f32 %v3093_v36, %v806_v56  ;;  %v695_v56 = vld [vmem:[%s5189_s15 + $0x58] sm:$0xff] }
 0x2e9   :  { %v856_v41 = vpop.f32.mrf.mxu0 }
 0x2ea   :  { %v857_v52 = vadd.f32 %v856_v41, %v804_v38 }
 0x2ec   :  { %918 = vmax.xlane.f32.xlu1 %v857_v52  ;;  %920 = vmax.xlane.f32.xlu0 %v862_v48 }
 0x2f0   :  { %922 = vmax.xlane.f32.xlu0 %v865_v58 }
 0x2f9   :  { %v4357_v13 = vpop.f32.mrf.mxu1 }
 0x2fb   :  { %v4359_v14 = vpop.f32.mrf.mxu1 }
 0x2fd   :  { %722 = vperm.xlu1 %3235, %v688_v62   ;;  %v4361_v16 = vpop.f32.mrf.mxu1 }
 0x2fe   :  { %v601_v62 = vadd.f32 %v4361_v16, %v310_v2  ;;  %v694_v16 = vld [vmem:[%s5189_s15 + $0x50] sm:$0xff] }
 0x2ff   :  { %v4363_v19 = vpop.f32.mrf.mxu1 }
 0x301   :  { %732 = vperm.xlu1 %3235, %v690_v4   ;;  %v3064_v23 = vpop.f32.mrf.mxu1 }
 0x302   :  { %v614_v35 = vadd.f32 %v3064_v23, %v310_v2  ;;  %v3096_v23 = vpop.f32.mrf.mxu0 }
 0x303   :  { %v605_v29 = vpop.f32.mrf.mxu1 }
 0x304   :  { %v606_v41 = vadd.f32 %v605_v29, %v310_v2 }
 0x305   :  { %737 = vperm.xlu1 %3235, %v691_v7   ;;  %v3065_v39 = vpop.f32.mrf.mxu1  ;;  %v697_v7 = vld [vmem:[%s5189_s15 + $0x68] sm:$0xff] }
 0x306   :  { %727 = vperm.xlu0 %3234, %v689_v10   ;;  %v617_v36 = vadd.f32 %v3065_v39, %v310_v2 }
 0x307   :  { %v608_v53 = vpop.f32.mrf.mxu1 }
 0x309   :  { %747 = vperm.xlu1 %3235, %v693_v11   ;;  %v3068_v45 = vpop.f32.mrf.mxu1  ;;  %v590_v11 = vadd.f32 %v4359_v14, %v310_v2  ;;  %v696_v14 = vld [vmem:[%s5189_s15 + $0x60] sm:$0xff] }
 0x30a   :  { %742 = vperm.xlu0 %3234, %v692_v12   ;;  %v630_v20 = vadd.f32 %v3068_v45, %v310_v2  ;;  %v593_v12 = vadd.f32 %v4363_v19, %v310_v2  ;;  %v698_v19 = vld [vmem:[%s5189_s15 + $0x70] sm:$0xff] }
 0x30b   :  { %v621_v59 = vpop.f32.mrf.mxu1 }
 0x30c   :  { %v622_v34 = vadd.f32 %v621_v59, %v310_v2 }
 0x30d   :  { %v3069_v63 = vpop.f32.mrf.mxu1 }
 0x30e   :  { %v633_v42 = vadd.f32 %v3069_v63, %v310_v2 }
 0x30f   :  { %v624_v1 = vpop.f32.mrf.mxu1 }
 0x310   :  { %v1073_v37 = vpack.c.bf16 %v633_v42, %v630_v20 }
 0x311   :  { %v3072_v6 = vpop.f32.mrf.mxu1 }
 0x312   :  { %v646_v60 = vadd.f32 %v3072_v6, %v310_v2 }
 0x313   :  { %v637_v50 = vpop.f32.mrf.mxu1 }
 0x314   :  { %v638_v8 = vadd.f32 %v637_v50, %v310_v2 }
 0x315   :  { %v3073_v5 = vpop.f32.mrf.mxu1 }
 0x316   :  { %v649_v9 = vadd.f32 %v3073_v5, %v310_v2 }
 0x317   :  { %v640_v15 = vpop.f32.mrf.mxu1 }
 0x318   :  { %v1075_v24 = vpack.c.bf16 %v649_v9, %v646_v60  ;;  %v641_v22 = vadd.f32 %v640_v15, %v310_v2 }
 0x31a   :  { %v1074_v44 = vpack.c.bf16 %v641_v22, %v638_v8  ;;  %3106 = vmatprep.subr.bf16.mxu1 %v1075_v24 }
 0x31b   :  { %3107 = vmatpush3.bf16.msra.mxu1 %v1075_v24 }
 0x31c   :  { %3108 = vmatprep.subr.bf16.mxu1 %v1074_v44 }
 0x31f   :  { %3109 = vmatpush3.bf16.msra.mxu1 %v1074_v44 }
 0x320   :  { %3110 = vmatprep.subr.bf16.mxu1 %v1073_v37 }
 0x323   :  { %3111 = vmatpush3.bf16.msra.mxu1 %v1073_v37 }
 0x371   :  { %v917_v18 = vpop.xlane.xlu0 %916 }
 0x372   :  { %v948_v30 = vsub.f32 %v854_v40, %v917_v18  ;;  %v625_v40 = vadd.f32 %v624_v1, %v310_v2  ;;  %v1068_v18 = vpack.c.bf16 %v593_v12, %v590_v11 }
 0x374   :  { %v964_v54 = vmul.f32 1.442695, %v948_v30  ;;  %v1072_v38 = vpack.c.bf16 %v625_v40, %v622_v34 }
 0x375   :  { %v921_v26 = vpop.xlane.xlu0 %920  ;;  %v919_v32 = vpop.xlane.xlu1 %918 }
 0x376   :  { %v950_v27 = vsub.f32 %v862_v48, %v921_v26  ;;  %v949_v49 = vsub.f32 %v857_v52, %v919_v32  ;;  %v1071_v48 = vpack.c.bf16 %v617_v36, %v614_v35  ;;  %v609_v52 = vadd.f32 %v608_v53, %v310_v2  ;;  %3112 = vmatprep.subr.bf16.mxu1 %v1072_v38  ;;  %v869_v26 = vpop.f32.mrf.mxu0 }
 0x377   :  { %3113 = vmatpush3.bf16.msra.mxu1 %v1072_v38 }
 0x378   :  { %v968_v33 = vmul.f32 1.442695, %v950_v27  ;;  %v966_v57 = vmul.f32 1.442695, %v949_v49  ;;  %v1070_v4 = vpack.c.bf16 %v609_v52, %v606_v41  ;;  %3114 = vmatprep.subr.bf16.mxu1 %v1071_v48  ;;  %v3097_v30 = vpop.f32.mrf.mxu0 }
 0x379   :  { %v923_v47 = vpop.xlane.xlu0 %922  ;;  %v723_v27 = vpop.permute.xlu1 %722 }
 0x37a   :  { %v951_v51 = vsub.f32 %v865_v58, %v923_v47  ;;  %3356 = vpow2.f32 %v968_v33  ;;  %v598_v58 = vadd.f32 %v4357_v13, %v310_v2  ;;  %v699_v13 = vld [vmem:[%s5189_s15 + $0x78] sm:$0xff]  ;;  %v872_v33 = vpop.f32.mrf.mxu0  ;;  %vm791_vm5 = vcmp.eq.f32.partialorder %v723_v27, %v4329_v21 }
 0x37b   :  { %3115 = vmatpush3.bf16.msra.mxu1 %v1071_v48 }
 0x37c   :  { %v970_v55 = vmul.f32 1.442695, %v951_v51  ;;  %v1069_v10 = vpack.c.bf16 %v601_v62, %v598_v58  ;;  %3116 = vmatprep.subr.bf16.mxu1 %v1070_v4  ;;  %v3100_v49 = vpop.f32.mrf.mxu0  ;;  %v807_v51 = vsel %vm791_vm5, 0.0, %v3895_v28 }
 0x37d   :  { %v733_v32 = vpop.permute.xlu1 %732 }
 0x37e   :  { %3358 = vpow2.f32 %v970_v55  ;;  %vm793_vm7 = vcmp.eq.f32.partialorder %v733_v32, %v4329_v21  ;;  %v885_v45 = vpop.f32.mrf.mxu0 }
 0x37f   :  { %3360 = vpow2.f32 %v964_v54  ;;  %3117 = vmatpush3.bf16.msra.mxu1 %v1070_v4  ;;  %v809_v59 = vsel %vm793_vm7, 0.0, %v3895_v28 }
 0x380   :  { %3362 = vpow2.f32 %v966_v57  ;;  %3118 = vmatprep.subr.bf16.mxu1 %v1069_v10  ;;  %v4411_v57 = vadd.f32 %v869_v26, %v807_v51  ;;  %v4419_v1 = vadd.f32 %v3096_v23, %v809_v59  ;;  %v3101_v6 = vpop.f32.mrf.mxu0 }
 0x381   :  { %v728_v29 = vpop.permute.xlu0 %727  ;;  %v738_v53 = vpop.permute.xlu1 %737 }
 0x382   :  { %vm792_vm4 = vcmp.eq.f32.partialorder %v728_v29, %v4329_v21  ;;  %vm794_vm8 = vcmp.eq.f32.partialorder %v738_v53, %v4329_v21  ;;  %v888_v5 = vpop.f32.mrf.mxu0 }
 0x383   :  { %3119 = vmatpush3.bf16.msra.mxu1 %v1069_v10  ;;  %v808_v47 = vsel %vm792_vm4, 0.0, %v3895_v28  ;;  %v810_v2 = vsel %vm794_vm8, 0.0, %v3895_v28 }
 0x384   :  { %3120 = vmatprep.subr.bf16.mxu1 %v1068_v18  ;;  %v4406_v54 = vadd.f32 %v872_v33, %v808_v47  ;;  %v4424_v50 = vadd.f32 %v3097_v30, %v810_v2  ;;  %v3104_v15 = vpop.f32.mrf.mxu0 }
 0x385   :  { %v743_v39 = vpop.permute.xlu0 %742  ;;  %v748_v63 = vpop.permute.xlu1 %747 }
 0x386   :  { %vm795_vm6 = vcmp.eq.f32.partialorder %v743_v39, %v4329_v21  ;;  %vm796_vm9 = vcmp.eq.f32.partialorder %v748_v63, %v4329_v21  ;;  %v901_v24 = vpop.f32.mrf.mxu0 }
 0x387   :  { %v4367_v3 = vpop.eup %3356  ;;  %3121 = vmatpush3.bf16.msra.mxu1 %v1068_v18  ;;  %v811_v55 = vsel %vm795_vm6, 0.0, %v3895_v28  ;;  %v812_v60 = vsel %vm796_vm9, 0.0, %v3895_v28 }
 0x388   :  { %1000 = vadd.xlane.f32.xlu1 %v4367_v3  ;;  %v4414_v61 = vadd.f32 %v885_v45, %v811_v55  ;;  %v4428_v8 = vadd.f32 %v888_v5, %v812_v60  ;;  %v3105_v34 = vpop.f32.mrf.mxu0 }
 0x38a   :  { %v904_v36 = vpop.f32.mrf.mxu0 }
 0x38b   :  { %v4370_v17 = vpop.eup %3358 }
 0x38c   :  { %v4372_v25 = vpop.eup %3360  ;;  %1002 = vadd.xlane.f32.xlu0 %v4370_v17 }
 0x38d   :  { %996 = vadd.xlane.f32.xlu1 %v4372_v25  ;;  %v4376_v31 = vpop.eup %3362 }
 0x390   :  { %998 = vadd.xlane.f32.xlu0 %v4376_v31 }
 0x39e   :  { %757 = vperm.xlu1 %3235, %v695_v56  }
 0x3a2   :  { %767 = vperm.xlu1 %3235, %v697_v7  }
 0x3a6   :  { %777 = vperm.xlu1 %3235, %v699_v13   ;;  %752 = vperm.xlu0 %3234, %v694_v16  }
 0x3aa   :  { %762 = vperm.xlu0 %3234, %v696_v14  }
 0x3ae   :  { %772 = vperm.xlu0 %3234, %v698_v19  }
 0x3ca   :  { %926 = vmax.xlane.f32.xlu1 %v4406_v54 }
 0x3cd   :  { %924 = vmax.xlane.f32.xlu0 %v4411_v57 }
 0x3ce   :  { %932 = vmax.xlane.f32.xlu1 %v4414_v61 }
 0x3d1   :  { %928 = vmax.xlane.f32.xlu0 %v4419_v1 }
 0x3d5   :  { %930 = vmax.xlane.f32.xlu0 %v4424_v50 }
 0x3d9   :  { %934 = vmax.xlane.f32.xlu0 %v4428_v8 }
 0x411   :  { %v1001_v9 = vpop.xlane.xlu1 %1000 }
 0x415   :  { %v1003_v20 = vpop.xlane.xlu0 %1002 }
 0x416   :  { %v997_v42 = vpop.xlane.xlu1 %996  ;;  %3364 = vrcp.f32 %v1003_v20 }
 0x417   :  { %3366 = vrcp.f32 %v997_v42 }
 0x418   :  { %3368 = vrcp.f32 %v1001_v9 }
 0x419   :  { %v999_v22 = vpop.xlane.xlu0 %998 }
 0x41a   :  { %v758_v44 = vpop.permute.xlu1 %757  ;;  %3370 = vrcp.f32 %v999_v22 }
 0x41b   :  { %vm798_vm10 = vcmp.eq.f32.partialorder %v758_v44, %v4329_v21 }
 0x41c   :  { %v814_v37 = vsel %vm798_vm10, 0.0, %v3895_v28 }
 0x41d   :  { %v4433_v40 = vadd.f32 %v3101_v6, %v814_v37 }
 0x41e   :  { %v768_v35 = vpop.permute.xlu1 %767 }
 0x41f   :  { %vm800_vm11 = vcmp.eq.f32.partialorder %v768_v35, %v4329_v21  ;;  %938 = vmax.xlane.f32.xlu0 %v4433_v40 }
 0x420   :  { %v816_v38 = vsel %vm800_vm11, 0.0, %v3895_v28 }
 0x421   :  { %v753_v41 = vpop.permute.xlu0 %752  ;;  %v4438_v48 = vadd.f32 %v904_v36, %v816_v38 }
 0x422   :  { %v778_v52 = vpop.permute.xlu1 %777  ;;  %vm797_vm12 = vcmp.eq.f32.partialorder %v753_v41, %v4329_v21 }
 0x423   :  { %vm802_vm13 = vcmp.eq.f32.partialorder %v778_v52, %v4329_v21  ;;  %v813_v56 = vsel %vm797_vm12, 0.0, %v3895_v28  ;;  %942 = vmax.xlane.f32.xlu0 %v4438_v48  ;;  %v3365_v58 = vpop.eup %3364 }
 0x424   :  { %v818_v62 = vsel %vm802_vm13, 0.0, %v3895_v28  ;;  %v4445_v4 = vadd.f32 %v3100_v49, %v813_v56  ;;  %v3367_v7 = vpop.eup %3366  ;;  %v1047_v18 = vmul.f32 %v3365_v58, %v4370_v17 }
 0x425   :  { %v763_v10 = vpop.permute.xlu0 %762  ;;  %v4447_v11 = vadd.f32 %v3105_v34, %v818_v62  ;;  %v3369_v12 = vpop.eup %3368  ;;  %v1044_v19 = vmul.f32 %v3367_v7, %v4372_v25 }
 0x426   :  { %vm799_vm14 = vcmp.eq.f32.partialorder %v763_v10, %v4329_v21  ;;  %936 = vmax.xlane.f32.xlu1 %v4445_v4  ;;  %v1046_v27 = vmul.f32 %v3369_v12, %v4367_v3  ;;  %v3268_v12 = vld [vmem:[%s5191_s4 + $0x38] sm:$0xff]  }
 0x427   :  { %v3371_v13 = vpop.eup %3370  ;;  %v815_v16 = vsel %vm799_vm14, 0.0, %v3895_v28  ;;  %946 = vmax.xlane.f32.xlu0 %v4447_v11  ;;  %3138 = vmatprep.subr.bf16.mxu1 %v3268_v12 }
 0x428   :  { %v4454_v14 = vadd.f32 %v901_v24, %v815_v16  ;;  %v1045_v23 = vmul.f32 %v3371_v13, %v4376_v31  ;;  %v1061_v32 = vpack.c.bf16 %v1047_v18, %v1046_v27  ;;  %v3269_v13 = vld [vmem:[%s5191_s4 + $0x30] sm:$0xff]   ;;  %v3270_v16 = vld [vmem:[%s5191_s4 + $0x28] sm:$0xff]   ;;  %v3271_v18 = vld [vmem:[%s5191_s4 + $0x20] sm:$0xff]  }
 0x429   :  { %v773_v26 = vpop.permute.xlu0 %772 }
 0x42a   :  { %vm801_vm15 = vcmp.eq.f32.partialorder %v773_v26, %v4329_v21  ;;  %940 = vmax.xlane.f32.xlu1 %v4454_v14  ;;  %v1060_v29 = vpack.c.bf16 %v1045_v23, %v1044_v19  ;;  %v3273_v19 = vld [vmem:[%s5191_s4 + $0x10] sm:$0xff]   ;;  %v3274_v23 = vld [vmem:[%s5191_s4 + $0x8] sm:$0xff]   ;;  %v3275_v26 = vld [vmem:[%s5191_s4] sm:$0xff]  }
 0x42b   :  { %v817_v30 = vsel %vm801_vm15, 0.0, %v3895_v28 }
 0x42c   :  { %3122 = vmatprep.mubr.bf16.mxu1 %v1060_v29  ;;  %v910_v33 = vadd.f32 %v3104_v15, %v817_v30 }
 0x42d   :  { %3123 = vmatmul.mubr.bf16.vlgmr.msra.gmra.mxu1 %v1061_v32 }
 0x42e   :  { %944 = vmax.xlane.f32.xlu1 %v910_v33  ;;  %3139 = vmatpush3.bf16.msra.mxu1 %v3268_v12 }
 0x42f   :  { %3140 = vmatprep.subr.bf16.mxu1 %v3269_v13 }
 0x432   :  { %3141 = vmatpush3.bf16.msra.mxu1 %v3269_v13 }
 0x433   :  { %3142 = vmatprep.subr.bf16.mxu1 %v3270_v16 }
 0x436   :  { %3143 = vmatpush3.bf16.msra.mxu1 %v3270_v16 }
 0x437   :  { %3144 = vmatprep.subr.bf16.mxu1 %v3271_v18 }
 0x43a   :  { %3145 = vmatpush3.bf16.msra.mxu1 %v3271_v18 }
 0x453   :  { %v927_v17 = vpop.xlane.xlu1 %926 }
 0x454   :  { %v953_v25 = vsub.f32 %v4406_v54, %v927_v17 }
 0x456   :  { %v974_v39 = vmul.f32 1.442695, %v953_v25  ;;  %v925_v31 = vpop.xlane.xlu0 %924 }
 0x457   :  { %v933_v47 = vpop.xlane.xlu1 %932  ;;  %v952_v3 = vsub.f32 %v4411_v57, %v925_v31 }
 0x458   :  { %3372 = vpow2.f32 %v974_v39  ;;  %v956_v49 = vsub.f32 %v4414_v61, %v933_v47 }
 0x459   :  { %v972_v21 = vmul.f32 1.442695, %v952_v3 }
 0x45a   :  { %v929_v51 = vpop.xlane.xlu0 %928  ;;  %v980_v55 = vmul.f32 1.442695, %v956_v49 }
 0x45b   :  { %3374 = vpow2.f32 %v972_v21  ;;  %v954_v28 = vsub.f32 %v4419_v1, %v929_v51 }
 0x45d   :  { %v976_v53 = vmul.f32 1.442695, %v954_v28 }
 0x45e   :  { %v931_v45 = vpop.xlane.xlu0 %930 }
 0x45f   :  { %3376 = vpow2.f32 %v976_v53  ;;  %v955_v59 = vsub.f32 %v4424_v50, %v931_v45 }
 0x460   :  { %3378 = vpow2.f32 %v980_v55 }
 0x461   :  { %v978_v54 = vmul.f32 1.442695, %v955_v59 }
 0x462   :  { %v935_v63 = vpop.xlane.xlu0 %934 }
 0x463   :  { %3380 = vpow2.f32 %v978_v54  ;;  %v957_v57 = vsub.f32 %v4428_v8, %v935_v63 }
 0x465   :  { %v4468_v2 = vpop.eup %3372  ;;  %v982_v6 = vmul.f32 1.442695, %v957_v57 }
 0x466   :  { %1006 = vadd.xlane.f32.xlu0 %v4468_v2 }
 0x467   :  { %3382 = vpow2.f32 %v982_v6 }
 0x468   :  { %v4471_v61 = vpop.eup %3374 }
 0x469   :  { %1004 = vadd.xlane.f32.xlu1 %v4471_v61 }
 0x46c   :  { %v4474_v1 = vpop.eup %3376 }
 0x46d   :  { %1008 = vadd.xlane.f32.xlu1 %v4474_v1  ;;  %v4477_v50 = vpop.eup %3378 }
 0x470   :  { %v4479_v60 = vpop.eup %3380 }
 0x471   :  { %1012 = vadd.xlane.f32.xlu1 %v4477_v50  ;;  %1010 = vadd.xlane.f32.xlu0 %v4479_v60 }
 0x474   :  { %v4483_v5 = vpop.eup %3382 }
 0x475   :  { %1014 = vadd.xlane.f32.xlu0 %v4483_v5 }
 0x4a8   :  { %v939_v8 = vpop.xlane.xlu0 %938 }
 0x4a9   :  { %v959_v9 = vsub.f32 %v4433_v40, %v939_v8 }
 0x4ab   :  { %v986_v15 = vmul.f32 1.442695, %v959_v9 }
 0x4ac   :  { %v943_v20 = vpop.xlane.xlu0 %942 }
 0x4ad   :  { %3384 = vpow2.f32 %v986_v15  ;;  %v961_v42 = vsub.f32 %v4438_v48, %v943_v20 }
 0x4af   :  { %v990_v24 = vmul.f32 1.442695, %v961_v42  ;;  %v937_v22 = vpop.xlane.xlu1 %936 }
 0x4b0   :  { %v958_v44 = vsub.f32 %v4445_v4, %v937_v22  ;;  %v947_v34 = vpop.xlane.xlu0 %946 }
 0x4b1   :  { %3386 = vpow2.f32 %v990_v24  ;;  %v963_v37 = vsub.f32 %v4447_v11, %v947_v34 }
 0x4b2   :  { %v984_v35 = vmul.f32 1.442695, %v958_v44 }
 0x4b3   :  { %v994_v36 = vmul.f32 1.442695, %v963_v37  ;;  %v941_v38 = vpop.xlane.xlu1 %940 }
 0x4b4   :  { %3388 = vpow2.f32 %v984_v35  ;;  %v960_v41 = vsub.f32 %v4454_v14, %v941_v38  ;;  %v3272_v14 = vld [vmem:[%s5191_s4 + $0x18] sm:$0xff]  }
 0x4b5   :  { %3390 = vpow2.f32 %v994_v36  ;;  %3146 = vmatprep.subr.bf16.mxu1 %v3272_v14 }
 0x4b6   :  { %v988_v40 = vmul.f32 1.442695, %v960_v41  ;;  %3147 = vmatpush3.bf16.msra.mxu1 %v3272_v14 }
 0x4b7   :  { %v945_v52 = vpop.xlane.xlu1 %944  ;;  %3148 = vmatprep.subr.bf16.mxu1 %v3273_v19 }
 0x4b8   :  { %3392 = vpow2.f32 %v988_v40  ;;  %v962_v56 = vsub.f32 %v910_v33, %v945_v52 }
 0x4ba   :  { %v4491_v48 = vpop.eup %3384  ;;  %v992_v58 = vmul.f32 1.442695, %v962_v56  ;;  %3149 = vmatpush3.bf16.msra.mxu1 %v3273_v19 }
 0x4bb   :  { %1018 = vadd.xlane.f32.xlu0 %v4491_v48  ;;  %3150 = vmatprep.subr.bf16.mxu1 %v3274_v23 }
 0x4bc   :  { %3394 = vpow2.f32 %v992_v58 }
 0x4be   :  { %v4494_v62 = vpop.eup %3386  ;;  %3151 = vmatpush3.bf16.msra.mxu1 %v3274_v23 }
 0x4bf   :  { %1022 = vadd.xlane.f32.xlu0 %v4494_v62  ;;  %3152 = vmatprep.subr.bf16.mxu1 %v3275_v26 }
 0x4c1   :  { %v4497_v4 = vpop.eup %3388 }
 0x4c2   :  { %v4499_v7 = vpop.eup %3390  ;;  %1016 = vadd.xlane.f32.xlu1 %v4497_v4  ;;  %3153 = vmatpush3.bf16.msra.mxu1 %v3275_v26 }
 0x4c3   :  { %1026 = vadd.xlane.f32.xlu0 %v4499_v7 }
 0x4c5   :  { %v4503_v10 = vpop.eup %3392 }
 0x4c6   :  { %1020 = vadd.xlane.f32.xlu1 %v4503_v10 }
 0x4c9   :  { %v4506_v11 = vpop.eup %3394 }
 0x4ca   :  { %1024 = vadd.xlane.f32.xlu1 %v4506_v11 }
 0x4ef   :  { %v1007_v27 = vpop.xlane.xlu0 %1006 }
 0x4f0   :  { %3396 = vrcp.f32 %v1007_v27 }
 0x4f2   :  { %v1005_v29 = vpop.xlane.xlu1 %1004 }
 0x4f3   :  { %3398 = vrcp.f32 %v1005_v29 }
 0x4f6   :  { %v1009_v30 = vpop.xlane.xlu1 %1008 }
 0x4f7   :  { %3400 = vrcp.f32 %v1009_v30 }
 0x4fa   :  { %v1013_v32 = vpop.xlane.xlu1 %1012  ;;  %v1011_v33 = vpop.xlane.xlu0 %1010 }
 0x4fb   :  { %3402 = vrcp.f32 %v1011_v33 }
 0x4fc   :  { %3404 = vrcp.f32 %v1013_v32 }
 0x4fd   :  { %v3397_v17 = vpop.eup %3396 }
 0x4fe   :  { %v1015_v25 = vpop.xlane.xlu0 %1014  ;;  %v1049_v47 = vmul.f32 %v3397_v17, %v4468_v2 }
 0x4ff   :  { %3406 = vrcp.f32 %v1015_v25  ;;  %v4545_v25 = vld [vmem:[#allocation5] ss:$0 sm:$0xff] }
 0x500   :  { %v3399_v39 = vpop.eup %3398 }
 0x501   :  { %v1048_v31 = vmul.f32 %v3399_v39, %v4471_v61 }
 0x503   :  { %v1062_v3 = vpack.c.bf16 %v1049_v47, %v1048_v31 }
 0x504   :  { %v3401_v21 = vpop.eup %3400 }
 0x505   :  { %3126 = vmatprep.mubr.bf16.mxu1 %v1062_v3  ;;  %v1050_v28 = vmul.f32 %v3401_v21, %v4474_v1  ;;  %v3520_v3 = vld [vmem:[%s5188_s3] sm:$0xff] }
 0x508   :  { %v3403_v49 = vpop.eup %3402 }
 0x509   :  { %v3405_v51 = vpop.eup %3404  ;;  %v1051_v53 = vmul.f32 %v3403_v49, %v4479_v60  ;;  %v3124_v60 = vpop.f32.mrf.mxu1 }
 0x50a   :  { %v1052_v59 = vmul.f32 %v3405_v51, %v4477_v50 }
 0x50b   :  { %v1063_v45 = vpack.c.bf16 %v1051_v53, %v1050_v28  ;;  %v1110_v15 = vpop.f32.mrf.mxu1  ;;  %v3521_v28 = vld [vmem:[%s5188_s3 + $0x8] sm:$0xff] }
 0x50c   :  { %v3407_v55 = vpop.eup %3406 }
 0x50d   :  { %v1053_v54 = vmul.f32 %v3407_v55, %v4483_v5  ;;  %3127 = vmatmul.mubr.bf16.gmra.mxu1 %v1063_v45  ;;  %v3125_v44 = vpop.f32.mrf.mxu1  ;;  %v3276_v55 = vld [vmem:[%s5160_s9 + $0x70] ss:$8 sps:$4 sm:$0xff]   ;;  %v3278_v45 = vld [vmem:[%s5160_s9 + $0x74] ss:$8 sps:$4 sm:$0xff]  }
 0x50e   :  { %v1174_v58 = vpack.c.bf16 %v3125_v44, %v3124_v60  ;;  %1704 = vmatprep.subr.bf16.mxu0 %v3278_v45 }
 0x50f   :  { %v1064_v63 = vpack.c.bf16 %v1053_v54, %v1052_v59  ;;  %v1113_v41 = vpop.f32.mrf.mxu1  ;;  %1705 = vmatpush1.bf16.msra.mxu0 %v3276_v55 }
 0x511   :  { %3130 = vmatprep.mubr.bf16.mxu1 %v1064_v63 }
 0x544   :  { %v1019_v57 = vpop.xlane.xlu0 %1018 }
 0x545   :  { %3408 = vrcp.f32 %v1019_v57 }
 0x548   :  { %v1023_v2 = vpop.xlane.xlu0 %1022 }
 0x54b   :  { %v1017_v6 = vpop.xlane.xlu1 %1016 }
 0x54c   :  { %3410 = vrcp.f32 %v1017_v6  ;;  %v1027_v61 = vpop.xlane.xlu0 %1026 }
 0x54d   :  { %3412 = vrcp.f32 %v1023_v2 }
 0x54f   :  { %v1021_v8 = vpop.xlane.xlu1 %1020 }
 0x550   :  { %3414 = vrcp.f32 %v1021_v8 }
 0x551   :  { %3416 = vrcp.f32 %v1027_v61 }
 0x552   :  { %v3409_v9 = vpop.eup %3408 }
 0x553   :  { %v1025_v1 = vpop.xlane.xlu1 %1024  ;;  %v1055_v20 = vmul.f32 %v3409_v9, %v4491_v48  ;;  %v1173_v48 = vpack.c.bf16 %v1113_v41, %v1110_v15  ;;  %v3525_v41 = vld [vmem:[%s5188_s3 + $0x28] sm:$0xff] }
 0x554   :  { %3418 = vrcp.f32 %v1025_v1 }
 0x559   :  { %v3411_v50 = vpop.eup %3410 }
 0x55a   :  { %v1054_v5 = vmul.f32 %v3411_v50, %v4497_v4  ;;  %v3413_v42 = vpop.eup %3412 }
 0x55b   :  { %v1057_v37 = vmul.f32 %v3413_v42, %v4494_v62 }
 0x55c   :  { %v1065_v24 = vpack.c.bf16 %v1055_v20, %v1054_v5  ;;  %v3522_v20 = vld [vmem:[%s5188_s3 + $0x10] sm:$0xff] }
 0x55d   :  { %v3415_v22 = vpop.eup %3414 }
 0x55e   :  { %3131 = vmatmul.mubr.bf16.gmra.mxu1 %v1065_v24  ;;  %v1056_v34 = vmul.f32 %v3415_v22, %v4503_v10  ;;  %v3417_v35 = vpop.eup %3416 }
 0x55f   :  { %v1059_v52 = vmul.f32 %v3417_v35, %v4499_v7  ;;  %v3524_v35 = vld [vmem:[%s5188_s3 + $0x20] sm:$0xff] }
 0x560   :  { %v1066_v36 = vpack.c.bf16 %v1057_v37, %v1056_v34  ;;  %v3523_v34 = vld [vmem:[%s5188_s3 + $0x18] sm:$0xff] }
 0x561   :  { %v3419_v38 = vpop.eup %3418 }
 0x562   :  { %3134 = vmatprep.mubr.bf16.mxu1 %v1066_v36  ;;  %v1058_v40 = vmul.f32 %v3419_v38, %v4506_v11 }
 0x564   :  { %v1067_v56 = vpack.c.bf16 %v1059_v52, %v1058_v40  ;;  %v3526_v52 = vld [vmem:[%s5188_s3 + $0x30] sm:$0xff] }
 0x566   :  { %3135 = vmatmul.mubr.bf16.gmra.mxu1 %v1067_v56 }
 0x567   :  { %3154 = vmatprep.mubr.bf16.mxu1 %v1173_v48  ;;  %v3281_v48 = vld [vmem:[%s5160_s9 + $0x64] ss:$8 sps:$4 sm:$0xff]  }
 0x568   :  { %1706 = vmatprep.subr.bf16.mxu0 %v3281_v48 }
 0x56e   :  { %3155 = vmatmul.mubr.bf16.vlgmr.msra.gmra.mxu1 %v1174_v58  ;;  %v3279_v58 = vld [vmem:[%s5160_s9 + $0x60] ss:$8 sps:$4 sm:$0xff]  }
 0x56f   :  { %1707 = vmatpush1.bf16.msra.mxu0 %v3279_v58 }
 0x5cd   :  { %v3128_v4 = vpop.f32.mrf.mxu1 }
 0x5cf   :  { %v1126_v12 = vpop.f32.mrf.mxu1 }
 0x5d1   :  { %v3129_v10 = vpop.f32.mrf.mxu1 }
 0x5d2   :  { %v1176_v16 = vpack.c.bf16 %v3129_v10, %v3128_v4  ;;  %v3527_v4 = vld [vmem:[%s5188_s3 + $0x38] sm:$0xff] }
 0x5d3   :  { %v1129_v13 = vpop.f32.mrf.mxu1  ;;  %v3284_v10 = vld [vmem:[%s5160_s9 + $0x54] ss:$8 sps:$4 sm:$0xff]  }
 0x5d4   :  { %v1175_v62 = vpack.c.bf16 %v1129_v13, %v1126_v12  ;;  %v3282_v13 = vld [vmem:[%s5160_s9 + $0x50] ss:$8 sps:$4 sm:$0xff]   ;;  %1708 = vmatprep.subr.bf16.mxu0 %v3284_v10 }
 0x5d5   :  { %1709 = vmatpush1.bf16.msra.mxu0 %v3282_v13 }
 0x5d6   :  { %3158 = vmatprep.mubr.bf16.mxu1 %v1175_v62  ;;  %v3287_v62 = vld [vmem:[%s5160_s9 + $0x44] ss:$8 sps:$4 sm:$0xff]  }
 0x5d7   :  { %3159 = vmatmul.mubr.bf16.gmra.mxu1 %v1176_v16  ;;  %v3285_v16 = vld [vmem:[%s5160_s9 + $0x40] ss:$8 sps:$4 sm:$0xff]   ;;  %1710 = vmatprep.subr.bf16.mxu0 %v3287_v62 }
 0x5d9   :  { %1711 = vmatpush1.bf16.msra.mxu0 %v3285_v16 }
 0x61e   :  { %v3132_v18 = vpop.f32.mrf.mxu1 }
 0x620   :  { %v1142_v14 = vpop.f32.mrf.mxu1 }
 0x622   :  { %v3133_v19 = vpop.f32.mrf.mxu1 }
 0x623   :  { %v1178_v7 = vpack.c.bf16 %v3133_v19, %v3132_v18  ;;  %v3290_v18 = vld [vmem:[%s5160_s9 + $0x34] ss:$8 sps:$4 sm:$0xff]   ;;  %v3293_v19 = vld [vmem:[%s5160_s9 + $0x24] ss:$8 sps:$4 sm:$0xff]  }
 0x624   :  { %v1145_v11 = vpop.f32.mrf.mxu1  ;;  %1712 = vmatprep.subr.bf16.mxu0 %v3290_v18 }
 0x625   :  { %v1177_v23 = vpack.c.bf16 %v1145_v11, %v1142_v14  ;;  %v3288_v14 = vld [vmem:[%s5160_s9 + $0x30] ss:$8 sps:$4 sm:$0xff]   ;;  %v3291_v11 = vld [vmem:[%s5160_s9 + $0x20] ss:$8 sps:$4 sm:$0xff]  }
 0x626   :  { %v3136_v26 = vpop.f32.mrf.mxu1  ;;  %1713 = vmatpush1.bf16.msra.mxu0 %v3288_v14 }
 0x627   :  { %3162 = vmatprep.mubr.bf16.mxu1 %v1177_v23  ;;  %1714 = vmatprep.subr.bf16.mxu0 %v3293_v19  ;;  %v3296_v23 = vld [vmem:[%s5160_s9 + $0x14] ss:$8 sps:$4 sm:$0xff]  }
 0x628   :  { %v1158_v27 = vpop.f32.mrf.mxu1  ;;  %3163 = vmatmul.mubr.bf16.gmra.mxu1 %v1178_v7  ;;  %v3294_v7 = vld [vmem:[%s5160_s9 + $0x10] ss:$8 sps:$4 sm:$0xff]  }
 0x62a   :  { %v3137_v29 = vpop.f32.mrf.mxu1  ;;  %1715 = vmatpush1.bf16.msra.mxu0 %v3291_v11 }
 0x62b   :  { %v1180_v33 = vpack.c.bf16 %v3137_v29, %v3136_v26  ;;  %v3299_v26 = vld [vmem:[%s5160_s9 + $0x4] ss:$8 sps:$4 sm:$0xff]   ;;  %1716 = vmatprep.subr.bf16.mxu0 %v3296_v23 }
 0x62c   :  { %v1161_v30 = vpop.f32.mrf.mxu1 }
 0x62d   :  { %v1179_v32 = vpack.c.bf16 %v1161_v30, %v1158_v27  ;;  %v3297_v27 = vld [vmem:[%s5160_s9] ss:$8 sps:$4 sm:$0xff]  }
 0x62e   :  { %v3156_v17 = vpop.f32.mrf.mxu1  ;;  %1717 = vmatpush1.bf16.msra.mxu0 %v3294_v7 }
 0x62f   :  { %3166 = vmatprep.mubr.bf16.mxu1 %v1179_v32  ;;  %v1295_v61 = vadd.f32 %v3156_v17, %v4545_v25  ;;  %1718 = vmatprep.subr.bf16.mxu0 %v3299_v26 }
 0x630   :  { %v1286_v39 = vpop.f32.mrf.mxu1  ;;  %3167 = vmatmul.mubr.bf16.gmra.mxu1 %v1180_v33 }
 0x631   :  { %v1287_v31 = vadd.f32 %v4545_v25, %v1286_v39  ;;  %v4575_v42 = vadd.f32 %v3522_v20, %v1295_v61  ;;  %v3528_v39 = vld [vmem:[%s5188_s3 + $0x40] sm:$0xff]  ;;  %v3534_v20 = vld [vmem:[%s5188_s3 + $0x70] sm:$0xff] }
 0x632   :  { %v3157_v47 = vpop.f32.mrf.mxu1  ;;  %1719 = vmatpush1.bf16.msra.mxu0 %v3297_v27  ;;  %v3532_v61 = vld [vmem:[%s5188_s3 + $0x60] sm:$0xff] }
 0x633   :  { %v1349_v21 = vadd.f32 %v3520_v3, %v1287_v31  ;;  %v1298_v50 = vadd.f32 %v3157_v47, %v4545_v25 }
 0x634   :  { %v1289_v49 = vpop.f32.mrf.mxu1 }
 0x635   :  { %v1290_v51 = vadd.f32 %v4545_v25, %v1289_v49  ;;  %1367 = vadd.xlane.f32.xlu1 %v1349_v21  ;;  %v4583_v37 = vadd.f32 %v3523_v34, %v1298_v50 }
 0x637   :  { %v1350_v53 = vadd.f32 %v3521_v28, %v1290_v51  ;;  %v3529_v51 = vld [vmem:[%s5188_s3 + $0x48] sm:$0xff] }
 0x639   :  { %1369 = vadd.xlane.f32.xlu0 %v1350_v53 }
 0x697   :  { %v3160_v59 = vpop.f32.mrf.mxu1 }
 0x698   :  { %v1311_v22 = vadd.f32 %v3160_v59, %v4545_v25 }
 0x699   :  { %v1302_v57 = vpop.f32.mrf.mxu1 }
 0x69a   :  { %v1303_v15 = vadd.f32 %v4545_v25, %v1302_v57  ;;  %v4601_v56 = vadd.f32 %v3526_v52, %v1311_v22  ;;  %v3531_v57 = vld [vmem:[%s5188_s3 + $0x58] sm:$0xff] }
 0x69b   :  { %v3161_v60 = vpop.f32.mrf.mxu1 }
 0x69c   :  { %v4588_v36 = vadd.f32 %v3524_v35, %v1303_v15  ;;  %v1314_v38 = vadd.f32 %v3161_v60, %v4545_v25  ;;  %v3533_v15 = vld [vmem:[%s5188_s3 + $0x68] sm:$0xff] }
 0x69d   :  { %v1305_v24 = vpop.f32.mrf.mxu1 }
 0x69e   :  { %v1306_v44 = vadd.f32 %v4545_v25, %v1305_v24  ;;  %v4614_v12 = vadd.f32 %v3527_v4, %v1314_v38 }
 0x6a0   :  { %v4596_v40 = vadd.f32 %v3525_v41, %v1306_v44 }
 0x6be   :  { %v1368_v54 = vpop.xlane.xlu1 %1367 }
 0x6bf   :  { %v1400_v63 = vmul.f32 0.0078125, %v1368_v54 }
 0x6c1   :  { %v4561_v2 = vsub.f32 %v1349_v21, %v1400_v63 }
 0x6c2   :  { %v1370_v6 = vpop.xlane.xlu0 %1369 }
 0x6c3   :  { %v1401_v8 = vmul.f32 0.0078125, %v1370_v6  ;;  %v1432_v1 = vmul.f32 %v4561_v2, %v4561_v2 }
 0x6c5   :  { %v4566_v9 = vsub.f32 %v1350_v53, %v1401_v8  ;;  %1448 = vadd.xlane.f32.xlu1 %v1432_v1  ;;  %v3530_v53 = vld [vmem:[%s5188_s3 + $0x50] sm:$0xff] }
 0x6c7   :  { %v1433_v5 = vmul.f32 %v4566_v9, %v4566_v9 }
 0x6c9   :  { %1450 = vadd.xlane.f32.xlu0 %v1433_v5  ;;  %1371 = vadd.xlane.f32.xlu1 %v4575_v42 }
 0x6cd   :  { %1373 = vadd.xlane.f32.xlu0 %v4583_v37  ;;  %1375 = vadd.xlane.f32.xlu1 %v4588_v36 }
 0x6d1   :  { %1377 = vadd.xlane.f32.xlu0 %v4596_v40  ;;  %1379 = vadd.xlane.f32.xlu1 %v4601_v56 }
 0x6d5   :  { %1381 = vadd.xlane.f32.xlu0 %v4614_v12 }
 0x6e8   :  { %v3164_v29 = vpop.f32.mrf.mxu1 }
 0x6e9   :  { %v1327_v17 = vadd.f32 %v3164_v29, %v4545_v25 }
 0x6ea   :  { %v1318_v30 = vpop.f32.mrf.mxu1 }
 0x6eb   :  { %v1319_v32 = vadd.f32 %v4545_v25, %v1318_v30  ;;  %v4671_v55 = vadd.f32 %v3530_v53, %v1327_v17 }
 0x6ec   :  { %v3165_v33 = vpop.f32.mrf.mxu1 }
 0x6ed   :  { %v4658_v31 = vadd.f32 %v3528_v39, %v1319_v32  ;;  %v1330_v49 = vadd.f32 %v3165_v33, %v4545_v25  ;;  %v4733_v33 = vld [vmem:[#allocation7] ss:$0 sm:$0xff] }
 0x6ee   :  { %v1321_v47 = vpop.f32.mrf.mxu1 }
 0x6ef   :  { %v1322_v3 = vadd.f32 %v4545_v25, %v1321_v47  ;;  %1383 = vadd.xlane.f32.xlu1 %v4658_v31  ;;  %v4680_v6 = vadd.f32 %v3531_v57, %v1330_v49 }
 0x6f0   :  { %v3168_v21 = vpop.f32.mrf.mxu1 }
 0x6f1   :  { %v4666_v28 = vadd.f32 %v3529_v51, %v1322_v3  ;;  %v1343_v63 = vadd.f32 %v3168_v21, %v4545_v25 }
 0x6f2   :  { %v1334_v45 = vpop.f32.mrf.mxu1 }
 0x6f3   :  { %v1335_v59 = vadd.f32 %v4545_v25, %v1334_v45  ;;  %1385 = vadd.xlane.f32.xlu0 %v4666_v28  ;;  %1387 = vadd.xlane.f32.xlu1 %v4671_v55  ;;  %v4699_v24 = vadd.f32 %v3534_v20, %v1343_v63 }
 0x6f4   :  { %v3169_v54 = vpop.f32.mrf.mxu1 }
 0x6f5   :  { %v4685_v8 = vadd.f32 %v3532_v61, %v1335_v59  ;;  %v1346_v50 = vadd.f32 %v3169_v54, %v4545_v25 }
 0x6f6   :  { %v1337_v1 = vpop.f32.mrf.mxu1 }
 0x6f7   :  { %v1338_v60 = vadd.f32 %v4545_v25, %v1337_v1  ;;  %1389 = vadd.xlane.f32.xlu0 %v4680_v6  ;;  %1391 = vadd.xlane.f32.xlu1 %v4685_v8  ;;  %v3535_v25 = vld [vmem:[%s5188_s3 + $0x78] sm:$0xff] }
 0x6f8   :  { %v4706_v22 = vadd.f32 %v3535_v25, %v1346_v50  ;;  %v3300_v25 = vld [vmem:[%s5162_s11 + $0x78] sm:$0xff]  }
 0x6f9   :  { %v4694_v5 = vadd.f32 %v3533_v15, %v1338_v60  ;;  %2960 = vmatprep.subr.bf16.mxu1 %v3300_v25 }
 0x6fb   :  { %1393 = vadd.xlane.f32.xlu0 %v4694_v5  ;;  %1395 = vadd.xlane.f32.xlu1 %v4699_v24 }
 0x6ff   :  { %1397 = vadd.xlane.f32.xlu0 %v4706_v22 }
 0x74e   :  { %v1449_v44 = vpop.xlane.xlu1 %1448 }
 0x74f   :  { %v1480_v34 = vmul.f32 0.0078125, %v1449_v44  ;;  %v3303_v44 = vld [vmem:[%s5162_s11 + $0x30] sm:$0xff]  }
 0x751   :  { %v1496_v35 = vadd.f32 1e-12, %v1480_v34  ;;  %v3304_v34 = vld [vmem:[%s5162_s11 + $0x68] sm:$0xff]  }
 0x752   :  { %v1451_v38 = vpop.xlane.xlu0 %1450  ;;  %v1372_v41 = vpop.xlane.xlu1 %1371 }
 0x753   :  { %3420 = vrsqrt.f32 %v1496_v35  ;;  %v1481_v52 = vmul.f32 0.0078125, %v1451_v38  ;;  %v1402_v48 = vmul.f32 0.0078125, %v1372_v41  ;;  %v3305_v35 = vld [vmem:[%s5162_s11 + $0x28] sm:$0xff]   ;;  %v3306_v38 = vld [vmem:[%s5162_s11 + $0x60] sm:$0xff]  }
 0x754   :  { %v3307_v41 = vld [vmem:[%s5162_s11 + $0x20] sm:$0xff]  }
 0x755   :  { %v1497_v58 = vadd.f32 1e-12, %v1481_v52  ;;  %v4710_v4 = vsub.f32 %v4575_v42, %v1402_v48  ;;  %v3308_v52 = vld [vmem:[%s5162_s11 + $0x58] sm:$0xff]  }
 0x756   :  { %v1374_v10 = vpop.xlane.xlu0 %1373  ;;  %v1376_v13 = vpop.xlane.xlu1 %1375  ;;  %v3309_v48 = vld [vmem:[%s5162_s11 + $0x18] sm:$0xff]  }
 0x757   :  { %3422 = vrsqrt.f32 %v1497_v58  ;;  %v1403_v62 = vmul.f32 0.0078125, %v1374_v10  ;;  %v1404_v16 = vmul.f32 0.0078125, %v1376_v13  ;;  %v1434_v18 = vmul.f32 %v4710_v4, %v4710_v4  ;;  %v3310_v58 = vld [vmem:[%s5162_s11 + $0x50] sm:$0xff]   ;;  %v3312_v13 = vld [vmem:[%s5162_s11 + $0x48] sm:$0xff]  }
 0x758   :  { %v3311_v10 = vld [vmem:[%s5162_s11 + $0x10] sm:$0xff]  }
 0x759   :  { %v4715_v14 = vsub.f32 %v4583_v37, %v1403_v62  ;;  %v4718_v19 = vsub.f32 %v4588_v36, %v1404_v16  ;;  %1452 = vadd.xlane.f32.xlu1 %v1434_v18  ;;  %v3313_v62 = vld [vmem:[%s5162_s11 + $0x8] sm:$0xff]   ;;  %v3314_v18 = vld [vmem:[%s5162_s11 + $0x40] sm:$0xff]  }
 0x75a   :  { %v1378_v11 = vpop.xlane.xlu0 %1377  ;;  %v1380_v23 = vpop.xlane.xlu1 %1379 }
 0x75b   :  { %v1405_v7 = vmul.f32 0.0078125, %v1378_v11  ;;  %v1406_v42 = vmul.f32 0.0078125, %v1380_v23  ;;  %v1435_v26 = vmul.f32 %v4715_v14, %v4715_v14  ;;  %v1436_v27 = vmul.f32 %v4718_v19, %v4718_v19  ;;  %v3315_v11 = vld [vmem:[%s5162_s11] sm:$0xff]  }
 0x75d   :  { %v4725_v29 = vsub.f32 %v4596_v40, %v1405_v7  ;;  %1454 = vadd.xlane.f32.xlu0 %v1435_v26  ;;  %1456 = vadd.xlane.f32.xlu1 %v1436_v27  ;;  %v4728_v37 = vsub.f32 %v4601_v56, %v1406_v42  ;;  %v4739_v56 = vld [vmem:[#allocation8] ss:$0 sm:$0xff] }
 0x75e   :  { %v4810_v16 = vpop.xlane.xlu0 %1381 }
 0x75f   :  { %v1437_v36 = vmul.f32 %v4725_v29, %v4725_v29  ;;  %v1438_v17 = vmul.f32 %v4728_v37, %v4728_v37 }
 0x760   :  { %v3421_v30 = vpop.eup %3420 }
 0x761   :  { %v1528_v32 = vmul.f32 %v3421_v30, %v4561_v2  ;;  %1458 = vadd.xlane.f32.xlu0 %v1437_v36 }
 0x763   :  { %v1550_v47 = vmul.f32 %v4733_v33, %v1528_v32 }
 0x764   :  { %v3423_v39 = vpop.eup %3422 }
 0x765   :  { %v1529_v40 = vmul.f32 %v3423_v39, %v4566_v9  ;;  %1460 = vadd.xlane.f32.xlu0 %v1438_v17  ;;  %v4743_v21 = vadd.f32 %v4739_v56, %v1550_v47 }
 0x767   :  { %v1551_v3 = vmul.f32 %v4733_v33, %v1529_v40 }
 0x769   :  { %v1573_v2 = vadd.f32 %v4739_v56, %v1551_v3 }
 0x76b   :  { %v1588_v49 = vpack.c.bf16 %v1573_v2, %v4743_v21 }
 0x76d   :  { %1737 = vmatmul.mubr.bf16.vlgmr.msra.gmra.mxu0 %v1588_v49 }
 0x76e   :  { %1746 = vmatprep.mubr.bf16.mxu0 %v3894_v0 }
 0x778   :  { %v1384_v51 = vpop.xlane.xlu1 %1383 }
 0x779   :  { %v1408_v53 = vmul.f32 0.0078125, %v1384_v51 }
 0x77b   :  { %v4749_v9 = vsub.f32 %v4658_v31, %v1408_v53 }
 0x77c   :  { %v1388_v45 = vpop.xlane.xlu1 %1387  ;;  %v4818_v23 = vpop.xlane.xlu0 %1385 }
 0x77d   :  { %v1410_v59 = vmul.f32 0.0078125, %v1388_v45  ;;  %v1440_v54 = vmul.f32 %v4749_v9, %v4749_v9 }
 0x77f   :  { %v4754_v63 = vsub.f32 %v4671_v55, %v1410_v59  ;;  %1464 = vadd.xlane.f32.xlu0 %v1440_v54 }
 0x780   :  { %v1392_v57 = vpop.xlane.xlu1 %1391  ;;  %v4820_v7 = vpop.xlane.xlu0 %1389 }
 0x781   :  { %v1412_v61 = vmul.f32 0.0078125, %v1392_v57  ;;  %v1442_v1 = vmul.f32 %v4754_v63, %v4754_v63 }
 0x783   :  { %v4759_v60 = vsub.f32 %v4685_v8, %v1412_v61  ;;  %1468 = vadd.xlane.f32.xlu0 %v1442_v1  ;;  %v3301_v8 = vld [vmem:[%s5162_s11 + $0x38] sm:$0xff]  }
 0x784   :  { %v1396_v31 = vpop.xlane.xlu1 %1395  ;;  %2961 = vmatpush3.bf16.msra.mxu1 %v3301_v8  ;;  %v4822_v42 = vpop.xlane.xlu0 %1393 }
 0x785   :  { %v1414_v50 = vmul.f32 0.0078125, %v1396_v31  ;;  %v1444_v15 = vmul.f32 %v4759_v60, %v4759_v60 }
 0x787   :  { %v4764_v20 = vsub.f32 %v4699_v24, %v1414_v50  ;;  %1472 = vadd.xlane.f32.xlu0 %v1444_v15  ;;  %v3302_v24 = vld [vmem:[%s5162_s11 + $0x70] sm:$0xff]   ;;  %s3898_s11 = smov [#allocation26]  }
 0x788   :  { %2962 = vmatprep.subr.bf16.mxu1 %v3302_v24  ;;  %v4824_v26 = vpop.xlane.xlu0 %1397  ;;  %s2770_s28 = sshll.u32 %s3898_s11, 4  ;;  %s2771_s28 = int_to_ptr.vmem [resolvable:$true] %s2770_s28 }
 0x789   :  { %v1446_v55 = vmul.f32 %v4764_v20, %v4764_v20  ;;  %2963 = vmatpush3.bf16.msra.mxu1 %v3303_v44  ;;  %s3816_s0 = scalar_lea.vmem %s2771_s28, 32  ;;  %p3821_p1 = scmp.lt.s32.totalorder %s2771_s28, %s2771_s28 }
 0x78a   :  { %2964 = vmatprep.subr.bf16.mxu1 %v3304_v34  ;;  %p3817_p0 = scmp.ne.s32.totalorder %s2771_s28, %s3816_s0  ;;  %p3822_p2 = scmp.lt.s32.totalorder %s3816_s0, %s3816_s0 }
 0x78b   :  { %1476 = vadd.xlane.f32.xlu0 %v1446_v55 }
 0x78c   :  { %p3823_p3 = por %p3822_p2, %p3821_p1 }
 0x78d   :  { %2965 = vmatpush3.bf16.msra.mxu1 %v3305_v35  ;;  %v1612_v35 = vld [vmem:[#allocation10] sm:$0x3] }
 0x78e   :  { %2966 = vmatprep.subr.bf16.mxu1 %v3306_v38  ;;  %p3824_p4 = pnand %p3823_p3, %p3817_p0 }
 0x791   :  { %2967 = vmatpush3.bf16.msra.mxu1 %v3307_v41 }
 0x792   :  { %2968 = vmatprep.subr.bf16.mxu1 %v3308_v52 }
 0x795   :  { %2969 = vmatpush3.bf16.msra.mxu1 %v3309_v48 }
 0x796   :  { %2970 = vmatprep.subr.bf16.mxu1 %v3310_v58 }
 0x799   :  { %2971 = vmatpush3.bf16.msra.mxu1 %v3311_v10 }
 0x79a   :  { %2972 = vmatprep.subr.bf16.mxu1 %v3312_v13 }
 0x79d   :  { %2973 = vmatpush3.bf16.msra.mxu1 %v3313_v62 }
 0x79e   :  { %2974 = vmatprep.subr.bf16.mxu1 %v3314_v18 }
 0x7a1   :  { %2975 = vmatpush3.bf16.msra.mxu1 %v3315_v11 }
 0x7e2   :  { %v1453_v27 = vpop.xlane.xlu1 %1452 }
 0x7e3   :  { %v1482_v36 = vmul.f32 0.0078125, %v1453_v27 }
 0x7e5   :  { %v1498_v30 = vadd.f32 1e-12, %v1482_v36 }
 0x7e6   :  { %v1455_v32 = vpop.xlane.xlu0 %1454  ;;  %v1457_v17 = vpop.xlane.xlu1 %1456 }
 0x7e7   :  { %3424 = vrsqrt.f32 %v1498_v30  ;;  %v1483_v39 = vmul.f32 0.0078125, %v1455_v32  ;;  %v1484_v40 = vmul.f32 0.0078125, %v1457_v17 }
 0x7e9   :  { %v1499_v47 = vadd.f32 1e-12, %v1483_v39  ;;  %v1500_v3 = vadd.f32 1e-12, %v1484_v40 }
 0x7ea   :  { %v1459_v2 = vpop.xlane.xlu0 %1458 }
 0x7eb   :  { %3426 = vrsqrt.f32 %v1499_v47  ;;  %v1485_v49 = vmul.f32 0.0078125, %v1459_v2 }
 0x7ec   :  { %3428 = vrsqrt.f32 %v1500_v3 }
 0x7ed   :  { %v1501_v51 = vadd.f32 1e-12, %v1485_v49 }
 0x7ef   :  { %3430 = vrsqrt.f32 %v1501_v51 }
 0x7f4   :  { %v3425_v53 = vpop.eup %3424 }
 0x7f5   :  { %v1530_v45 = vmul.f32 %v3425_v53, %v4710_v4 }
 0x7f7   :  { %v1552_v57 = vmul.f32 %v4733_v33, %v1530_v45 }
 0x7f8   :  { %v3427_v59 = vpop.eup %3426 }
 0x7f9   :  { %v1531_v54 = vmul.f32 %v3427_v59, %v4715_v14  ;;  %v3429_v61 = vpop.eup %3428  ;;  %v1574_v50 = vadd.f32 %v4739_v56, %v1552_v57 }
 0x7fa   :  { %v1532_v55 = vmul.f32 %v3429_v61, %v4718_v19  ;;  %v4841_v19 = vrot.slane %v1612_v35, %v4187_v43 }
 0x7fb   :  { %v1553_v1 = vmul.f32 %v4733_v33, %v1531_v54 }
 0x7fc   :  { %v3431_v31 = vpop.eup %3430  ;;  %v1554_v14 = vmul.f32 %v4733_v33, %v1532_v55 }
 0x7fd   :  { %v1575_v15 = vadd.f32 %v4739_v56, %v1553_v1  ;;  %v1533_v25 = vmul.f32 %v3431_v31, %v4725_v29  ;;  %v4844_v29 = vrot.slane %v1612_v35, %v4196_v46 }
 0x7fe   :  { %v1576_v44 = vadd.f32 %v4739_v56, %v1554_v14 }
 0x7ff   :  { %v1589_v8 = vpack.c.bf16 %v1575_v15, %v1574_v50  ;;  %v1555_v4 = vmul.f32 %v4733_v33, %v1533_v25 }
 0x801   :  { %1747 = vmatmul.mubr.bf16.gmra.mxu0 %v1589_v8  ;;  %v1577_v24 = vadd.f32 %v4739_v56, %v1555_v4 }
 0x802   :  { %1756 = vmatprep.mubr.bf16.mxu0 %v3894_v0 }
 0x803   :  { %v1590_v34 = vpack.c.bf16 %v1577_v24, %v1576_v44 }
 0x809   :  { %1757 = vmatmul.mubr.bf16.gmra.mxu0 %v1590_v34 }
 0x80a   :  { %1766 = vmatprep.mubr.bf16.mxu0 %v3894_v0 }
 0x82d   :  { %v1738_v38 = vpop.f32.mrf.mxu0 }
 0x82e   :  { %v1739_v41 = vadd.f32 %v1738_v38, %v4841_v19 }
 0x82f   :  { %v1740_v52 = vpop.f32.mrf.mxu0 }
 0x830   :  { %v1849_v48 = vmul.f32 0.044715, %v1739_v41  ;;  %v1741_v58 = vadd.f32 %v1740_v52, %v4844_v29  ;;  %v1817_v34 = vmul.f32 0.5, %v1739_v41 }
 0x831   :  { %v1742_v10 = vpop.f32.mrf.mxu0 }
 0x832   :  { %v1881_v13 = vmul.f32 %v1849_v48, %v1739_v41  ;;  %v1850_v62 = vmul.f32 0.044715, %v1741_v58  ;;  %v1743_v18 = vadd.f32 %v1742_v10, %v4841_v19  ;;  %v1818_v14 = vmul.f32 0.5, %v1741_v58 }
 0x833   :  { %v1744_v11 = vpop.f32.mrf.mxu0 }
 0x834   :  { %v1913_v27 = vmul.f32 %v1881_v13, %v1739_v41  ;;  %v1882_v36 = vmul.f32 %v1850_v62, %v1741_v58  ;;  %v1851_v30 = vmul.f32 0.044715, %v1743_v18  ;;  %v1745_v32 = vadd.f32 %v1744_v11, %v4844_v29 }
 0x835   :  { %v1819_v8 = vmul.f32 0.5, %v1743_v18 }
 0x836   :  { %v1945_v17 = vadd.f32 %v1913_v27, %v1739_v41  ;;  %v1914_v39 = vmul.f32 %v1882_v36, %v1741_v58  ;;  %v1883_v40 = vmul.f32 %v1851_v30, %v1743_v18  ;;  %v1852_v47 = vmul.f32 0.044715, %v1745_v32 }
 0x837   :  { %v1820_v24 = vmul.f32 0.5, %v1745_v32 }
 0x838   :  { %v1977_v3 = vmul.f32 0.7978846, %v1945_v17  ;;  %v1915_v2 = vmul.f32 %v1883_v40, %v1743_v18  ;;  %v1946_v49 = vadd.f32 %v1914_v39, %v1741_v58  ;;  %v1884_v51 = vmul.f32 %v1852_v47, %v1745_v32 }
 0x83a   :  { %v1947_v53 = vadd.f32 %v1915_v2, %v1743_v18  ;;  %v1978_v45 = vmul.f32 0.7978846, %v1946_v49  ;;  %v1916_v59 = vmul.f32 %v1884_v51, %v1745_v32  ;;  %3432 = vtanh.f32 %v1977_v3 }
 0x83c   :  { %v1979_v54 = vmul.f32 0.7978846, %v1947_v53  ;;  %v1948_v57 = vadd.f32 %v1916_v59, %v1745_v32  ;;  %3434 = vtanh.f32 %v1978_v45 }
 0x83e   :  { %3436 = vtanh.f32 %v1979_v54  ;;  %v1980_v61 = vmul.f32 0.7978846, %v1948_v57 }
 0x840   :  { %3438 = vtanh.f32 %v1980_v61 }
 0x847   :  { %v3433_v1 = vpop.eup %3432 }
 0x848   :  { %v2041_v4 = vadd.f32 1.0, %v3433_v1 }
 0x849   :  { %v3435_v31 = vpop.eup %3434 }
 0x84a   :  { %v2042_v55 = vadd.f32 1.0, %v3435_v31  ;;  %v2073_v48 = vmul.f32 %v2041_v4, %v1817_v34 }
 0x84b   :  { %v3437_v50 = vpop.eup %3436 }
 0x84c   :  { %v2043_v15 = vadd.f32 1.0, %v3437_v50  ;;  %v2074_v38 = vmul.f32 %v2042_v55, %v1818_v14 }
 0x84d   :  { %v3439_v25 = vpop.eup %3438 }
 0x84e   :  { %v2044_v44 = vadd.f32 1.0, %v3439_v25  ;;  %v2075_v35 = vmul.f32 %v2043_v15, %v1819_v8 }
 0x850   :  { %v2076_v52 = vmul.f32 %v2044_v44, %v1820_v24  ;;  %v2105_v13 = vpack.c.bf16 %v2075_v35, %v2073_v48 }
 0x852   :  { %v2106_v10 = vpack.c.bf16 %v2076_v52, %v2074_v38 }
 0x854   :  { %2288 = vmatprep.mubr.bf16.mxu1 %v2106_v10 }
 0x855   :  { %2289 = vmatmul.mubr.bf16.vlgmr.msra.gmra.mxu1 %v2105_v13 }
 0x8c1   :  { %v1748_v62 = vpop.f32.mrf.mxu0 }
 0x8c2   :  { %v4851_v11 = vadd.f32 %v1748_v62, %v4841_v19 }
 0x8c3   :  { %v1750_v27 = vpop.f32.mrf.mxu0 }
 0x8c4   :  { %v1853_v18 = vmul.f32 0.044715, %v4851_v11  ;;  %v4855_v58 = vadd.f32 %v1750_v27, %v4844_v29 }
 0x8c5   :  { %v1752_v36 = vpop.f32.mrf.mxu0 }
 0x8c6   :  { %v1885_v41 = vmul.f32 %v1853_v18, %v4851_v11  ;;  %v1854_v30 = vmul.f32 0.044715, %v4855_v58  ;;  %v1753_v32 = vadd.f32 %v1752_v36, %v4841_v19 }
 0x8c7   :  { %v1754_v17 = vpop.f32.mrf.mxu0 }
 0x8c8   :  { %v1917_v39 = vmul.f32 %v1885_v41, %v4851_v11  ;;  %v1886_v40 = vmul.f32 %v1854_v30, %v4855_v58  ;;  %v1855_v47 = vmul.f32 0.044715, %v1753_v32  ;;  %v1755_v3 = vadd.f32 %v1754_v17, %v4844_v29 }
 0x8c9   :  { %v1758_v2 = vpop.f32.mrf.mxu0 }
 0x8ca   :  { %v1918_v49 = vmul.f32 %v1886_v40, %v4855_v58  ;;  %v1887_v51 = vmul.f32 %v1855_v47, %v1753_v32  ;;  %v1856_v53 = vmul.f32 0.044715, %v1755_v3  ;;  %v4865_v45 = vadd.f32 %v1758_v2, %v4841_v19 }
 0x8cb   :  { %v1760_v59 = vpop.f32.mrf.mxu0  ;;  %v1949_v54 = vadd.f32 %v1917_v39, %v4851_v11 }
 0x8cc   :  { %v1919_v57 = vmul.f32 %v1887_v51, %v1753_v32  ;;  %v1888_v61 = vmul.f32 %v1856_v53, %v1755_v3  ;;  %v1857_v1 = vmul.f32 0.044715, %v4865_v45  ;;  %v4870_v31 = vadd.f32 %v1760_v59, %v4844_v29 }
 0x8cd   :  { %v1762_v50 = vpop.f32.mrf.mxu0  ;;  %v1950_v15 = vadd.f32 %v1918_v49, %v4855_v58  ;;  %v1981_v55 = vmul.f32 0.7978846, %v1949_v54 }
 0x8ce   :  { %v1920_v25 = vmul.f32 %v1888_v61, %v1755_v3  ;;  %v1889_v8 = vmul.f32 %v1857_v1, %v4865_v45  ;;  %v1858_v4 = vmul.f32 0.044715, %v4870_v31  ;;  %v1763_v14 = vadd.f32 %v1762_v50, %v4841_v19 }
 0x8cf   :  { %v1764_v24 = vpop.f32.mrf.mxu0  ;;  %v1982_v44 = vmul.f32 0.7978846, %v1950_v15  ;;  %v1951_v34 = vadd.f32 %v1919_v57, %v1753_v32 }
 0x8d0   :  { %v1921_v35 = vmul.f32 %v1889_v8, %v4865_v45  ;;  %v1890_v38 = vmul.f32 %v1858_v4, %v4870_v31  ;;  %v1859_v52 = vmul.f32 0.044715, %v1763_v14  ;;  %v1765_v48 = vadd.f32 %v1764_v24, %v4844_v29 }
 0x8d1   :  { %v1952_v10 = vadd.f32 %v1920_v25, %v1755_v3  ;;  %3440 = vtanh.f32 %v1982_v44  ;;  %v1983_v13 = vmul.f32 0.7978846, %v1951_v34  ;;  %v1822_v8 = vmul.f32 0.5, %v4855_v58 }
 0x8d2   :  { %v1922_v62 = vmul.f32 %v1890_v38, %v4870_v31  ;;  %v1891_v27 = vmul.f32 %v1859_v52, %v1763_v14  ;;  %v1860_v18 = vmul.f32 0.044715, %v1765_v48  ;;  %3442 = vtanh.f32 %v1981_v55 }
 0x8d3   :  { %v1984_v36 = vmul.f32 0.7978846, %v1952_v10  ;;  %3444 = vtanh.f32 %v1983_v13  ;;  %v1953_v41 = vadd.f32 %v1921_v35, %v4865_v45  ;;  %v1823_v55 = vmul.f32 0.5, %v1753_v32 }
 0x8d4   :  { %v1923_v30 = vmul.f32 %v1891_v27, %v1763_v14  ;;  %v1892_v17 = vmul.f32 %v1860_v18, %v1765_v48  ;;  %v1954_v39 = vadd.f32 %v1922_v62, %v4870_v31  ;;  %v1824_v4 = vmul.f32 0.5, %v1755_v3 }
 0x8d5   :  { %3446 = vtanh.f32 %v1984_v36  ;;  %v1985_v40 = vmul.f32 0.7978846, %v1953_v41  ;;  %v1821_v44 = vmul.f32 0.5, %v4851_v11  ;;  %v1826_v32 = vmul.f32 0.5, %v4870_v31 }
 0x8d6   :  { %v1924_v47 = vmul.f32 %v1892_v17, %v1765_v48  ;;  %v1986_v2 = vmul.f32 0.7978846, %v1954_v39  ;;  %v1955_v49 = vadd.f32 %v1923_v30, %v1763_v14  ;;  %v1828_v58 = vmul.f32 0.5, %v1765_v48 }
 0x8d7   :  { %v1827_v17 = vmul.f32 0.5, %v1763_v14  ;;  %v1407_v31 = vmul.f32 0.0078125, %v4810_v16 }
 0x8d8   :  { %v1956_v51 = vadd.f32 %v1924_v47, %v1765_v48  ;;  %3448 = vtanh.f32 %v1986_v2  ;;  %v1987_v53 = vmul.f32 0.7978846, %v1955_v49  ;;  %v1825_v47 = vmul.f32 0.5, %v4865_v45 }
 0x8d9   :  { %3450 = vtanh.f32 %v1985_v40  ;;  %v1409_v45 = vmul.f32 0.0078125, %v4818_v23 }
 0x8da   :  { %v1988_v59 = vmul.f32 0.7978846, %v1956_v51  ;;  %3452 = vtanh.f32 %v1987_v53 }
 0x8dc   :  { %3454 = vtanh.f32 %v1988_v59 }
 0x8de   :  { %v3441_v54 = vpop.eup %3440 }
 0x8df   :  { %v3443_v57 = vpop.eup %3442  ;;  %v2046_v1 = vadd.f32 1.0, %v3441_v54  ;;  %v2842_v54 = vld [vmem:[#allocation11] ss:$0 sm:$0xff] }
 0x8e0   :  { %v3445_v61 = vpop.eup %3444  ;;  %v2045_v25 = vadd.f32 1.0, %v3443_v57 }
 0x8e1   :  { %v2047_v50 = vadd.f32 1.0, %v3445_v61  ;;  %v2078_v38 = vmul.f32 %v2046_v1, %v1822_v8 }
 0x8e2   :  { %v3447_v15 = vpop.eup %3446  ;;  %v2077_v13 = vmul.f32 %v2045_v25, %v1821_v44  ;;  %v1411_v25 = vmul.f32 0.0078125, %v4820_v7  ;;  %v3319_v44 = vld [vmem:[#allocation16 + $0x20] sm:$0xff]  }
 0x8e3   :  { %v2048_v24 = vadd.f32 1.0, %v3447_v15  ;;  %v2079_v34 = vmul.f32 %v2047_v50, %v1823_v55  ;;  %v4888_v50 = vsub.f32 %v4614_v12, %v1407_v31  ;;  %v4893_v55 = vsub.f32 %v4666_v28, %v1409_v45 }
 0x8e4   :  { %v4899_v8 = vsub.f32 %v4680_v6, %v1411_v25  ;;  %v1413_v12 = vmul.f32 0.0078125, %v4822_v42  ;;  %v1415_v28 = vmul.f32 0.0078125, %v4824_v26  ;;  %v3317_v26 = vld [vmem:[#allocation16 + $0x30] sm:$0xff]  }
 0x8e5   :  { %v3449_v35 = vpop.eup %3448  ;;  %v2080_v52 = vmul.f32 %v2048_v24, %v1824_v4  ;;  %v2107_v18 = vpack.c.bf16 %v2079_v34, %v2077_v13  ;;  %v1439_v16 = vmul.f32 %v4888_v50, %v4888_v50  ;;  %v1441_v23 = vmul.f32 %v4893_v55, %v4893_v55  ;;  %v3316_v24 = vld [vmem:[#allocation16 + $0x38] sm:$0xff]  }
 0x8e6   :  { %v3451_v10 = vpop.eup %3450  ;;  %v2050_v36 = vadd.f32 1.0, %v3449_v35  ;;  %v1443_v7 = vmul.f32 %v4899_v8, %v4899_v8  ;;  %v4911_v4 = vsub.f32 %v4706_v22, %v1415_v28  ;;  %v3318_v22 = vld [vmem:[#allocation16 + $0x28] sm:$0xff]   ;;  %v3320_v34 = vld [vmem:[#allocation16 + $0x18] sm:$0xff]   ;;  %v1461_v35 = vpop.xlane.xlu0 %1460 }
 0x8e7   :  { %v3453_v62 = vpop.eup %3452  ;;  %v2108_v27 = vpack.c.bf16 %v2080_v52, %v2078_v38  ;;  %v2049_v11 = vadd.f32 1.0, %v3451_v10  ;;  %v1486_v38 = vmul.f32 0.0078125, %v1461_v35 }
 0x8e8   :  { %v2051_v41 = vadd.f32 1.0, %v3453_v62  ;;  %v2082_v39 = vmul.f32 %v2050_v36, %v1826_v32  ;;  %v1447_v42 = vmul.f32 %v4911_v4, %v4911_v4 }
 0x8e9   :  { %v3455_v30 = vpop.eup %3454  ;;  %2295 = vmatprep.mubr.bf16.mxu1 %v2108_v27  ;;  %v2081_v51 = vmul.f32 %v2049_v11, %v1825_v47  ;;  %v1502_v52 = vadd.f32 1e-12, %v1486_v38 }
 0x8ea   :  { %2296 = vmatmul.mubr.bf16.gmra.mxu1 %v2107_v18  ;;  %v2052_v3 = vadd.f32 1.0, %v3455_v30  ;;  %v2083_v2 = vmul.f32 %v2051_v41, %v1827_v17  ;;  %v1465_v10 = vpop.xlane.xlu0 %1464 }
 0x8eb   :  { %3456 = vrsqrt.f32 %v1502_v52  ;;  %v1488_v18 = vmul.f32 0.0078125, %v1465_v10 }
 0x8ec   :  { %v2084_v40 = vmul.f32 %v2052_v3, %v1828_v58  ;;  %v2109_v53 = vpack.c.bf16 %v2083_v2, %v2081_v51 }
 0x8ed   :  { %v1504_v17 = vadd.f32 1e-12, %v1488_v18 }
 0x8ee   :  { %v2110_v49 = vpack.c.bf16 %v2084_v40, %v2082_v39  ;;  %v1469_v11 = vpop.xlane.xlu0 %1468 }
 0x8ef   :  { %v1490_v51 = vmul.f32 0.0078125, %v1469_v11 }
 0x8f0   :  { %2301 = vmatprep.mubr.bf16.mxu1 %v2110_v49 }
 0x8f2   :  { %2302 = vmatmul.mubr.bf16.gmra.mxu1 %v2109_v53 }
 0x915   :  { %v2976_v59 = vpop.f32.mrf.mxu1 }
 0x917   :  { %v2977_v57 = vpop.f32.mrf.mxu1 }
 0x918   :  { %v2978_v61 = vadd.f32 %v2977_v57, %v2976_v59 }
 0x919   :  { %v2979_v48 = vpop.f32.mrf.mxu1 }
 0x91a   :  { %v2291_v1 = vadd.f32 %v2978_v61, %v2842_v54  ;;  %v3457_v61 = vpop.eup %3456  ;;  %v1506_v48 = vadd.f32 1e-12, %v1490_v51 }
 0x91b   :  { %v2980_v14 = vpop.f32.mrf.mxu1 }
 0x91c   :  { %v2338_v15 = vadd.f32 %v2291_v1, %v4743_v21  ;;  %v4905_v21 = vsub.f32 %v4694_v5, %v1413_v12  ;;  %v3896_v5 = vmov 0.0   ;;  %v1473_v1 = vpop.xlane.xlu0 %1472  ;;  %v1534_v12 = vmul.f32 %v3457_v61, %v4728_v37 }
 0x91d   :  { %3170 = vmatprep.subr.bf16.mxu0 %v3896_v5  ;;  %3190 = vmatprep.subr.bf16.mxu1 %v3896_v5 }
 0x91e   :  { %2341 = vadd.xlane.f32.xlu1 %v2338_v15  ;;  %v1445_v6 = vmul.f32 %v4905_v21, %v4905_v21  ;;  %3171 = vmatpush3.bf16.msra.mxu0 %v3316_v24 }
 0x91f   :  { %3172 = vmatprep.subr.bf16.mxu0 %v3896_v5 }
 0x922   :  { %1462 = vadd.xlane.f32.xlu1 %v1439_v16  ;;  %3173 = vmatpush3.bf16.msra.mxu0 %v3317_v26  ;;  %v1492_v16 = vmul.f32 0.0078125, %v1473_v1 }
 0x923   :  { %3174 = vmatprep.subr.bf16.mxu0 %v3896_v5 }
 0x926   :  { %1466 = vadd.xlane.f32.xlu1 %v1441_v23  ;;  %3175 = vmatpush3.bf16.msra.mxu0 %v3318_v22  ;;  %v1477_v22 = vpop.xlane.xlu0 %1476 }
 0x927   :  { %3176 = vmatprep.subr.bf16.mxu0 %v3896_v5  ;;  %v1494_v37 = vmul.f32 0.0078125, %v1477_v22 }
 0x92a   :  { %1470 = vadd.xlane.f32.xlu1 %v1443_v7  ;;  %3177 = vmatpush3.bf16.msra.mxu0 %v3319_v44  ;;  %v1508_v7 = vadd.f32 1e-12, %v1492_v16 }
 0x92b   :  { %3178 = vmatprep.subr.bf16.mxu0 %v3896_v5 }
 0x92e   :  { %1474 = vadd.xlane.f32.xlu1 %v1445_v6  ;;  %3179 = vmatpush3.bf16.msra.mxu0 %v3320_v34 }
 0x92f   :  { %3180 = vmatprep.subr.bf16.mxu0 %v3896_v5 }
 0x932   :  { %1478 = vadd.xlane.f32.xlu1 %v1447_v42  ;;  %v1556_v42 = vmul.f32 %v4733_v33, %v1534_v12 }
 0x934   :  { %v1578_v38 = vadd.f32 %v4739_v56, %v1556_v42  ;;  %v2860_v42 = vld [vmem:[#allocation14] ss:$0 sm:$0xff] }
 0x9a7   :  { %v2342_v13 = vpop.xlane.xlu1 %2341 }
 0x9a8   :  { %v2343_v62 = vmul.f32 0.0078125, %v2342_v13 }
 0x9aa   :  { %v2982_v27 = vpop.f32.mrf.mxu1  ;;  %v4924_v36 = vsub.f32 %v2338_v15, %v2343_v62 }
 0x9ab   :  { %v1463_v30 = vpop.xlane.xlu1 %1462 }
 0x9ac   :  { %v2983_v41 = vpop.f32.mrf.mxu1  ;;  %v1487_v32 = vmul.f32 0.0078125, %v1463_v30  ;;  %v2345_v58 = vmul.f32 %v4924_v36, %v4924_v36  ;;  %v1510_v30 = vadd.f32 1e-12, %v1494_v37  ;;  %v3331_v37 = vld [vmem:[#allocation19] sm:$0xff]  }
 0x9ad   :  { %v3321_v41 = vld [vmem:[#allocation16 + $0x10] sm:$0xff]  }
 0x9ae   :  { %v2985_v3 = vpop.f32.mrf.mxu1  ;;  %v1503_v39 = vadd.f32 1e-12, %v1487_v32  ;;  %2346 = vadd.xlane.f32.xlu0 %v2345_v58  ;;  %3181 = vmatpush3.bf16.msra.mxu0 %v3321_v41 }
 0x9af   :  { %v1467_v47 = vpop.xlane.xlu1 %1466  ;;  %3182 = vmatprep.subr.bf16.mxu0 %v3896_v5 }
 0x9b0   :  { %v2986_v40 = vpop.f32.mrf.mxu1  ;;  %3458 = vrsqrt.f32 %v1503_v39  ;;  %v1489_v2 = vmul.f32 0.0078125, %v1467_v47  ;;  %v3323_v39 = vld [vmem:[#allocation16] sm:$0xff]  }
 0x9b1   :  { %3460 = vrsqrt.f32 %v1504_v17 }
 0x9b2   :  { %v2988_v49 = vpop.f32.mrf.mxu1  ;;  %v1505_v53 = vadd.f32 1e-12, %v1489_v2 }
 0x9b3   :  { %v1471_v54 = vpop.xlane.xlu1 %1470 }
 0x9b4   :  { %v2989_v59 = vpop.f32.mrf.mxu1  ;;  %3462 = vrsqrt.f32 %v1505_v53  ;;  %v1491_v57 = vmul.f32 0.0078125, %v1471_v54 }
 0x9b6   :  { %v2991_v31 = vpop.f32.mrf.mxu1  ;;  %v1507_v14 = vadd.f32 1e-12, %v1491_v57 }
 0x9b7   :  { %v1475_v15 = vpop.xlane.xlu1 %1474 }
 0x9b8   :  { %v2992_v45 = vpop.f32.mrf.mxu1  ;;  %3464 = vrsqrt.f32 %v1507_v14  ;;  %v1493_v25 = vmul.f32 0.0078125, %v1475_v15 }
 0x9b9   :  { %3466 = vrsqrt.f32 %v1506_v48 }
 0x9ba   :  { %v1509_v23 = vadd.f32 1e-12, %v1493_v25 }
 0x9bb   :  { %v1479_v6 = vpop.xlane.xlu1 %1478 }
 0x9bc   :  { %3468 = vrsqrt.f32 %v1509_v23  ;;  %v1495_v44 = vmul.f32 0.0078125, %v1479_v6  ;;  %v2859_v6 = vld [vmem:[#allocation13] ss:$0 sm:$0xff] }
 0x9bd   :  { %v3459_v28 = vpop.eup %3458  ;;  %3470 = vrsqrt.f32 %v1508_v7 }
 0x9be   :  { %v1535_v24 = vmul.f32 %v3459_v28, %v4888_v50  ;;  %v3461_v26 = vpop.eup %3460  ;;  %v1511_v62 = vadd.f32 1e-12, %v1495_v44  ;;  %v3325_v44 = vld [vmem:[#allocation19 + $0x30] sm:$0xff]  }
 0x9bf   :  { %v1536_v10 = vmul.f32 %v3461_v26, %v4749_v9 }
 0x9c0   :  { %v1557_v34 = vmul.f32 %v4733_v33, %v1535_v24  ;;  %3472 = vrsqrt.f32 %v1511_v62 }
 0x9c1   :  { %v3463_v35 = vpop.eup %3462  ;;  %v1558_v32 = vmul.f32 %v4733_v33, %v1536_v10  ;;  %3474 = vrsqrt.f32 %v1510_v30 }
 0x9c2   :  { %v1579_v52 = vadd.f32 %v4739_v56, %v1557_v34  ;;  %v1537_v13 = vmul.f32 %v3463_v35, %v4893_v55  ;;  %v3322_v55 = vld [vmem:[#allocation16 + $0x8] sm:$0xff]  }
 0x9c3   :  { %v1580_v17 = vadd.f32 %v4739_v56, %v1558_v32  ;;  %3183 = vmatpush3.bf16.msra.mxu0 %v3322_v55  ;;  %v3326_v34 = vld [vmem:[#allocation19 + $0x28] sm:$0xff]   ;;  %v3327_v35 = vld [vmem:[#allocation19 + $0x20] sm:$0xff]  }
 0x9c4   :  { %v1591_v27 = vpack.c.bf16 %v1579_v52, %v1578_v38  ;;  %v1559_v50 = vmul.f32 %v4733_v33, %v1537_v13  ;;  %3184 = vmatprep.subr.bf16.mxu0 %v3896_v5  ;;  %v3329_v38 = vld [vmem:[#allocation19 + $0x10] sm:$0xff]  }
 0x9c5   :  { %v3465_v18 = vpop.eup %3464 }
 0x9c6   :  { %1767 = vmatmul.mubr.bf16.gmra.mxu0 %v1591_v27  ;;  %v3467_v58 = vpop.eup %3466  ;;  %v1581_v3 = vadd.f32 %v4739_v56, %v1559_v50  ;;  %v1539_v9 = vmul.f32 %v3465_v18, %v4899_v8 }
 0x9c7   :  { %1776 = vmatprep.mubr.bf16.mxu0 %v3894_v0  ;;  %v1538_v11 = vmul.f32 %v3467_v58, %v4754_v63  ;;  %3185 = vmatpush3.bf16.msra.mxu0 %v3323_v39 }
 0x9c8   :  { %v1592_v40 = vpack.c.bf16 %v1581_v3, %v1580_v17  ;;  %v1561_v47 = vmul.f32 %v4733_v33, %v1539_v9 }
 0x9c9   :  { %v3469_v2 = vpop.eup %3468  ;;  %v1560_v8 = vmul.f32 %v4733_v33, %v1538_v11 }
 0x9ca   :  { %v3471_v49 = vpop.eup %3470  ;;  %v1583_v51 = vadd.f32 %v4739_v56, %v1561_v47  ;;  %v1541_v53 = vmul.f32 %v3469_v2, %v4905_v21 }
 0x9cb   :  { %v1582_v63 = vadd.f32 %v4739_v56, %v1560_v8  ;;  %v1540_v59 = vmul.f32 %v3471_v49, %v4759_v60 }
 0x9cc   :  { %v1563_v57 = vmul.f32 %v4733_v33, %v1541_v53 }
 0x9cd   :  { %v1593_v54 = vpack.c.bf16 %v1583_v51, %v1582_v63  ;;  %v3473_v31 = vpop.eup %3472  ;;  %v1562_v61 = vmul.f32 %v4733_v33, %v1540_v59 }
 0x9ce   :  { %1777 = vmatmul.mubr.bf16.gmra.mxu0 %v1592_v40  ;;  %v3475_v48 = vpop.eup %3474  ;;  %v1585_v1 = vadd.f32 %v4739_v56, %v1563_v57  ;;  %v1543_v14 = vmul.f32 %v3473_v31, %v4911_v4 }
 0x9cf   :  { %1786 = vmatprep.mubr.bf16.mxu0 %v3894_v0  ;;  %v1584_v21 = vadd.f32 %v4739_v56, %v1562_v61  ;;  %v1542_v45 = vmul.f32 %v3475_v48, %v4764_v20 }
 0x9d0   :  { %v1565_v60 = vmul.f32 %v4733_v33, %v1543_v14 }
 0x9d1   :  { %v1594_v15 = vpack.c.bf16 %v1585_v1, %v1584_v21  ;;  %v1564_v25 = vmul.f32 %v4733_v33, %v1542_v45 }
 0x9d2   :  { %v1587_v16 = vadd.f32 %v4739_v56, %v1565_v60 }
 0x9d3   :  { %v1586_v12 = vadd.f32 %v4739_v56, %v1564_v25  ;;  %v3324_v56 = vld [vmem:[#allocation19 + $0x38] sm:$0xff]  }
 0x9d4   :  { %3191 = vmatpush3.bf16.msra.mxu1 %v3324_v56 }
 0x9d5   :  { %v1595_v23 = vpack.c.bf16 %v1587_v16, %v1586_v12  ;;  %3192 = vmatprep.subr.bf16.mxu1 %v3896_v5 }
 0x9d6   :  { %1787 = vmatmul.mubr.bf16.gmra.mxu0 %v1593_v54 }
 0x9d7   :  { %1796 = vmatprep.mubr.bf16.mxu0 %v3894_v0 }
 0x9d8   :  { %3193 = vmatpush3.bf16.msra.mxu1 %v3325_v44 }
 0x9d9   :  { %3194 = vmatprep.subr.bf16.mxu1 %v3896_v5 }
 0x9dc   :  { %3195 = vmatpush3.bf16.msra.mxu1 %v3326_v34 }
 0x9dd   :  { %3196 = vmatprep.subr.bf16.mxu1 %v3896_v5 }
 0x9de   :  { %1797 = vmatmul.mubr.bf16.gmra.mxu0 %v1594_v15 }
 0x9df   :  { %1806 = vmatprep.mubr.bf16.mxu0 %v3894_v0 }
 0x9e0   :  { %3197 = vmatpush3.bf16.msra.mxu1 %v3327_v35 }
 0x9e1   :  { %3198 = vmatprep.subr.bf16.mxu1 %v3896_v5 }
 0x9e6   :  { %1807 = vmatmul.mubr.bf16.gmra.mxu0 %v1595_v23 }
 0x9e7   :  { %3186 = vmatprep.mubr.msk.bf16.mxu0 %vm3897_vm0, %v3896_v5 }
 0xa37   :  { %v2347_v4 = vpop.xlane.xlu0 %2346 }
 0xa38   :  { %v2348_v20 = vmul.f32 0.0078125, %v2347_v4 }
 0xa3a   :  { %v2349_v28 = vadd.f32 1e-12, %v2348_v20 }
 0xa3c   :  { %3476 = vrsqrt.f32 %v2349_v28 }
 0xa49   :  { %v3477_v7 = vpop.eup %3476 }
 0xa4a   :  { %v2351_v33 = vmul.f32 %v3477_v7, %v4924_v36  ;;  %v3328_v36 = vld [vmem:[#allocation19 + $0x18] sm:$0xff]  }
 0xa4b   :  { %3199 = vmatpush3.bf16.msra.mxu1 %v3328_v36 }
 0xa4c   :  { %v2358_v24 = vmul.f32 %v2859_v6, %v2351_v33  ;;  %3200 = vmatprep.subr.bf16.mxu1 %v3896_v5 }
 0xa4e   :  { %v2365_v26 = vadd.f32 %v2860_v42, %v2358_v24 }
 0xa4f   :  { %3201 = vmatpush3.bf16.msra.mxu1 %v3329_v38 }
 0xa50   :  { %v2366_v22 = vpack.c.bf16 %v2365_v26, %v2365_v26  ;;  %3202 = vmatprep.subr.bf16.mxu1 %v3896_v5 }
 0xa52   :  { %3187 = vmatmul.mubr.bf16.vlgmr.msra.gmra.mxu0 %v2366_v22 }
 0xa53   :  { %2732 = vmatprep.mubr.bf16.mxu0 %v3894_v0  ;;  %v3330_v0 = vld [vmem:[#allocation19 + $0x8] sm:$0xff]  }
 0xa54   :  { %3203 = vmatpush3.bf16.msra.mxu1 %v3330_v0 }
 0xa55   :  { %3204 = vmatprep.subr.bf16.mxu1 %v3896_v5 }
 0xa58   :  { %3205 = vmatpush3.bf16.msra.mxu1 %v3331_v37 }
 0xa86   :  { %v1768_v52 = vpop.f32.mrf.mxu0 }
 0xa87   :  { %v4976_v10 = vadd.f32 %v1768_v52, %v4841_v19 }
 0xa88   :  { %v1770_v13 = vpop.f32.mrf.mxu0 }
 0xa89   :  { %v1861_v62 = vmul.f32 0.044715, %v4976_v10  ;;  %v4980_v27 = vadd.f32 %v1770_v13, %v4844_v29 }
 0xa8a   :  { %v1772_v50 = vpop.f32.mrf.mxu0 }
 0xa8b   :  { %v1893_v18 = vmul.f32 %v1861_v62, %v4976_v10  ;;  %v1862_v41 = vmul.f32 0.044715, %v4980_v27  ;;  %v4985_v30 = vadd.f32 %v1772_v50, %v4841_v19 }
 0xa8c   :  { %v1774_v32 = vpop.f32.mrf.mxu0 }
 0xa8d   :  { %v1925_v58 = vmul.f32 %v1893_v18, %v4976_v10  ;;  %v1894_v3 = vmul.f32 %v1862_v41, %v4980_v27  ;;  %v1863_v9 = vmul.f32 0.044715, %v4985_v30  ;;  %v4991_v55 = vadd.f32 %v1774_v32, %v4844_v29 }
 0xa8e   :  { %v1778_v17 = vpop.f32.mrf.mxu0 }
 0xa8f   :  { %v1926_v11 = vmul.f32 %v1894_v3, %v4980_v27  ;;  %v1895_v39 = vmul.f32 %v1863_v9, %v4985_v30  ;;  %v1864_v40 = vmul.f32 0.044715, %v4991_v55  ;;  %v4997_v47 = vadd.f32 %v1778_v17, %v4841_v19 }
 0xa90   :  { %v1780_v2 = vpop.f32.mrf.mxu0  ;;  %v1957_v49 = vadd.f32 %v1925_v58, %v4976_v10  ;;  %v1829_v9 = vmul.f32 0.5, %v4976_v10 }
 0xa91   :  { %v1927_v8 = vmul.f32 %v1895_v39, %v4985_v30  ;;  %v1896_v51 = vmul.f32 %v1864_v40, %v4991_v55  ;;  %v1865_v53 = vmul.f32 0.044715, %v4997_v47  ;;  %v5004_v63 = vadd.f32 %v1780_v2, %v4844_v29 }
 0xa92   :  { %v1782_v59 = vpop.f32.mrf.mxu0  ;;  %v1958_v54 = vadd.f32 %v1926_v11, %v4980_v27  ;;  %v1989_v57 = vmul.f32 0.7978846, %v1957_v49 }
 0xa93   :  { %v1928_v31 = vmul.f32 %v1896_v51, %v4991_v55  ;;  %v1897_v61 = vmul.f32 %v1865_v53, %v4997_v47  ;;  %v1866_v48 = vmul.f32 0.044715, %v5004_v63  ;;  %v5011_v1 = vadd.f32 %v1782_v59, %v4841_v19 }
 0xa94   :  { %v1784_v14 = vpop.f32.mrf.mxu0  ;;  %v1990_v21 = vmul.f32 0.7978846, %v1958_v54  ;;  %v1959_v45 = vadd.f32 %v1927_v8, %v4985_v30  ;;  %3478 = vtanh.f32 %v1989_v57  ;;  %v1830_v51 = vmul.f32 0.5, %v4980_v27 }
 0xa95   :  { %v1929_v15 = vmul.f32 %v1897_v61, %v4997_v47  ;;  %v1898_v60 = vmul.f32 %v1866_v48, %v5004_v63  ;;  %v1867_v25 = vmul.f32 0.044715, %v5011_v1  ;;  %v5018_v16 = vadd.f32 %v1784_v14, %v4844_v29 }
 0xa96   :  { %v1788_v12 = vpop.f32.mrf.mxu0  ;;  %v1960_v23 = vadd.f32 %v1928_v31, %v4991_v55  ;;  %3480 = vtanh.f32 %v1990_v21  ;;  %v1991_v4 = vmul.f32 0.7978846, %v1959_v45  ;;  %v1831_v53 = vmul.f32 0.5, %v4985_v30 }
 0xa97   :  { %v1930_v20 = vmul.f32 %v1898_v60, %v5004_v63  ;;  %v1899_v28 = vmul.f32 %v1867_v25, %v5011_v1  ;;  %v1868_v7 = vmul.f32 0.044715, %v5018_v16  ;;  %v5025_v6 = vadd.f32 %v1788_v12, %v4841_v19 }
 0xa98   :  { %v1790_v33 = vpop.f32.mrf.mxu0  ;;  %v1992_v42 = vmul.f32 0.7978846, %v1960_v23  ;;  %3482 = vtanh.f32 %v1991_v4  ;;  %v1961_v24 = vadd.f32 %v1929_v15, %v4997_v47  ;;  %v1832_v14 = vmul.f32 0.5, %v4991_v55 }
 0xa99   :  { %v1931_v26 = vmul.f32 %v1899_v28, %v5011_v1  ;;  %v1900_v22 = vmul.f32 %v1868_v7, %v5018_v16  ;;  %v1869_v56 = vmul.f32 0.044715, %v5025_v6  ;;  %v5032_v44 = vadd.f32 %v1790_v33, %v4844_v29 }
 0xa9a   :  { %v1792_v34 = vpop.f32.mrf.mxu0  ;;  %3484 = vtanh.f32 %v1992_v42  ;;  %v1962_v35 = vadd.f32 %v1930_v20, %v5004_v63  ;;  %v1993_v36 = vmul.f32 0.7978846, %v1961_v24  ;;  %v5066_v27 = vmul.f32 0.5, %v4997_v47 }
 0xa9b   :  { %v1932_v38 = vmul.f32 %v1900_v22, %v5018_v16  ;;  %v1901_v0 = vmul.f32 %v1869_v56, %v5025_v6  ;;  %v1870_v37 = vmul.f32 0.044715, %v5032_v44  ;;  %v5039_v52 = vadd.f32 %v1792_v34, %v4841_v19 }
 0xa9c   :  { %v1794_v13 = vpop.f32.mrf.mxu0  ;;  %v1994_v62 = vmul.f32 0.7978846, %v1962_v35  ;;  %v1963_v50 = vadd.f32 %v1931_v26, %v5011_v1  ;;  %3486 = vtanh.f32 %v1993_v36  ;;  %v5076_v55 = vmul.f32 0.5, %v5004_v63 }
 0xa9d   :  { %v1933_v18 = vmul.f32 %v1901_v0, %v5025_v6  ;;  %v1902_v41 = vmul.f32 %v1870_v37, %v5032_v44  ;;  %v1871_v32 = vmul.f32 0.044715, %v5039_v52  ;;  %v5046_v58 = vadd.f32 %v1794_v13, %v4844_v29 }
 0xa9e   :  { %v1798_v3 = vpop.f32.mrf.mxu0  ;;  %v1964_v17 = vadd.f32 %v1932_v38, %v5018_v16  ;;  %3488 = vtanh.f32 %v1994_v62  ;;  %v1995_v11 = vmul.f32 0.7978846, %v1963_v50  ;;  %v1835_v47 = vmul.f32 0.5, %v5011_v1 }
 0xa9f   :  { %v1934_v39 = vmul.f32 %v1902_v41, %v5032_v44  ;;  %v1903_v40 = vmul.f32 %v1871_v32, %v5039_v52  ;;  %v1872_v2 = vmul.f32 0.044715, %v5046_v58  ;;  %v5054_v49 = vadd.f32 %v1798_v3, %v4841_v19 }
 0xaa0   :  { %v1800_v8 = vpop.f32.mrf.mxu0  ;;  %v1996_v59 = vmul.f32 0.7978846, %v1964_v17  ;;  %3490 = vtanh.f32 %v1995_v11  ;;  %v1965_v61 = vadd.f32 %v1933_v18, %v5025_v6 }
 0xaa1   :  { %v3479_v10 = vpop.eup %3478  ;;  %v1935_v54 = vmul.f32 %v1903_v40, %v5039_v52  ;;  %v1904_v57 = vmul.f32 %v1872_v2, %v5046_v58  ;;  %v5061_v31 = vadd.f32 %v1800_v8, %v4844_v29  ;;  %v1966_v30 = vadd.f32 %v1934_v39, %v5032_v44 }
 0xaa2   :  { %v1802_v48 = vpop.f32.mrf.mxu0  ;;  %3492 = vtanh.f32 %v1996_v59  ;;  %v1873_v15 = vmul.f32 0.044715, %v5054_v49  ;;  %v2053_v23 = vadd.f32 1.0, %v3479_v10  ;;  %v1997_v42 = vmul.f32 0.7978846, %v1965_v61 }
 0xaa3   :  { %v3481_v21 = vpop.eup %3480  ;;  %v1936_v45 = vmul.f32 %v1904_v57, %v5046_v58  ;;  %v1874_v60 = vmul.f32 0.044715, %v5061_v31  ;;  %v5073_v25 = vadd.f32 %v1802_v48, %v4841_v19  ;;  %v1998_v4 = vmul.f32 0.7978846, %v1966_v30 }
 0xaa4   :  { %v1804_v12 = vpop.f32.mrf.mxu0  ;;  %v2054_v7 = vadd.f32 1.0, %v3481_v21  ;;  %v1967_v33 = vadd.f32 %v1935_v54, %v5039_v52  ;;  %v1905_v34 = vmul.f32 %v1873_v15, %v5054_v49  ;;  %v2085_v37 = vmul.f32 %v2053_v23, %v1829_v9 }
 0xaa5   :  { %v3483_v20 = vpop.eup %3482  ;;  %v5080_v28 = vadd.f32 %v1804_v12, %v4844_v29  ;;  %v1906_v24 = vmul.f32 %v1874_v60, %v5061_v31  ;;  %v1968_v56 = vadd.f32 %v1936_v45, %v5046_v58  ;;  %3494 = vtanh.f32 %v1998_v4 }
 0xaa6   :  { %v1808_v26 = vpop.f32.mrf.mxu0  ;;  %v2055_v22 = vadd.f32 1.0, %v3483_v20  ;;  %v1875_v1 = vmul.f32 0.044715, %v5073_v25  ;;  %v2086_v3 = vmul.f32 %v2054_v7, %v1830_v51  ;;  %v1999_v40 = vmul.f32 0.7978846, %v1967_v33 }
 0xaa7   :  { %v3485_v63 = vpop.eup %3484  ;;  %v1876_v35 = vmul.f32 0.044715, %v5080_v28  ;;  %v5089_v36 = vadd.f32 %v1808_v26, %v4841_v19  ;;  %v2000_v62 = vmul.f32 0.7978846, %v1968_v56  ;;  %v1938_v17 = vmul.f32 %v1906_v24, %v5061_v31 }
 0xaa8   :  { %v1810_v38 = vpop.f32.mrf.mxu0  ;;  %v2056_v0 = vadd.f32 1.0, %v3485_v63  ;;  %v2087_v13 = vmul.f32 %v2055_v22, %v1831_v53  ;;  %v1907_v9 = vmul.f32 %v1875_v1, %v5073_v25  ;;  %v1937_v12 = vmul.f32 %v1905_v34, %v5054_v49 }
 0xaa9   :  { %v3487_v50 = vpop.eup %3486  ;;  %v1908_v18 = vmul.f32 %v1876_v35, %v5080_v28  ;;  %v1877_v41 = vmul.f32 0.044715, %v5089_v36  ;;  %v5094_v32 = vadd.f32 %v1810_v38, %v4844_v29  ;;  %3496 = vtanh.f32 %v2000_v62 }
 0xaaa   :  { %v1812_v11 = vpop.f32.mrf.mxu0  ;;  %v2088_v39 = vmul.f32 %v2056_v0, %v1832_v14  ;;  %v2111_v59 = vpack.c.bf16 %v2087_v13, %v2085_v37  ;;  %v2057_v51 = vadd.f32 1.0, %v3487_v50  ;;  %3498 = vtanh.f32 %v1997_v42 }
 0xaab   :  { %v3489_v2 = vpop.eup %3488  ;;  %v1878_v8 = vmul.f32 0.044715, %v5094_v32  ;;  %v5100_v53 = vadd.f32 %v1812_v11, %v4841_v19  ;;  %v1940_v10 = vmul.f32 %v1908_v18, %v5080_v28  ;;  %v1909_v48 = vmul.f32 %v1877_v41, %v5089_v36 }
 0xaac   :  { %v1814_v54 = vpop.f32.mrf.mxu0  ;;  %v2112_v57 = vpack.c.bf16 %v2088_v39, %v2086_v3  ;;  %v1836_v19 = vmul.f32 0.5, %v5018_v16  ;;  %v2058_v45 = vadd.f32 1.0, %v3489_v2  ;;  %3500 = vtanh.f32 %v1999_v40 }
 0xaad   :  { %v3491_v61 = vpop.eup %3490  ;;  %v1910_v14 = vmul.f32 %v1878_v8, %v5094_v32  ;;  %v1879_v30 = vmul.f32 0.044715, %v5100_v53  ;;  %v5107_v21 = vadd.f32 %v1814_v54, %v4844_v29  ;;  %v1939_v23 = vmul.f32 %v1907_v9, %v5073_v25 }
 0xaae   :  { %2307 = vmatprep.mubr.bf16.mxu1 %v2112_v57  ;;  %v2059_v15 = vadd.f32 1.0, %v3491_v61  ;;  %v1970_v29 = vadd.f32 %v1938_v17, %v5061_v31  ;;  %v1972_v42 = vadd.f32 %v1940_v10, %v5080_v28  ;;  %v1941_v16 = vmul.f32 %v1909_v48, %v5089_v36 }
 0xaaf   :  { %v3493_v60 = vpop.eup %3492  ;;  %v1911_v4 = vmul.f32 %v1879_v30, %v5100_v53  ;;  %v1880_v20 = vmul.f32 0.044715, %v5107_v21  ;;  %2308 = vmatmul.mubr.bf16.gmra.mxu1 %v2111_v59  ;;  %v1942_v24 = vmul.f32 %v1910_v14, %v5094_v32  ;;  %v2089_v22 = vmul.f32 %v2057_v51, %v5066_v27 }
 0xab0   :  { %v2060_v7 = vadd.f32 1.0, %v3493_v60  ;;  %v2091_v33 = vmul.f32 %v2059_v15, %v1835_v47  ;;  %v2090_v56 = vmul.f32 %v2058_v45, %v5076_v55  ;;  %v2002_v34 = vmul.f32 0.7978846, %v1970_v29 }
 0xab1   :  { %v1912_v26 = vmul.f32 %v1880_v20, %v5107_v21  ;;  %v2004_v1 = vmul.f32 0.7978846, %v1972_v42  ;;  %v1943_v47 = vmul.f32 %v1911_v4, %v5100_v53  ;;  %v1969_v0 = vadd.f32 %v1937_v12, %v5054_v49 }
 0xab2   :  { %v2092_v63 = vmul.f32 %v2060_v7, %v1836_v19  ;;  %v3495_v35 = vpop.eup %3494  ;;  %v1971_v37 = vadd.f32 %v1939_v23, %v5073_v25  ;;  %v2113_v62 = vpack.c.bf16 %v2091_v33, %v2089_v22  ;;  %3502 = vtanh.f32 %v2002_v34 }
 0xab3   :  { %v1944_v38 = vmul.f32 %v1912_v26, %v5107_v21  ;;  %3504 = vtanh.f32 %v2004_v1  ;;  %v2001_v50 = vmul.f32 0.7978846, %v1969_v0  ;;  %v1974_v55 = vadd.f32 %v1942_v24, %v5094_v32 }
 0xab4   :  { %v2114_v13 = vpack.c.bf16 %v2092_v63, %v2090_v56  ;;  %v2003_v27 = vmul.f32 0.7978846, %v1971_v37  ;;  %v1838_v18 = vmul.f32 0.5, %v5032_v44  ;;  %v2062_v41 = vadd.f32 1.0, %v3495_v35 }
 0xab5   :  { %v1976_v3 = vadd.f32 %v1944_v38, %v5107_v21  ;;  %3506 = vtanh.f32 %v2001_v50  ;;  %v2006_v11 = vmul.f32 0.7978846, %v1974_v55  ;;  %v1973_v39 = vadd.f32 %v1941_v16, %v5089_v36 }
 0xab6   :  { %2313 = vmatprep.mubr.bf16.mxu1 %v2114_v13  ;;  %v3497_v17 = vpop.eup %3496  ;;  %v1975_v40 = vadd.f32 %v1943_v47, %v5100_v53  ;;  %v1840_v2 = vmul.f32 0.5, %v5046_v58  ;;  %3508 = vtanh.f32 %v2003_v27  ;;  %v2094_v54 = vmul.f32 %v2062_v41, %v1838_v18 }
 0xab7   :  { %2314 = vmatmul.mubr.bf16.gmra.mxu1 %v2113_v62  ;;  %v2064_v9 = vadd.f32 1.0, %v3497_v17  ;;  %v2008_v8 = vmul.f32 0.7978846, %v1976_v3  ;;  %v3499_v59 = vpop.eup %3498  ;;  %3510 = vtanh.f32 %v2006_v11  ;;  %v2005_v10 = vmul.f32 0.7978846, %v1973_v39 }
 0xab8   :  { %v2007_v44 = vmul.f32 0.7978846, %v1975_v40  ;;  %v2061_v51 = vadd.f32 1.0, %v3499_v59  ;;  %v1837_v48 = vmul.f32 0.5, %v5025_v6  ;;  %v1839_v30 = vmul.f32 0.5, %v5039_v52 }
 0xab9   :  { %v2096_v57 = vmul.f32 %v2064_v9, %v1840_v2  ;;  %3512 = vtanh.f32 %v2008_v8  ;;  %v3501_v61 = vpop.eup %3500  ;;  %v1842_v4 = vmul.f32 0.5, %v5061_v31  ;;  %v1844_v20 = vmul.f32 0.5, %v5080_v28  ;;  %v3332_v2 = vld [vmem:[#allocation22 + $0x70] ss:$8 sps:$4 sm:$0xff]   ;;  %v3334_v9 = vld [vmem:[#allocation22 + $0x74] ss:$8 sps:$4 sm:$0xff]  }
 0xaba   :  { %3514 = vtanh.f32 %v2005_v10  ;;  %v2063_v19 = vadd.f32 1.0, %v3501_v61  ;;  %v2093_v58 = vmul.f32 %v2061_v51, %v1837_v48  ;;  %v1841_v24 = vmul.f32 0.5, %v5054_v49  ;;  %v3337_v8 = vld [vmem:[#allocation22 + $0x64] ss:$8 sps:$4 sm:$0xff]   ;;  %2700 = vmatprep.subr.bf16.mxu0 %v3334_v9  ;;  %v3340_v59 = vld [vmem:[#allocation22 + $0x54] ss:$8 sps:$4 sm:$0xff]  }
 0xabb   :  { %v2116_v14 = vpack.c.bf16 %v2096_v57, %v2094_v54  ;;  %3516 = vtanh.f32 %v2007_v44  ;;  %v1843_v26 = vmul.f32 0.5, %v5073_v25  ;;  %v1846_v34 = vmul.f32 0.5, %v5094_v32  ;;  %2701 = vmatpush1.bf16.msra.mxu0 %v3332_v2  ;;  %v3338_v10 = vld [vmem:[#allocation22 + $0x50] ss:$8 sps:$4 sm:$0xff]   ;;  %v3341_v44 = vld [vmem:[#allocation22 + $0x40] ss:$8 sps:$4 sm:$0xff]  }
 0xabc   :  { %v2095_v45 = vmul.f32 %v2063_v19, %v1839_v30  ;;  %v1848_v47 = vmul.f32 0.5, %v5107_v21  ;;  %v1847_v50 = vmul.f32 0.5, %v5100_v53  ;;  %v1845_v32 = vmul.f32 0.5, %v5089_v36  ;;  %v2861_v21 = vld [vmem:[#allocation17] ss:$0 sm:$0xff]  ;;  %2702 = vmatprep.subr.bf16.mxu0 %v3337_v8 }
 0xabd   :  { %2319 = vmatprep.mubr.bf16.mxu1 %v2116_v14  ;;  %v3335_v36 = vld [vmem:[#allocation22 + $0x60] ss:$8 sps:$4 sm:$0xff]   ;;  %v3344_v54 = vld [vmem:[#allocation22 + $0x30] ss:$8 sps:$4 sm:$0xff]   ;;  %v3346_v57 = vld [vmem:[#allocation22 + $0x34] ss:$8 sps:$4 sm:$0xff]  }
 0xabe   :  { %v2115_v15 = vpack.c.bf16 %v2095_v45, %v2093_v58  ;;  %v3349_v51 = vld [vmem:[#allocation22 + $0x24] ss:$8 sps:$4 sm:$0xff]   ;;  %v3347_v61 = vld [vmem:[#allocation22 + $0x20] ss:$8 sps:$4 sm:$0xff]   ;;  %v3352_v48 = vld [vmem:[#allocation22 + $0x14] ss:$8 sps:$4 sm:$0xff]  }
 0xabf   :  { %v3503_v60 = vpop.eup %3502  ;;  %2703 = vmatpush1.bf16.msra.mxu0 %v3335_v36  ;;  %v3350_v30 = vld [vmem:[#allocation22 + $0x10] ss:$8 sps:$4 sm:$0xff]   ;;  %v3355_v19 = vld [vmem:[#allocation22 + $0x4] ss:$8 sps:$4 sm:$0xff]  }
 0xac0   :  { %v3505_v12 = vpop.eup %3504  ;;  %2320 = vmatmul.mubr.bf16.gmra.mxu1 %v2115_v15  ;;  %v2066_v23 = vadd.f32 1.0, %v3503_v60  ;;  %2704 = vmatprep.subr.bf16.mxu0 %v3340_v59  ;;  %v3353_v15 = vld [vmem:[#allocation22] ss:$8 sps:$4 sm:$0xff]  }
 0xac1   :  { %v2068_v7 = vadd.f32 1.0, %v3505_v12 }
 0xac2   :  { %v3507_v6 = vpop.eup %3506  ;;  %v2098_v29 = vmul.f32 %v2066_v23, %v1842_v4 }
 0xac3   :  { %v3509_v33 = vpop.eup %3508  ;;  %v2100_v42 = vmul.f32 %v2068_v7, %v1844_v20  ;;  %v2065_v52 = vadd.f32 1.0, %v3507_v6  ;;  %2705 = vmatpush1.bf16.msra.mxu0 %v3338_v10 }
 0xac4   :  { %v3511_v16 = vpop.eup %3510  ;;  %v2067_v22 = vadd.f32 1.0, %v3509_v33 }
 0xac5   :  { %v2118_v63 = vpack.c.bf16 %v2100_v42, %v2098_v29  ;;  %v2070_v1 = vadd.f32 1.0, %v3511_v16  ;;  %v2097_v35 = vmul.f32 %v2065_v52, %v1841_v24 }
 0xac6   :  { %v3513_v56 = vpop.eup %3512  ;;  %v2099_v28 = vmul.f32 %v2067_v22, %v1843_v26 }
 0xac7   :  { %v3515_v31 = vpop.eup %3514  ;;  %v2072_v38 = vadd.f32 1.0, %v3513_v56  ;;  %2325 = vmatprep.mubr.bf16.mxu1 %v2118_v63  ;;  %v2102_v13 = vmul.f32 %v2070_v1, %v1846_v34  ;;  %v2870_v34 = vld [vmem:[#allocation20] ss:$0 sm:$0xff] }
 0xac8   :  { %v3517_v0 = vpop.eup %3516  ;;  %v2117_v37 = vpack.c.bf16 %v2099_v28, %v2097_v35  ;;  %v2069_v27 = vadd.f32 1.0, %v3515_v31 }
 0xac9   :  { %v2104_v62 = vmul.f32 %v2072_v38, %v1848_v47  ;;  %v2071_v49 = vadd.f32 1.0, %v3517_v0 }
 0xaca   :  { %2326 = vmatmul.mubr.bf16.gmra.mxu1 %v2117_v37  ;;  %v2101_v18 = vmul.f32 %v2069_v27, %v1845_v32 }
 0xacb   :  { %v2120_v25 = vpack.c.bf16 %v2104_v62, %v2102_v13  ;;  %v2103_v55 = vmul.f32 %v2071_v49, %v1847_v50 }
 0xacd   :  { %2331 = vmatprep.mubr.bf16.mxu1 %v2120_v25  ;;  %v2119_v41 = vpack.c.bf16 %v2103_v55, %v2101_v18 }
 0xad2   :  { %2332 = vmatmul.mubr.bf16.gmra.mxu1 %v2119_v41 }
 0xad3   :  { %3206 = vmatprep.mubr.msk.bf16.mxu1 %vm3897_vm0, %v3896_v5  ;;  %v3343_v5 = vld [vmem:[#allocation22 + $0x44] ss:$8 sps:$4 sm:$0xff]  }
 0xad4   :  { %2706 = vmatprep.subr.bf16.mxu0 %v3343_v5 }
 0xad5   :  { %2707 = vmatpush1.bf16.msra.mxu0 %v3341_v44 }
 0xad6   :  { %2708 = vmatprep.subr.bf16.mxu0 %v3346_v57 }
 0xad9   :  { %2709 = vmatpush1.bf16.msra.mxu0 %v3344_v54 }
 0xada   :  { %2710 = vmatprep.subr.bf16.mxu0 %v3349_v51 }
 0xadd   :  { %2711 = vmatpush1.bf16.msra.mxu0 %v3347_v61 }
 0xade   :  { %2712 = vmatprep.subr.bf16.mxu0 %v3352_v48 }
 0xae1   :  { %2713 = vmatpush1.bf16.msra.mxu0 %v3350_v30 }
 0xae2   :  { %2714 = vmatprep.subr.bf16.mxu0 %v3355_v19 }
 0xae5   :  { %2715 = vmatpush1.bf16.msra.mxu0 %v3353_v15 }
 0xb12   :  { %v2472_v3 = vpop.f32.mrf.mxu0 }
 0xb13   :  { %v2473_v17 = vadd.f32 %v2861_v21, %v2472_v3 }
 0xb14   :  { %v3188_v11 = vpop.f32.mrf.mxu0 }
 0xb15   :  { %v2478_v39 = vpack.c.bf16 %v2473_v17, %v2473_v17  ;;  %2741 = vst [vmem:[#allocation26] sm:$0x3] %v2473_v17 }
 0xb16   :  { %v2475_v40 = vpop.f32.mrf.mxu0 }
 0xb17   :  { %3207 = vmatmul.mubr.bf16.vlgmr.msra.gmra.mxu1 %v2478_v39 }
 0xb18   :  { %v3189_v53 = vpop.f32.mrf.mxu0 }
 0xb6f   :  { %v2994_v14 = vpop.f32.mrf.mxu1 }
 0xb71   :  { %v2995_v58 = vpop.f32.mrf.mxu1 }
 0xb73   :  { %v2997_v45 = vpop.f32.mrf.mxu1 }
 0xb75   :  { %v2998_v60 = vpop.f32.mrf.mxu1 }
 0xb77   :  { %v3000_v12 = vpop.f32.mrf.mxu1 }
 0xb79   :  { %v3001_v23 = vpop.f32.mrf.mxu1 }
 0xb7b   :  { %v3003_v4 = vpop.f32.mrf.mxu1 }
 0xb7d   :  { %v3004_v20 = vpop.f32.mrf.mxu1 }
 0xb80   :  { %v3006_v7 = vpop.f32.mrf.mxu1 }
 0xb82   :  { %v3007_v6 = vpop.f32.mrf.mxu1 }
 0xb84   :  { %v3009_v33 = vpop.f32.mrf.mxu1 }
 0xb86   :  { %v3010_v29 = vpop.f32.mrf.mxu1 }
 0xb8a   :  { %v3012_v42 = vpop.f32.mrf.mxu1 }
 0xb8c   :  { %v3013_v52 = vpop.f32.mrf.mxu1 }
 0xb8e   :  { %v3015_v16 = vpop.f32.mrf.mxu1 }
 0xb90   :  { %v3016_v24 = vpop.f32.mrf.mxu1 }
 0xb92   :  { %v3018_v26 = vpop.f32.mrf.mxu1 }
 0xb94   :  { %v3019_v22 = vpop.f32.mrf.mxu1 }
 0xb96   :  { %v3021_v56 = vpop.f32.mrf.mxu1 }
 0xb98   :  { %v3022_v63 = vpop.f32.mrf.mxu1 }
 0xbd7   :  { %v2584_v1 = vpop.f32.mrf.mxu1 }
 0xbd8   :  { %v2585_v31 = vadd.f32 %v2870_v34, %v2584_v1 }
 0xbd9   :  { %v3208_v35 = vpop.f32.mrf.mxu1 }
 0xbda   :  { %3518 = vtanh.f32 %v2585_v31 }
 0xbdb   :  { %v2587_v28 = vpop.f32.mrf.mxu1 }
 0xbdd   :  { %v3209_v47 = vpop.f32.mrf.mxu1 }
 0xbe7   :  { %v3519_v38 = vpop.eup %3518 }
 0xbe8   :  { %v2591_v0 = vpack.c.bf16 %v3519_v38, %v3519_v38 }
 0xbea   :  { %2733 = vmatmul.mubr.bf16.vlgmr.msra.gmra.mxu0 %v2591_v0 }
 0xbeb   :  { %3827 = shalt.err (!%p3824_p4)
}
 0xbec   :  { %2773 = dma.vmem_to_hbm [thread:$0]  %s2771_s28, 32, %s5173_s22, [#allocation27]   ;;  %v2608_v37 = vld [vmem:[#allocation23] sm:$0x3] }
 0xbed   :  { %v2613_v13 = vrot.slane %v2608_v37, %v4187_v43  ;;  %v2617_v62 = vrot.slane %v2608_v37, %v4196_v46  ;;  %s3899_s23 = smov [#allocation25]  }
 0xbee   :  { %s2760_s19 = sshll.u32 %s3899_s23, 4  ;;  %s2761_s19 = int_to_ptr.vmem [resolvable:$true] %s2760_s19 }
 0xbef   :  { %s3836_s20 = scalar_lea.vmem %s2761_s19, 64  ;;  %p3841_p6 = scmp.lt.s32.totalorder %s2761_s19, %s2761_s19 }
 0xbf0   :  { %p3837_p5 = scmp.ne.s32.totalorder %s2761_s19, %s3836_s20  ;;  %p3842_p7 = scmp.lt.s32.totalorder %s3836_s20, %s3836_s20 }
 0xbf2   :  { %p3843_p8 = por %p3842_p7, %p3841_p6 }
 0xbf4   :  { %p3844_p9 = pnand %p3843_p8, %p3837_p5 }
 0xcaa   :  { %v2734_v49 = vpop.f32.mrf.mxu0 }
 0xcab   :  { %v2735_v50 = vadd.f32 %v2734_v49, %v2613_v13 }
 0xcac   :  { %v2736_v25 = vpop.f32.mrf.mxu0 }
 0xcad   :  { %v2737_v27 = vadd.f32 %v2736_v25, %v2617_v62 }
 0xcae   :  { %v2738_v32 = vpop.f32.mrf.mxu0 }
 0xcaf   :  { %v2744_v55 = vcombine.low %v2735_v50, %v2737_v27 }
 0xcb0   :  { %v2739_v18 = vpop.f32.mrf.mxu0 }
 0xcb1   :  { %2895 = vst.sshfl [vmem:[#allocation25] sm:$0x33 pattern:$0x76325410] %v2744_v55 }
 0xcb2   :  { %3847 = shalt.err (!%p3844_p9)
}
 0xcb3   :  { %2763 = dma.vmem_to_hbm [thread:$0]  %s2761_s19, 64, %s5172_s21, [#allocation4]  }
 0xcb4   :  { %3872 = dma.done.wait [#allocation4], 64  }
 0xcb5   :  { %3873 = vsyncadd [#allocation4], 4294967232 }
 0xcb6   :  { %3874 = dma.done.wait [#allocation27], 32  }
 0xcb7   :  { %3875 = vsyncadd [#allocation27], 4294967264 }
 0xcb8   :  { %2780 = vsyncpa [#allocation3], 1 }
 0xcb9   :  { %2781 = vsyncpa [#allocation6], 1 }
 0xcba   :  { %2782 = vsyncpa [#allocation9], 1 }
 0xcbb   :  { %2783 = vsyncpa [#allocation12], 1 }
 0xcbc   :  { %2784 = vsyncpa [#allocation15], 1 }
 0xcbd   :  { %2785 = vsyncpa [#allocation18], 1 }
 0xcbe   :  { %2786 = vsyncpa [#allocation21], 1 }
 0xcbf   :  { %2787 = vsyncpa [#allocation24], 1 }
 0xcc0   :  { %2788 = vsyncpa [#allocation4], 1 }
 0xcc1   :  { %2789 = vsyncpa [#allocation27], 1 }

</bundles_post_ra>
